<compile_context>
chip_gen: v6e
topology: v6e:2x2x1
jax: 0.10.0
libtpu: 0.0.40
codegen_flags: <defaults>
</compile_context>

<pallas_src>
import jax
import jax.numpy as jnp
from jax import lax
from jax.experimental import pallas as pl
from jax.experimental.pallas import tpu as pltpu


# ------------------------------ fused kernel --------------------------------


def _core_block_kernel(x_ref, w1m_ref, w2_ref, w3_ref, wse1t_ref, wse2_ref,
                       aff1m_ref, aff23_ref, o_ref, pad1_ref, pad2_ref):
    # x_ref:    (1, H, W, Cin) f32       w1m_ref: (Cin, 2C) f32  = [w1 | wm]
    # w2_ref:   (9, 1, 1, C) f32 (tap-major depthwise)
    # w3_ref:   (9, C, C) bf16 (tap-major dense 3x3)
    # wse1t_ref:(Cr, C) f32              wse2_ref:(Cr, C) f32
    # aff1m_ref:(2, 2C) f32 = [[s1|sm],[t1|tm]]   aff23_ref:(4, C) = [s2,t2,s3,t3]
    # o_ref:    (1, H*W, C) f32
    # pad1_ref / pad2_ref: VMEM (H+2, W+2, C) f32 'same'-padding scratches
    _, H, W, Cin = x_ref.shape
    C = o_ref.shape[2]
    HW = H * W

    # ---- Zero ONLY the 1-wide halo ring of the padding scratches (every step:
    #      scratch VMEM is stale on first use per core, interior is overwritten).
    zrow = jnp.zeros((1, W + 2, C), jnp.float32)
    zcol = jnp.zeros((H, 1, C), jnp.float32)
    for pad in (pad1_ref, pad2_ref):
        pad[0:1, :, :] = zrow
        pad[H + 1:H + 2, :, :] = zrow
        pad[1:H + 1, 0:1, :] = zcol
        pad[1:H + 1, W + 1:W + 2, :] = zcol

    # ---- Stage 1 + residual branch: conv1 (1x1, +folded BN1) and match_channels
    #      (1x1, +folded BN) as ONE MXU dot against the concatenated weight.
    x0f = x_ref[0].reshape(HW, Cin)                              # (HW, Cin)
    hm = jnp.dot(x0f, w1m_ref[...],
                 preferred_element_type=jnp.float32)             # (HW, 2C)
    hm = hm * aff1m_ref[0:1] + aff1m_ref[1:2]                    # joint BN affine
    h1 = jnp.maximum(hm[:, :C], 0.0)                             # conv1 branch
    ident = hm[:, C:]                                            # residual branch

    pad1_ref[1:H + 1, 1:W + 1, :] = h1.reshape(H, W, C)

    # ---- Stage 2: depthwise 3x3 (groups=C) + folded BN2 + ReLU as 9 shifted
    #      VPU MACs over the padded tile.
    xp1 = pad1_ref[...]                                          # (H+2, W+2, C)
    acc = xp1[0:H, 0:W, :] * w2_ref[0]
    for t in range(1, 9):
        di, dj = divmod(t, 3)
        acc = acc + xp1[di:di + H, dj:dj + W, :] * w2_ref[t]
    s2 = aff23_ref[0:1].reshape(1, 1, C)
    t2 = aff23_ref[1:2].reshape(1, 1, C)
    h2 = jnp.maximum(acc * s2 + t2, 0.0)

    pad2_ref[1:H + 1, 1:W + 1, :] = h2

    # ---- Stage 3: dense 3x3 conv as 9 accumulating MXU dots
    #      (bf16 operands, f32 accumulation; no im2col scratch).
    xp2 = pad2_ref[...]
    y3 = jnp.dot(xp2[0:H, 0:W, :].reshape(HW, C).astype(jnp.bfloat16),
                 w3_ref[0], preferred_element_type=jnp.float32)  # (HW, C) f32
    for t in range(1, 9):
        di, dj = divmod(t, 3)
        patch = xp2[di:di + H, dj:dj + W, :].reshape(HW, C).astype(jnp.bfloat16)
        y3 = y3 + jnp.dot(patch, w3_ref[t], preferred_element_type=jnp.float32)
    y3 = y3 * aff23_ref[2:3] + aff23_ref[3:4]                    # folded BN3, no act.

    # ---- Squeeze-and-excitation gate on VPU/XLU (no M=1 MXU dots).
    pooled = jnp.mean(y3, axis=0, keepdims=True)                 # (1, C)
    e = jnp.maximum(
        jnp.sum(wse1t_ref[...] * pooled, axis=-1, keepdims=True), 0.0)   # (Cr, 1)
    gate = jax.nn.sigmoid(
        jnp.sum(e * wse2_ref[...], axis=0, keepdims=True))               # (1, C)

    # ---- Gate, residual add, final activation.
    o_ref[0] = jnp.maximum(y3 * gate + ident, 0.0)               # (HW, C)


# ------------------------------ module wrapper -------------------------------


def core_cnn_block(x_nchw, p):
    """CoreCNNBlock forward. Input/output NCHW (PyTorch convention)."""
    B, Cin, H, W = x_nchw.shape
    C = p["w1"].shape[1]
    Cr = p["wse1"].shape[1]

    # Kernel-layout parameter packing (plain JAX glue, constant work).
    w1m = jnp.concatenate([p["w1"], p["wm"]], axis=1)            # (Cin, 2C)
    w2 = p["w2"].reshape(9, 1, 1, C)                             # tap-major depthwise
    w3 = p["w3"].reshape(9, C, C).astype(jnp.bfloat16)           # tap-major dense
    wse1t = jnp.transpose(p["wse1"])                             # (Cr, C)
    aff1m = jnp.concatenate(
        [jnp.concatenate([p["s1"], p["sm"]], axis=1),
         jnp.concatenate([p["t1"], p["tm"]], axis=1)], axis=0)   # (2, 2C)
    aff23 = jnp.concatenate([p["s2"], p["t2"], p["s3"], p["t3"]], axis=0)  # (4, C)

    x = jnp.transpose(x_nchw, (0, 2, 3, 1))                      # -> NHWC

    flops = B * (2 * H * W * Cin * 2 * C        # conv1 + match_channels (fused dot)
                 + 2 * H * W * 9 * C            # depthwise 3x3
                 + 2 * H * W * 9 * C * C        # dense 3x3 (9 MXU dots)
                 + 4 * C * Cr                   # SE MLP
                 + 12 * H * W * C)              # BN/ReLU/gate/residual
    bytes_accessed = (4 * (x.size + B * H * W * C + w1m.size + w2.size
                           + wse1t.size + p["wse2"].size + aff1m.size + aff23.size)
                      + 2 * w3.size)
    cost = pl.CostEstimate(flops=flops, transcendentals=B * C,
                           bytes_accessed=bytes_accessed)

    out = pl.pallas_call(
        _core_block_kernel,
        out_shape=jax.ShapeDtypeStruct((B, H * W, C), jnp.float32),
        grid=(B,),
        in_specs=[
            pl.BlockSpec((1, H, W, Cin), lambda b: (b, 0, 0, 0)),
            pl.BlockSpec((Cin, 2 * C), lambda b: (0, 0)),
            pl.BlockSpec((9, 1, 1, C), lambda b: (0, 0, 0, 0)),
            pl.BlockSpec((9, C, C), lambda b: (0, 0, 0)),
            pl.BlockSpec((Cr, C), lambda b: (0, 0)),
            pl.BlockSpec((Cr, C), lambda b: (0, 0)),
            pl.BlockSpec((2, 2 * C), lambda b: (0, 0)),
            pl.BlockSpec((4, C), lambda b: (0, 0)),
        ],
        out_specs=pl.BlockSpec((1, H * W, C), lambda b: (b, 0, 0)),
        scratch_shapes=[
            pltpu.VMEM((H + 2, W + 2, C), jnp.float32),          # padded stage-1 out
            pltpu.VMEM((H + 2, W + 2, C), jnp.float32),          # padded stage-2 out
        ],
        compiler_params=pltpu.CompilerParams(
            dimension_semantics=("parallel",),                   # megacore shards B
            vmem_limit_bytes=16 * 1024 * 1024),
        cost_estimate=cost,
    )(x, w1m, w2, w3, wse1t, p["wse2"], aff1m, aff23)

    return jnp.transpose(out.reshape(B, H, W, C), (0, 3, 1, 2))  # -> NCHW


# --------------------------- params + reference ------------------------------


def init_params(key, cin, cout, reduction=16):
    cr = max(cout // reduction, 1)
    keys = jax.random.split(key, 32)
    ki = iter(keys)

    def nrm(shape, scale=0.1):
        return (scale * jax.random.normal(next(ki), shape)).astype(jnp.float32)

    def bn_params():
        gamma = 1.0 + nrm((cout,))
        beta = nrm((cout,))
        mean = nrm((cout,))
        var = jax.random.uniform(next(ki), (cout,), minval=0.5,
                                 maxval=1.5).astype(jnp.float32)
        return gamma, beta, mean, var

    def fold(bn, bias=None, eps=1e-5):
        gamma, beta, mean, var = bn
        s = gamma / jnp.sqrt(var + eps)
        t = beta - s * mean
        if bias is not None:
            t = t + s * bias
        return s.reshape(1, cout), t.reshape(1, cout)

    w1, b1 = nrm((cin, cout)), nrm((cout,))
    s1, t1 = fold(bn_params(), b1)
    w2, b2 = nrm((3, 3, 1, cout)), nrm((cout,))          # depthwise, HWIO
    s2, t2 = fold(bn_params(), b2)
    w3, b3 = nrm((3, 3, cout, cout)), nrm((cout,))       # dense 3x3, HWIO
    s3, t3 = fold(bn_params(), b3)
    wse1 = nrm((cout, cr))
    wse2 = nrm((cr, cout), scale=1.0)
    wm = nrm((cin, cout))                                # match_channels 1x1
    sm, tm = fold(bn_params())
    return dict(w1=w1, s1=s1, t1=t1, w2=w2, s2=s2, t2=t2,
                w3=w3, s3=s3, t3=t3, wse1=wse1, wse2=wse2,
                wm=wm, sm=sm, tm=tm)


def reference_nchw(x_nchw, p):
    """Pure-JAX (lax.conv) reference using the same folded parameters."""
    x = jnp.transpose(x_nchw, (0, 2, 3, 1))
    C = p["w1"].shape[1]

    def aff(h, s, t):
        return h * s.reshape(1, 1, 1, -1) + t.reshape(1, 1, 1, -1)

    h = jax.nn.relu(aff(jnp.einsum("bhwc,cd->bhwd", x, p["w1"]), p["s1"], p["t1"]))
    h = lax.conv_general_dilated(h, p["w2"], (1, 1), "SAME",
                                 dimension_numbers=("NHWC", "HWIO", "NHWC"),
                                 feature_group_count=C)
    h = jax.nn.relu(aff(h, p["s2"], p["t2"]))
    # conv3 in bf16 operands / f32 accumulation to mirror the kernel's MXU dtype.
    h = lax.conv_general_dilated(h.astype(jnp.bfloat16),
                                 p["w3"].astype(jnp.bfloat16),
                                 (1, 1), "SAME",
                                 dimension_numbers=("NHWC", "HWIO", "NHWC"),
                                 preferred_element_type=jnp.float32)
    h = aff(h, p["s3"], p["t3"])
    pooled = h.mean(axis=(1, 2))
    gate = jax.nn.sigmoid(jax.nn.relu(pooled @ p["wse1"]) @ p["wse2"])
    h = h * gate[:, None, None, :]
    ident = aff(jnp.einsum("bhwc,cd->bhwd", x, p["wm"]), p["sm"], p["tm"])
    return jnp.transpose(jax.nn.relu(h + ident), (0, 3, 1, 2))


# ---------------------------------- main -------------------------------------

if __name__ == "__main__":
    B, Cin, H, W = 2, 4, 16, 16
    Cout = 32  # divisible by SE reduction=16

    key = jax.random.PRNGKey(0)
    kx, kp = jax.random.split(key)
    x_nchw = jax.random.normal(kx, (B, Cin, H, W), dtype=jnp.float32)
    params = init_params(kp, Cin, Cout)

    out = jax.jit(core_cnn_block)(x_nchw, params)
    out = jax.block_until_ready(out)
    assert out.shape == (B, Cout, H, W), out.shape

    ref = reference_nchw(x_nchw, params)
    err = float(jnp.max(jnp.abs(out - ref)))
    assert err < 1e-2, f"max abs error vs reference: {err}"

    print("KERNEL_OK")
</pallas_src>

<mosaic_0001>
module attributes {stable_mosaic.version = 11 : i64} {
  func.func @_core_block_kernel(%arg0: i32, %arg1: memref<1x16x16x4xf32, #tpu.memory_space<vmem>>, %arg2: memref<4x64xf32, #tpu.memory_space<vmem>>, %arg3: memref<9x1x1x32xf32, #tpu.memory_space<vmem>>, %arg4: memref<9x32x32xbf16, #tpu.memory_space<vmem>>, %arg5: memref<2x32xf32, #tpu.memory_space<vmem>>, %arg6: memref<2x32xf32, #tpu.memory_space<vmem>>, %arg7: memref<2x64xf32, #tpu.memory_space<vmem>>, %arg8: memref<4x32xf32, #tpu.memory_space<vmem>>, %arg9: memref<1x256x32xf32, #tpu.memory_space<vmem>>, %arg10: memref<18x18x32xf32, #tpu.memory_space<vmem>>, %arg11: memref<18x18x32xf32, #tpu.memory_space<vmem>>) attributes {dimension_semantics = [#tpu.dimension_semantics<parallel>], iteration_bounds = array<i64: 2>, scalar_prefetch = 0 : i64, scratch_operands = 2 : i64, tpu.core_type = #tpu.core_type<tc>, window_params = [{transform_indices = @transform_0, window_bounds = array<i64: 1, 16, 16, 4>}, {pipeline_mode = #tpu.pipeline_mode<synchronous>, transform_indices = @transform_1, window_bounds = array<i64: 4, 64>}, {pipeline_mode = #tpu.pipeline_mode<synchronous>, transform_indices = @transform_2, window_bounds = array<i64: 9, 1, 1, 32>}, {pipeline_mode = #tpu.pipeline_mode<synchronous>, transform_indices = @transform_3, window_bounds = array<i64: 9, 32, 32>}, {pipeline_mode = #tpu.pipeline_mode<synchronous>, transform_indices = @transform_4, window_bounds = array<i64: 2, 32>}, {pipeline_mode = #tpu.pipeline_mode<synchronous>, transform_indices = @transform_5, window_bounds = array<i64: 2, 32>}, {pipeline_mode = #tpu.pipeline_mode<synchronous>, transform_indices = @transform_6, window_bounds = array<i64: 2, 64>}, {pipeline_mode = #tpu.pipeline_mode<synchronous>, transform_indices = @transform_7, window_bounds = array<i64: 4, 32>}, {transform_indices = @transform_8, window_bounds = array<i64: 1, 256, 32>}]} {
    %cst = arith.constant 0.000000e+00 : f32
    %0 = vector.broadcast %cst : f32 to vector<1x18x32xf32>
    %cst_0 = arith.constant 0.000000e+00 : f32
    %1 = vector.broadcast %cst_0 : f32 to vector<16x1x32xf32>
    %c0 = arith.constant 0 : index
    %c0_1 = arith.constant 0 : index
    %c0_2 = arith.constant 0 : index
    %2 = vector.load %arg10[%c0, %c0_1, %c0_2] : memref<18x18x32xf32, #tpu.memory_space<vmem>>, vector<1x18x32xf32>
    tpu.vector_store %arg10[%c0, %c0_1, %c0_2], %0 {strides = array<i32>} : memref<18x18x32xf32, #tpu.memory_space<vmem>>, vector<1x18x32xf32>,
    %c17 = arith.constant 17 : index
    %c0_3 = arith.constant 0 : index
    %c0_4 = arith.constant 0 : index
    %3 = vector.load %arg10[%c17, %c0_3, %c0_4] : memref<18x18x32xf32, #tpu.memory_space<vmem>>, vector<1x18x32xf32>
    tpu.vector_store %arg10[%c17, %c0_3, %c0_4], %0 {strides = array<i32>} : memref<18x18x32xf32, #tpu.memory_space<vmem>>, vector<1x18x32xf32>,
    %c1 = arith.constant 1 : index
    %c0_5 = arith.constant 0 : index
    %c0_6 = arith.constant 0 : index
    %4 = vector.load %arg10[%c1, %c0_5, %c0_6] : memref<18x18x32xf32, #tpu.memory_space<vmem>>, vector<16x1x32xf32>
    tpu.vector_store %arg10[%c1, %c0_5, %c0_6], %1 {strides = array<i32>} : memref<18x18x32xf32, #tpu.memory_space<vmem>>, vector<16x1x32xf32>,
    %c1_7 = arith.constant 1 : index
    %c17_8 = arith.constant 17 : index
    %c0_9 = arith.constant 0 : index
    %5 = vector.load %arg10[%c1_7, %c17_8, %c0_9] : memref<18x18x32xf32, #tpu.memory_space<vmem>>, vector<16x1x32xf32>
    tpu.vector_store %arg10[%c1_7, %c17_8, %c0_9], %1 {strides = array<i32>} : memref<18x18x32xf32, #tpu.memory_space<vmem>>, vector<16x1x32xf32>,
    %c0_10 = arith.constant 0 : index
    %c0_11 = arith.constant 0 : index
    %c0_12 = arith.constant 0 : index
    %6 = vector.load %arg11[%c0_10, %c0_11, %c0_12] : memref<18x18x32xf32, #tpu.memory_space<vmem>>, vector<1x18x32xf32>
    tpu.vector_store %arg11[%c0_10, %c0_11, %c0_12], %0 {strides = array<i32>} : memref<18x18x32xf32, #tpu.memory_space<vmem>>, vector<1x18x32xf32>,
    %c17_13 = arith.constant 17 : index
    %c0_14 = arith.constant 0 : index
    %c0_15 = arith.constant 0 : index
    %7 = vector.load %arg11[%c17_13, %c0_14, %c0_15] : memref<18x18x32xf32, #tpu.memory_space<vmem>>, vector<1x18x32xf32>
    tpu.vector_store %arg11[%c17_13, %c0_14, %c0_15], %0 {strides = array<i32>} : memref<18x18x32xf32, #tpu.memory_space<vmem>>, vector<1x18x32xf32>,
    %c1_16 = arith.constant 1 : index
    %c0_17 = arith.constant 0 : index
    %c0_18 = arith.constant 0 : index
    %8 = vector.load %arg11[%c1_16, %c0_17, %c0_18] : memref<18x18x32xf32, #tpu.memory_space<vmem>>, vector<16x1x32xf32>
    tpu.vector_store %arg11[%c1_16, %c0_17, %c0_18], %1 {strides = array<i32>} : memref<18x18x32xf32, #tpu.memory_space<vmem>>, vector<16x1x32xf32>,
    %c1_19 = arith.constant 1 : index
    %c17_20 = arith.constant 17 : index
    %c0_21 = arith.constant 0 : index
    %9 = vector.load %arg11[%c1_19, %c17_20, %c0_21] : memref<18x18x32xf32, #tpu.memory_space<vmem>>, vector<16x1x32xf32>
    tpu.vector_store %arg11[%c1_19, %c17_20, %c0_21], %1 {strides = array<i32>} : memref<18x18x32xf32, #tpu.memory_space<vmem>>, vector<16x1x32xf32>,
    %c0_22 = arith.constant 0 : index
    %c0_23 = arith.constant 0 : index
    %c0_24 = arith.constant 0 : index
    %c0_25 = arith.constant 0 : index
    %10 = vector.load %arg1[%c0_22, %c0_23, %c0_24, %c0_25] : memref<1x16x16x4xf32, #tpu.memory_space<vmem>>, vector<1x16x16x4xf32>
    %11 = vector.shape_cast %10 : vector<1x16x16x4xf32> to vector<16x16x4xf32>
    %12 = vector.shape_cast %11 : vector<16x16x4xf32> to vector<256x4xf32>
    %c0_26 = arith.constant 0 : index
    %c0_27 = arith.constant 0 : index
    %13 = vector.load %arg2[%c0_26, %c0_27] : memref<4x64xf32, #tpu.memory_space<vmem>>, vector<4x64xf32>
    %cst_28 = arith.constant dense<0.000000e+00> : vector<256x64xf32>
    %14 = tpu.matmul %12, %13, %cst_28 {dimension_numbers = #tpu.dot_dimension_numbers<[1], [0], [0], [1], [0, 0, 1, 1], [], []>} : vector<256x4xf32>, vector<4x64xf32>, vector<256x64xf32> -> vector<256x64xf32>
    %c0_29 = arith.constant 0 : index
    %c0_30 = arith.constant 0 : index
    %15 = vector.load %arg7[%c0_29, %c0_30] : memref<2x64xf32, #tpu.memory_space<vmem>>, vector<1x64xf32>
    %16 = vector.broadcast %15 : vector<1x64xf32> to vector<256x64xf32>
    %17 = arith.mulf %14, %16 : vector<256x64xf32>
    %c1_31 = arith.constant 1 : index
    %c0_32 = arith.constant 0 : index
    %18 = vector.load %arg7[%c1_31, %c0_32] : memref<2x64xf32, #tpu.memory_space<vmem>>, vector<1x64xf32>
    %19 = vector.broadcast %18 : vector<1x64xf32> to vector<256x64xf32>
    %20 = arith.addf %17, %19 : vector<256x64xf32>
    %21 = vector.extract_strided_slice %20 {offsets = [0, 0], sizes = [256, 32], strides = [1, 1]} : vector<256x64xf32> to vector<256x32xf32>
    %cst_33 = arith.constant 0.000000e+00 : f32
    %22 = vector.broadcast %cst_33 : f32 to vector<256x32xf32>
    %23 = arith.maximumf %21, %22 : vector<256x32xf32>
    %24 = vector.extract_strided_slice %20 {offsets = [0, 32], sizes = [256, 32], strides = [1, 1]} : vector<256x64xf32> to vector<256x32xf32>
    %25 = vector.shape_cast %23 : vector<256x32xf32> to vector<16x16x32xf32>
    %c1_34 = arith.constant 1 : index
    %c1_35 = arith.constant 1 : index
    %c0_36 = arith.constant 0 : index
    %26 = vector.load %arg10[%c1_34, %c1_35, %c0_36] : memref<18x18x32xf32, #tpu.memory_space<vmem>>, vector<16x16x32xf32>
    tpu.vector_store %arg10[%c1_34, %c1_35, %c0_36], %25 {strides = array<i32>} : memref<18x18x32xf32, #tpu.memory_space<vmem>>, vector<16x16x32xf32>,
    %c0_37 = arith.constant 0 : index
    %c0_38 = arith.constant 0 : index
    %c0_39 = arith.constant 0 : index
    %27 = vector.load %arg10[%c0_37, %c0_38, %c0_39] : memref<18x18x32xf32, #tpu.memory_space<vmem>>, vector<18x18x32xf32>
    %28 = vector.extract_strided_slice %27 {offsets = [0, 0, 0], sizes = [16, 16, 32], strides = [1, 1, 1]} : vector<18x18x32xf32> to vector<16x16x32xf32>
    %c0_40 = arith.constant 0 : index
    %c0_41 = arith.constant 0 : index
    %c0_42 = arith.constant 0 : index
    %c0_43 = arith.constant 0 : index
    %29 = vector.load %arg3[%c0_40, %c0_41, %c0_42, %c0_43] : memref<9x1x1x32xf32, #tpu.memory_space<vmem>>, vector<1x1x1x32xf32>
    %30 = vector.shape_cast %29 : vector<1x1x1x32xf32> to vector<1x1x32xf32>
    %31 = vector.broadcast %30 : vector<1x1x32xf32> to vector<16x16x32xf32>
    %32 = arith.mulf %28, %31 : vector<16x16x32xf32>
    %33 = vector.extract_strided_slice %27 {offsets = [0, 1, 0], sizes = [16, 16, 32], strides = [1, 1, 1]} : vector<18x18x32xf32> to vector<16x16x32xf32>
    %c1_44 = arith.constant 1 : index
    %c0_45 = arith.constant 0 : index
    %c0_46 = arith.constant 0 : index
    %c0_47 = arith.constant 0 : index
    %34 = vector.load %arg3[%c1_44, %c0_45, %c0_46, %c0_47] : memref<9x1x1x32xf32, #tpu.memory_space<vmem>>, vector<1x1x1x32xf32>
    %35 = vector.shape_cast %34 : vector<1x1x1x32xf32> to vector<1x1x32xf32>
    %36 = vector.broadcast %35 : vector<1x1x32xf32> to vector<16x16x32xf32>
    %37 = arith.mulf %33, %36 : vector<16x16x32xf32>
    %38 = arith.addf %32, %37 : vector<16x16x32xf32>
    %39 = vector.extract_strided_slice %27 {offsets = [0, 2, 0], sizes = [16, 16, 32], strides = [1, 1, 1]} : vector<18x18x32xf32> to vector<16x16x32xf32>
    %c2 = arith.constant 2 : index
    %c0_48 = arith.constant 0 : index
    %c0_49 = arith.constant 0 : index
    %c0_50 = arith.constant 0 : index
    %40 = vector.load %arg3[%c2, %c0_48, %c0_49, %c0_50] : memref<9x1x1x32xf32, #tpu.memory_space<vmem>>, vector<1x1x1x32xf32>
    %41 = vector.shape_cast %40 : vector<1x1x1x32xf32> to vector<1x1x32xf32>
    %42 = vector.broadcast %41 : vector<1x1x32xf32> to vector<16x16x32xf32>
    %43 = arith.mulf %39, %42 : vector<16x16x32xf32>
    %44 = arith.addf %38, %43 : vector<16x16x32xf32>
    %45 = vector.extract_strided_slice %27 {offsets = [1, 0, 0], sizes = [16, 16, 32], strides = [1, 1, 1]} : vector<18x18x32xf32> to vector<16x16x32xf32>
    %c3 = arith.constant 3 : index
    %c0_51 = arith.constant 0 : index
    %c0_52 = arith.constant 0 : index
    %c0_53 = arith.constant 0 : index
    %46 = vector.load %arg3[%c3, %c0_51, %c0_52, %c0_53] : memref<9x1x1x32xf32, #tpu.memory_space<vmem>>, vector<1x1x1x32xf32>
    %47 = vector.shape_cast %46 : vector<1x1x1x32xf32> to vector<1x1x32xf32>
    %48 = vector.broadcast %47 : vector<1x1x32xf32> to vector<16x16x32xf32>
    %49 = arith.mulf %45, %48 : vector<16x16x32xf32>
    %50 = arith.addf %44, %49 : vector<16x16x32xf32>
    %51 = vector.extract_strided_slice %27 {offsets = [1, 1, 0], sizes = [16, 16, 32], strides = [1, 1, 1]} : vector<18x18x32xf32> to vector<16x16x32xf32>
    %c4 = arith.constant 4 : index
    %c0_54 = arith.constant 0 : index
    %c0_55 = arith.constant 0 : index
    %c0_56 = arith.constant 0 : index
    %52 = vector.load %arg3[%c4, %c0_54, %c0_55, %c0_56] : memref<9x1x1x32xf32, #tpu.memory_space<vmem>>, vector<1x1x1x32xf32>
    %53 = vector.shape_cast %52 : vector<1x1x1x32xf32> to vector<1x1x32xf32>
    %54 = vector.broadcast %53 : vector<1x1x32xf32> to vector<16x16x32xf32>
    %55 = arith.mulf %51, %54 : vector<16x16x32xf32>
    %56 = arith.addf %50, %55 : vector<16x16x32xf32>
    %57 = vector.extract_strided_slice %27 {offsets = [1, 2, 0], sizes = [16, 16, 32], strides = [1, 1, 1]} : vector<18x18x32xf32> to vector<16x16x32xf32>
    %c5 = arith.constant 5 : index
    %c0_57 = arith.constant 0 : index
    %c0_58 = arith.constant 0 : index
    %c0_59 = arith.constant 0 : index
    %58 = vector.load %arg3[%c5, %c0_57, %c0_58, %c0_59] : memref<9x1x1x32xf32, #tpu.memory_space<vmem>>, vector<1x1x1x32xf32>
    %59 = vector.shape_cast %58 : vector<1x1x1x32xf32> to vector<1x1x32xf32>
    %60 = vector.broadcast %59 : vector<1x1x32xf32> to vector<16x16x32xf32>
    %61 = arith.mulf %57, %60 : vector<16x16x32xf32>
    %62 = arith.addf %56, %61 : vector<16x16x32xf32>
    %63 = vector.extract_strided_slice %27 {offsets = [2, 0, 0], sizes = [16, 16, 32], strides = [1, 1, 1]} : vector<18x18x32xf32> to vector<16x16x32xf32>
    %c6 = arith.constant 6 : index
    %c0_60 = arith.constant 0 : index
    %c0_61 = arith.constant 0 : index
    %c0_62 = arith.constant 0 : index
    %64 = vector.load %arg3[%c6, %c0_60, %c0_61, %c0_62] : memref<9x1x1x32xf32, #tpu.memory_space<vmem>>, vector<1x1x1x32xf32>
    %65 = vector.shape_cast %64 : vector<1x1x1x32xf32> to vector<1x1x32xf32>
    %66 = vector.broadcast %65 : vector<1x1x32xf32> to vector<16x16x32xf32>
    %67 = arith.mulf %63, %66 : vector<16x16x32xf32>
    %68 = arith.addf %62, %67 : vector<16x16x32xf32>
    %69 = vector.extract_strided_slice %27 {offsets = [2, 1, 0], sizes = [16, 16, 32], strides = [1, 1, 1]} : vector<18x18x32xf32> to vector<16x16x32xf32>
    %c7 = arith.constant 7 : index
    %c0_63 = arith.constant 0 : index
    %c0_64 = arith.constant 0 : index
    %c0_65 = arith.constant 0 : index
    %70 = vector.load %arg3[%c7, %c0_63, %c0_64, %c0_65] : memref<9x1x1x32xf32, #tpu.memory_space<vmem>>, vector<1x1x1x32xf32>
    %71 = vector.shape_cast %70 : vector<1x1x1x32xf32> to vector<1x1x32xf32>
    %72 = vector.broadcast %71 : vector<1x1x32xf32> to vector<16x16x32xf32>
    %73 = arith.mulf %69, %72 : vector<16x16x32xf32>
    %74 = arith.addf %68, %73 : vector<16x16x32xf32>
    %75 = vector.extract_strided_slice %27 {offsets = [2, 2, 0], sizes = [16, 16, 32], strides = [1, 1, 1]} : vector<18x18x32xf32> to vector<16x16x32xf32>
    %c8 = arith.constant 8 : index
    %c0_66 = arith.constant 0 : index
    %c0_67 = arith.constant 0 : index
    %c0_68 = arith.constant 0 : index
    %76 = vector.load %arg3[%c8, %c0_66, %c0_67, %c0_68] : memref<9x1x1x32xf32, #tpu.memory_space<vmem>>, vector<1x1x1x32xf32>
    %77 = vector.shape_cast %76 : vector<1x1x1x32xf32> to vector<1x1x32xf32>
    %78 = vector.broadcast %77 : vector<1x1x32xf32> to vector<16x16x32xf32>
    %79 = arith.mulf %75, %78 : vector<16x16x32xf32>
    %80 = arith.addf %74, %79 : vector<16x16x32xf32>
    %c0_69 = arith.constant 0 : index
    %c0_70 = arith.constant 0 : index
    %81 = vector.load %arg8[%c0_69, %c0_70] : memref<4x32xf32, #tpu.memory_space<vmem>>, vector<1x32xf32>
    %82 = vector.shape_cast %81 : vector<1x32xf32> to vector<1x1x32xf32>
    %c1_71 = arith.constant 1 : index
    %c0_72 = arith.constant 0 : index
    %83 = vector.load %arg8[%c1_71, %c0_72] : memref<4x32xf32, #tpu.memory_space<vmem>>, vector<1x32xf32>
    %84 = vector.shape_cast %83 : vector<1x32xf32> to vector<1x1x32xf32>
    %85 = vector.broadcast %82 : vector<1x1x32xf32> to vector<16x16x32xf32>
    %86 = arith.mulf %80, %85 : vector<16x16x32xf32>
    %87 = vector.broadcast %84 : vector<1x1x32xf32> to vector<16x16x32xf32>
    %88 = arith.addf %86, %87 : vector<16x16x32xf32>
    %cst_73 = arith.constant 0.000000e+00 : f32
    %89 = vector.broadcast %cst_73 : f32 to vector<16x16x32xf32>
    %90 = arith.maximumf %88, %89 : vector<16x16x32xf32>
    %c1_74 = arith.constant 1 : index
    %c1_75 = arith.constant 1 : index
    %c0_76 = arith.constant 0 : index
    %91 = vector.load %arg11[%c1_74, %c1_75, %c0_76] : memref<18x18x32xf32, #tpu.memory_space<vmem>>, vector<16x16x32xf32>
    tpu.vector_store %arg11[%c1_74, %c1_75, %c0_76], %90 {strides = array<i32>} : memref<18x18x32xf32, #tpu.memory_space<vmem>>, vector<16x16x32xf32>,
    %c0_77 = arith.constant 0 : index
    %c0_78 = arith.constant 0 : index
    %c0_79 = arith.constant 0 : index
    %92 = vector.load %arg11[%c0_77, %c0_78, %c0_79] : memref<18x18x32xf32, #tpu.memory_space<vmem>>, vector<18x18x32xf32>
    %93 = vector.extract_strided_slice %92 {offsets = [0, 0, 0], sizes = [16, 16, 32], strides = [1, 1, 1]} : vector<18x18x32xf32> to vector<16x16x32xf32>
    %94 = vector.shape_cast %93 : vector<16x16x32xf32> to vector<256x32xf32>
    %95 = arith.truncf %94 : vector<256x32xf32> to vector<256x32xbf16>
    %c0_80 = arith.constant 0 : index
    %c0_81 = arith.constant 0 : index
    %c0_82 = arith.constant 0 : index
    %96 = vector.load %arg4[%c0_80, %c0_81, %c0_82] : memref<9x32x32xbf16, #tpu.memory_space<vmem>>, vector<1x32x32xbf16>
    %97 = vector.shape_cast %96 : vector<1x32x32xbf16> to vector<32x32xbf16>
    %cst_83 = arith.constant dense<0.000000e+00> : vector<256x32xf32>
    %98 = tpu.matmul %95, %97, %cst_83 {dimension_numbers = #tpu.dot_dimension_numbers<[1], [0], [0], [1], [0, 0, 1, 1], [], []>} : vector<256x32xbf16>, vector<32x32xbf16>, vector<256x32xf32> -> vector<256x32xf32>
    %99 = vector.extract_strided_slice %92 {offsets = [0, 1, 0], sizes = [16, 16, 32], strides = [1, 1, 1]} : vector<18x18x32xf32> to vector<16x16x32xf32>
    %100 = vector.shape_cast %99 : vector<16x16x32xf32> to vector<256x32xf32>
    %101 = arith.truncf %100 : vector<256x32xf32> to vector<256x32xbf16>
    %c1_84 = arith.constant 1 : index
    %c0_85 = arith.constant 0 : index
    %c0_86 = arith.constant 0 : index
    %102 = vector.load %arg4[%c1_84, %c0_85, %c0_86] : memref<9x32x32xbf16, #tpu.memory_space<vmem>>, vector<1x32x32xbf16>
    %103 = vector.shape_cast %102 : vector<1x32x32xbf16> to vector<32x32xbf16>
    %cst_87 = arith.constant dense<0.000000e+00> : vector<256x32xf32>
    %104 = tpu.matmul %101, %103, %cst_87 {dimension_numbers = #tpu.dot_dimension_numbers<[1], [0], [0], [1], [0, 0, 1, 1], [], []>} : vector<256x32xbf16>, vector<32x32xbf16>, vector<256x32xf32> -> vector<256x32xf32>
    %105 = arith.addf %98, %104 : vector<256x32xf32>
    %106 = vector.extract_strided_slice %92 {offsets = [0, 2, 0], sizes = [16, 16, 32], strides = [1, 1, 1]} : vector<18x18x32xf32> to vector<16x16x32xf32>
    %107 = vector.shape_cast %106 : vector<16x16x32xf32> to vector<256x32xf32>
    %108 = arith.truncf %107 : vector<256x32xf32> to vector<256x32xbf16>
    %c2_88 = arith.constant 2 : index
    %c0_89 = arith.constant 0 : index
    %c0_90 = arith.constant 0 : index
    %109 = vector.load %arg4[%c2_88, %c0_89, %c0_90] : memref<9x32x32xbf16, #tpu.memory_space<vmem>>, vector<1x32x32xbf16>
    %110 = vector.shape_cast %109 : vector<1x32x32xbf16> to vector<32x32xbf16>
    %cst_91 = arith.constant dense<0.000000e+00> : vector<256x32xf32>
    %111 = tpu.matmul %108, %110, %cst_91 {dimension_numbers = #tpu.dot_dimension_numbers<[1], [0], [0], [1], [0, 0, 1, 1], [], []>} : vector<256x32xbf16>, vector<32x32xbf16>, vector<256x32xf32> -> vector<256x32xf32>
    %112 = arith.addf %105, %111 : vector<256x32xf32>
    %113 = vector.extract_strided_slice %92 {offsets = [1, 0, 0], sizes = [16, 16, 32], strides = [1, 1, 1]} : vector<18x18x32xf32> to vector<16x16x32xf32>
    %114 = vector.shape_cast %113 : vector<16x16x32xf32> to vector<256x32xf32>
    %115 = arith.truncf %114 : vector<256x32xf32> to vector<256x32xbf16>
    %c3_92 = arith.constant 3 : index
    %c0_93 = arith.constant 0 : index
    %c0_94 = arith.constant 0 : index
    %116 = vector.load %arg4[%c3_92, %c0_93, %c0_94] : memref<9x32x32xbf16, #tpu.memory_space<vmem>>, vector<1x32x32xbf16>
    %117 = vector.shape_cast %116 : vector<1x32x32xbf16> to vector<32x32xbf16>
    %cst_95 = arith.constant dense<0.000000e+00> : vector<256x32xf32>
    %118 = tpu.matmul %115, %117, %cst_95 {dimension_numbers = #tpu.dot_dimension_numbers<[1], [0], [0], [1], [0, 0, 1, 1], [], []>} : vector<256x32xbf16>, vector<32x32xbf16>, vector<256x32xf32> -> vector<256x32xf32>
    %119 = arith.addf %112, %118 : vector<256x32xf32>
    %120 = vector.extract_strided_slice %92 {offsets = [1, 1, 0], sizes = [16, 16, 32], strides = [1, 1, 1]} : vector<18x18x32xf32> to vector<16x16x32xf32>
    %121 = vector.shape_cast %120 : vector<16x16x32xf32> to vector<256x32xf32>
    %122 = arith.truncf %121 : vector<256x32xf32> to vector<256x32xbf16>
    %c4_96 = arith.constant 4 : index
    %c0_97 = arith.constant 0 : index
    %c0_98 = arith.constant 0 : index
    %123 = vector.load %arg4[%c4_96, %c0_97, %c0_98] : memref<9x32x32xbf16, #tpu.memory_space<vmem>>, vector<1x32x32xbf16>
    %124 = vector.shape_cast %123 : vector<1x32x32xbf16> to vector<32x32xbf16>
    %cst_99 = arith.constant dense<0.000000e+00> : vector<256x32xf32>
    %125 = tpu.matmul %122, %124, %cst_99 {dimension_numbers = #tpu.dot_dimension_numbers<[1], [0], [0], [1], [0, 0, 1, 1], [], []>} : vector<256x32xbf16>, vector<32x32xbf16>, vector<256x32xf32> -> vector<256x32xf32>
    %126 = arith.addf %119, %125 : vector<256x32xf32>
    %127 = vector.extract_strided_slice %92 {offsets = [1, 2, 0], sizes = [16, 16, 32], strides = [1, 1, 1]} : vector<18x18x32xf32> to vector<16x16x32xf32>
    %128 = vector.shape_cast %127 : vector<16x16x32xf32> to vector<256x32xf32>
    %129 = arith.truncf %128 : vector<256x32xf32> to vector<256x32xbf16>
    %c5_100 = arith.constant 5 : index
    %c0_101 = arith.constant 0 : index
    %c0_102 = arith.constant 0 : index
    %130 = vector.load %arg4[%c5_100, %c0_101, %c0_102] : memref<9x32x32xbf16, #tpu.memory_space<vmem>>, vector<1x32x32xbf16>
    %131 = vector.shape_cast %130 : vector<1x32x32xbf16> to vector<32x32xbf16>
    %cst_103 = arith.constant dense<0.000000e+00> : vector<256x32xf32>
    %132 = tpu.matmul %129, %131, %cst_103 {dimension_numbers = #tpu.dot_dimension_numbers<[1], [0], [0], [1], [0, 0, 1, 1], [], []>} : vector<256x32xbf16>, vector<32x32xbf16>, vector<256x32xf32> -> vector<256x32xf32>
    %133 = arith.addf %126, %132 : vector<256x32xf32>
    %134 = vector.extract_strided_slice %92 {offsets = [2, 0, 0], sizes = [16, 16, 32], strides = [1, 1, 1]} : vector<18x18x32xf32> to vector<16x16x32xf32>
    %135 = vector.shape_cast %134 : vector<16x16x32xf32> to vector<256x32xf32>
    %136 = arith.truncf %135 : vector<256x32xf32> to vector<256x32xbf16>
    %c6_104 = arith.constant 6 : index
    %c0_105 = arith.constant 0 : index
    %c0_106 = arith.constant 0 : index
    %137 = vector.load %arg4[%c6_104, %c0_105, %c0_106] : memref<9x32x32xbf16, #tpu.memory_space<vmem>>, vector<1x32x32xbf16>
    %138 = vector.shape_cast %137 : vector<1x32x32xbf16> to vector<32x32xbf16>
    %cst_107 = arith.constant dense<0.000000e+00> : vector<256x32xf32>
    %139 = tpu.matmul %136, %138, %cst_107 {dimension_numbers = #tpu.dot_dimension_numbers<[1], [0], [0], [1], [0, 0, 1, 1], [], []>} : vector<256x32xbf16>, vector<32x32xbf16>, vector<256x32xf32> -> vector<256x32xf32>
    %140 = arith.addf %133, %139 : vector<256x32xf32>
    %141 = vector.extract_strided_slice %92 {offsets = [2, 1, 0], sizes = [16, 16, 32], strides = [1, 1, 1]} : vector<18x18x32xf32> to vector<16x16x32xf32>
    %142 = vector.shape_cast %141 : vector<16x16x32xf32> to vector<256x32xf32>
    %143 = arith.truncf %142 : vector<256x32xf32> to vector<256x32xbf16>
    %c7_108 = arith.constant 7 : index
    %c0_109 = arith.constant 0 : index
    %c0_110 = arith.constant 0 : index
    %144 = vector.load %arg4[%c7_108, %c0_109, %c0_110] : memref<9x32x32xbf16, #tpu.memory_space<vmem>>, vector<1x32x32xbf16>
    %145 = vector.shape_cast %144 : vector<1x32x32xbf16> to vector<32x32xbf16>
    %cst_111 = arith.constant dense<0.000000e+00> : vector<256x32xf32>
    %146 = tpu.matmul %143, %145, %cst_111 {dimension_numbers = #tpu.dot_dimension_numbers<[1], [0], [0], [1], [0, 0, 1, 1], [], []>} : vector<256x32xbf16>, vector<32x32xbf16>, vector<256x32xf32> -> vector<256x32xf32>
    %147 = arith.addf %140, %146 : vector<256x32xf32>
    %148 = vector.extract_strided_slice %92 {offsets = [2, 2, 0], sizes = [16, 16, 32], strides = [1, 1, 1]} : vector<18x18x32xf32> to vector<16x16x32xf32>
    %149 = vector.shape_cast %148 : vector<16x16x32xf32> to vector<256x32xf32>
    %150 = arith.truncf %149 : vector<256x32xf32> to vector<256x32xbf16>
    %c8_112 = arith.constant 8 : index
    %c0_113 = arith.constant 0 : index
    %c0_114 = arith.constant 0 : index
    %151 = vector.load %arg4[%c8_112, %c0_113, %c0_114] : memref<9x32x32xbf16, #tpu.memory_space<vmem>>, vector<1x32x32xbf16>
    %152 = vector.shape_cast %151 : vector<1x32x32xbf16> to vector<32x32xbf16>
    %cst_115 = arith.constant dense<0.000000e+00> : vector<256x32xf32>
    %153 = tpu.matmul %150, %152, %cst_115 {dimension_numbers = #tpu.dot_dimension_numbers<[1], [0], [0], [1], [0, 0, 1, 1], [], []>} : vector<256x32xbf16>, vector<32x32xbf16>, vector<256x32xf32> -> vector<256x32xf32>
    %154 = arith.addf %147, %153 : vector<256x32xf32>
    %c2_116 = arith.constant 2 : index
    %c0_117 = arith.constant 0 : index
    %155 = vector.load %arg8[%c2_116, %c0_117] : memref<4x32xf32, #tpu.memory_space<vmem>>, vector<1x32xf32>
    %156 = vector.broadcast %155 : vector<1x32xf32> to vector<256x32xf32>
    %157 = arith.mulf %154, %156 : vector<256x32xf32>
    %c3_118 = arith.constant 3 : index
    %c0_119 = arith.constant 0 : index
    %158 = vector.load %arg8[%c3_118, %c0_119] : memref<4x32xf32, #tpu.memory_space<vmem>>, vector<1x32xf32>
    %159 = vector.broadcast %158 : vector<1x32xf32> to vector<256x32xf32>
    %160 = arith.addf %157, %159 : vector<256x32xf32>
    %cst_120 = arith.constant dense<0.000000e+00> : vector<32xf32>
    %161 = vector.multi_reduction <add>, %160, %cst_120 [0] : vector<256x32xf32> to vector<32xf32>
    %162 = vector.shape_cast %161 : vector<32xf32> to vector<1x32xf32>
    %cst_121 = arith.constant 2.560000e+02 : f32
    %163 = vector.broadcast %cst_121 : f32 to vector<1x32xf32>
    %164 = arith.divf %162, %163 : vector<1x32xf32>
    %c0_122 = arith.constant 0 : index
    %c0_123 = arith.constant 0 : index
    %165 = vector.load %arg5[%c0_122, %c0_123] : memref<2x32xf32, #tpu.memory_space<vmem>>, vector<2x32xf32>
    %166 = vector.broadcast %164 : vector<1x32xf32> to vector<2x32xf32>
    %167 = arith.mulf %165, %166 : vector<2x32xf32>
    %cst_124 = arith.constant dense<0.000000e+00> : vector<2xf32>
    %168 = vector.multi_reduction <add>, %167, %cst_124 [1] : vector<2x32xf32> to vector<2xf32>
    %169 = vector.shape_cast %168 : vector<2xf32> to vector<2x1xf32>
    %cst_125 = arith.constant 0.000000e+00 : f32
    %170 = vector.broadcast %cst_125 : f32 to vector<2x1xf32>
    %171 = arith.maximumf %169, %170 : vector<2x1xf32>
    %c0_126 = arith.constant 0 : index
    %c0_127 = arith.constant 0 : index
    %172 = vector.load %arg6[%c0_126, %c0_127] : memref<2x32xf32, #tpu.memory_space<vmem>>, vector<2x32xf32>
    %173 = vector.broadcast %171 : vector<2x1xf32> to vector<2x32xf32>
    %174 = arith.mulf %173, %172 : vector<2x32xf32>
    %cst_128 = arith.constant dense<0.000000e+00> : vector<32xf32>
    %175 = vector.multi_reduction <add>, %174, %cst_128 [0] : vector<2x32xf32> to vector<32xf32>
    %176 = vector.shape_cast %175 : vector<32xf32> to vector<1x32xf32>
    %177 = arith.negf %176 : vector<1x32xf32>
    %178 = math.exp %177 : vector<1x32xf32>
    %cst_129 = arith.constant 1.000000e+00 : f32
    %179 = vector.broadcast %cst_129 : f32 to vector<1x32xf32>
    %180 = arith.addf %179, %178 : vector<1x32xf32>
    %181 = arith.divf %179, %180 : vector<1x32xf32>
    %182 = vector.broadcast %181 : vector<1x32xf32> to vector<256x32xf32>
    %183 = arith.mulf %160, %182 : vector<256x32xf32>
    %184 = arith.addf %183, %24 : vector<256x32xf32>
    %cst_130 = arith.constant 0.000000e+00 : f32
    %185 = vector.broadcast %cst_130 : f32 to vector<256x32xf32>
    %186 = arith.maximumf %184, %185 : vector<256x32xf32>
    %c0_131 = arith.constant 0 : index
    %c0_132 = arith.constant 0 : index
    %c0_133 = arith.constant 0 : index
    %187 = vector.load %arg9[%c0_131, %c0_132, %c0_133] : memref<1x256x32xf32, #tpu.memory_space<vmem>>, vector<1x256x32xf32>
    %188 = vector.shape_cast %187 : vector<1x256x32xf32> to vector<256x32xf32>
    %189 = vector.shape_cast %186 : vector<256x32xf32> to vector<1x256x32xf32>
    tpu.vector_store %arg9[%c0_131, %c0_132, %c0_133], %189 {strides = array<i32>} : memref<1x256x32xf32, #tpu.memory_space<vmem>>, vector<1x256x32xf32>,
    return
  }
  func.func @transform_0(%arg0: i32) -> (i32, i32, i32, i32) {
    %c0_i32 = arith.constant 0 : i32
    %c0_i32_0 = arith.constant 0 : i32
    %c0_i32_1 = arith.constant 0 : i32
    %c0_i32_2 = arith.constant 0 : i32
    return %arg0, %c0_i32, %c0_i32_0, %c0_i32_1 : i32, i32, i32, i32
  }
  func.func @transform_1(%arg0: i32) -> (i32, i32) {
    %c0_i32 = arith.constant 0 : i32
    %c0_i32_0 = arith.constant 0 : i32
    %c0_i32_1 = arith.constant 0 : i32
    return %c0_i32, %c0_i32_0 : i32, i32
  }
  func.func @transform_2(%arg0: i32) -> (i32, i32, i32, i32) {
    %c0_i32 = arith.constant 0 : i32
    %c0_i32_0 = arith.constant 0 : i32
    %c0_i32_1 = arith.constant 0 : i32
    %c0_i32_2 = arith.constant 0 : i32
    %c0_i32_3 = arith.constant 0 : i32
    return %c0_i32, %c0_i32_0, %c0_i32_1, %c0_i32_2 : i32, i32, i32, i32
  }
  func.func @transform_3(%arg0: i32) -> (i32, i32, i32) {
    %c0_i32 = arith.constant 0 : i32
    %c0_i32_0 = arith.constant 0 : i32
    %c0_i32_1 = arith.constant 0 : i32
    %c0_i32_2 = arith.constant 0 : i32
    return %c0_i32, %c0_i32_0, %c0_i32_1 : i32, i32, i32
  }
  func.func @transform_4(%arg0: i32) -> (i32, i32) {
    %c0_i32 = arith.constant 0 : i32
    %c0_i32_0 = arith.constant 0 : i32
    %c0_i32_1 = arith.constant 0 : i32
    return %c0_i32, %c0_i32_0 : i32, i32
  }
  func.func @transform_5(%arg0: i32) -> (i32, i32) {
    %c0_i32 = arith.constant 0 : i32
    %c0_i32_0 = arith.constant 0 : i32
    %c0_i32_1 = arith.constant 0 : i32
    return %c0_i32, %c0_i32_0 : i32, i32
  }
  func.func @transform_6(%arg0: i32) -> (i32, i32) {
    %c0_i32 = arith.constant 0 : i32
    %c0_i32_0 = arith.constant 0 : i32
    %c0_i32_1 = arith.constant 0 : i32
    return %c0_i32, %c0_i32_0 : i32, i32
  }
  func.func @transform_7(%arg0: i32) -> (i32, i32) {
    %c0_i32 = arith.constant 0 : i32
    %c0_i32_0 = arith.constant 0 : i32
    %c0_i32_1 = arith.constant 0 : i32
    return %c0_i32, %c0_i32_0 : i32, i32
  }
  func.func @transform_8(%arg0: i32) -> (i32, i32, i32) {
    %c0_i32 = arith.constant 0 : i32
    %c0_i32_0 = arith.constant 0 : i32
    %c0_i32_1 = arith.constant 0 : i32
    return %arg0, %c0_i32, %c0_i32_0 : i32, i32, i32
  }
}

</mosaic_0001>

<bundles_post_ra>
// kernel: core_cnn_block.1
= control target key start
LH: loop header
LB: loop body
LE: loop exit
PB: predicated region body
PF: predicated region fallthrough
CT: control target
= control target key end

     0   :  { %13 = vsyncpa [#allocation5], 0  ;;  %s11043_s0 = inlined_call_operand.vmem [shape: f32[2,16,16,4], index: 0, kind: input, shape index: {}]   ;;  %s11044_s1 = inlined_call_operand.vmem [shape: f32[4,64], index: 1, kind: input, shape index: {}]   ;;  %s11045_s2 = inlined_call_operand.vmem [shape: f32[9,1,1,32], index: 2, kind: input, shape index: {}]   ;;  %s11046_s3 = inlined_call_operand.vmem [shape: bf16[9,32,32], index: 3, kind: input, shape index: {}]   ;;  %s11047_s4 = inlined_call_operand.vmem [shape: f32[2,32], index: 4, kind: input, shape index: {}]   ;;  %s11048_s5 = inlined_call_operand.vmem [shape: f32[2,32], index: 5, kind: input, shape index: {}]   ;;  %s11049_s6 = inlined_call_operand.vmem [shape: f32[2,64], index: 6, kind: input, shape index: {}]   ;;  %s11050_s7 = inlined_call_operand.vmem [shape: f32[4,32], index: 7, kind: input, shape index: {}]   ;;  %s11051_s8 = inlined_call_operand.hbm [shape: f32[2,256,32], index: 8, kind: output, shape index: {}]  }
   0x1   :  { %15 = vsyncpa [#allocation5 + $0x1], 0  ;;  %s6713_s27 = smov 0   ;;  %s6715_s28 = smov 0  }
   0x2   :  { %s6717_s29 = smov 0   ;;  %s6719_s30 = smov 0  }
   0x3 LB: > { %s6734_s9 = sadd.s32 4294967295, %s6661_s30   ;;  %s5649_s10 = sadd.s32 4294967294, %s6661_s30   ;;  %s6661_s30 = sphi %s6719_s30, %s12008_s30   ;;  %s6657_s29 = sphi %s6717_s29, %s12007_s29   ;;  %s6653_s28 = sphi %s6715_s28, %s12006_s28   ;;  %s6649_s27 = sphi %s6713_s27, %s12005_s27  }
   0x4   : > { %s6738_s11 = sadd.s32 1, %s6661_s30   ;;  %s201_s12 = sadd.s32 1, %s6657_s29 }
   0x5   : > { %s198_s13 = ssub.s32 %s6661_s30, %s6738_s11  ;;  %p211_p0 = scmp.ne.s32.totalorder %s6657_s29, %s6653_s28 }
   0x6   : > { %p199_p1 = scmp.eq.s32.totalorder %s198_s13, 0  ;;  %p212_p2 = scmp.eq.s32.totalorder %s6734_s9, 1 }
   0x7   : > { %p217_p3 = scmp.ne.s32.totalorder %s6653_s28, %s6649_s27  ;;  %p218_p4 = scmp.eq.s32.totalorder %s5649_s10, 1 }
   0x8   : > { %s6749_s14 = scalar_select %p199_p1, %s6657_s29, %s201_s12  }
   0x9   : > { %p6751_p5 = por %p212_p2, %p211_p0  ;;  %p6755_p6 = por %p218_p4, %p217_p3 }
   0xa   : > { %p5652_p7 = scmp.ge.s32.totalorder %s6661_s30, 1  ;;  %p265_p8 = scmp.lt.s32.totalorder %s6661_s30, 3 }
   0xc   : > { %p266_p9 = pnand %p5652_p7, %p265_p8 }
   0xe   : > { %269 = sbr.rel (%p266_p9) target bundleno = 1339 (0x53b), region = 52 }
  0x13   : > { %v420_v0 = vld [vmem:[%s11044_s1] sm:$0xf]  ;;  %vm518_vm0 = vcmask 1043456   ;;  %p299_p10 = scmp.lt.s32.totalorder %s6734_s9, 1  ;;  %vm421_vm1 = vcmask 31744   ;;  %vm305_vm2 = vcmask 261120  }
  0x14   : > { %6109 = vmatprep.subr.msk.mxu0 %vm518_vm0, %v420_v0  ;;  %v6663_v33 = vmov 0.0   ;;  %vm315_vm3 = vcmask 253952   ;;  %vm308_vm4 = vcmask 254976   ;;  %v6526_v34 = vld [vmem:[%s11046_s3 + $0x8] sm:$0xff]   ;;  %v6527_v35 = vld [vmem:[%s11046_s3 + $0x18] sm:$0xff]   ;;  %v6528_v36 = vld [vmem:[%s11046_s3] sm:$0xff]  }
  0x15   : > { %6110 = vmatpush3.msk.msra.mxu0 %vm518_vm0, %v420_v0  ;;  %s300_s19 = scalar_select %p299_p10, %s6734_s9, 1  ;;  %306 = vst.msk [vmem:[#allocation2] sm:$0xff] %vm305_vm2, %v6663_v33  ;;  %307 = vst.msk [vmem:[#allocation2 + $0x8] sm:$0xff] %vm305_vm2, %v6663_v33  ;;  %6159 = vmatprep.subr.bf16.mxu1 %v6527_v35  ;;  %v6999_v37 = vld [vmem:[%s11045_s2 + $0x1] ss:$0 sm:$0xff]  ;;  %v6529_v51 = vld [vmem:[%s11046_s3 + $0x10] sm:$0xff]  }
  0x16   : > { %311 = vst.msk [vmem:[#allocation2 + $0x198] sm:$0xff] %vm305_vm2, %v6663_v33  ;;  %312 = vst.msk [vmem:[#allocation2 + $0x1a0] sm:$0xff] %vm305_vm2, %v6663_v33  ;;  %6195 = vmatprep.subr.bf16.mxu0 %v6526_v34  ;;  %6160 = vmatpush3.bf16.msra.mxu1 %v6527_v35  ;;  %v7004_v39 = vld [vmem:[%s11049_s6] ss:$0 sm:$0xff]  ;;  %v7009_v43 = vld [vmem:[%s11049_s6 + $0x1] ss:$0 sm:$0xff] }
  0x17   : > { %s5912_s20 = sshll.u32 %s300_s19, 8  ;;  %348 = vst.msk [vmem:[#allocation3] sm:$0xff] %vm305_vm2, %v6663_v33  ;;  %349 = vst.msk [vmem:[#allocation3 + $0x8] sm:$0xff] %vm305_vm2, %v6663_v33  ;;  %v7022_v54 = vld [vmem:[%s11045_s2 + $0x2] ss:$0 sm:$0xff]  ;;  %vm1082_vm5 = vcmask 1046528   ;;  %6161 = vmatprep.subr.bf16.mxu1 %v6529_v51 }
  0x18   : > { %s6769_s23 = scalar_lea.vmem %s11043_s0, %s5912_s20  ;;  %352 = vst.msk [vmem:[#allocation3 + $0x198] sm:$0xff] %vm305_vm2, %v6663_v33  ;;  %353 = vst.msk [vmem:[#allocation3 + $0x1a0] sm:$0xff] %vm305_vm2, %v6663_v33  ;;  %s6664_s10 = smov 96   ;;  %v7031_v60 = vld [vmem:[%s11045_s2] ss:$0 sm:$0xff]  ;;  %vm1331_vm6 = vcmask 1045504  }
  0x19   : > { %v388_v1 = vld [vmem:[%s6769_s23] sm:$0xff]  ;;  %v389_v2 = vld [vmem:[%s6769_s23 + $0x8] sm:$0xff]  ;;  %v390_v3 = vld [vmem:[%s6769_s23 + $0x10] sm:$0xff]  ;;  %333 = vst.msk [vmem:[#allocation2 + $0x41] sm:$0x1] %vm315_vm3, %v6663_v33  ;;  %s296_s13 = sand.u32 1, %s6653_s28  }
  0x1a   : > { %6111 = vmatprep.mubr.msk.f32.mxu0 %vm421_vm1, %v388_v1  ;;  %v391_v4 = vld [vmem:[%s6769_s23 + $0x18] sm:$0xff]  ;;  %v392_v5 = vld [vmem:[%s6769_s23 + $0x20] sm:$0xff]  ;;  %v393_v6 = vld [vmem:[%s6769_s23 + $0x28] sm:$0xff]  ;;  %316 = vst.msk [vmem:[#allocation2 + $0x18] sm:$0x1] %vm315_vm3, %v6663_v33  ;;  %6162 = vmatpush3.bf16.msra.mxu1 %v6529_v51  ;;  %s5653_s17 = sshll.u32 %s296_s13, 8 }
  0x1b   : > { %6112 = vmatmul.mubr.msk.f32.vlgmr.msra.gmra.mxu0 %vm421_vm1, %v389_v2  ;;  %v394_v7 = vld [vmem:[%s6769_s23 + $0x30] sm:$0xff]  ;;  %v395_v8 = vld [vmem:[%s6769_s23 + $0x38] sm:$0xff]  ;;  %v396_v9 = vld [vmem:[%s6769_s23 + $0x40] sm:$0xff]  ;;  %317 = vst.msk [vmem:[#allocation2 + $0x30] sm:$0x1] %vm315_vm3, %v6663_v33  ;;  %s10904_s18 = scalar_lea.vmem [#allocation4], %s5653_s17 }
  0x1c   : > { %6114 = vmatprep.mubr.msk.f32.mxu0 %vm421_vm1, %v390_v3  ;;  %v397_v10 = vld [vmem:[%s6769_s23 + $0x48] sm:$0xff]  ;;  %v398_v11 = vld [vmem:[%s6769_s23 + $0x50] sm:$0xff]  ;;  %v399_v12 = vld [vmem:[%s6769_s23 + $0x58] sm:$0xff]  ;;  %318 = vst.msk [vmem:[#allocation2 + $0x48] sm:$0x1] %vm315_vm3, %v6663_v33  ;;  %6196 = vmatpush3.bf16.msra.mxu0 %v6526_v34  ;;  %s5913_s19 = sshll.u32 %s6734_s9, 12 }
  0x1d   : > { %v400_v13 = vld [vmem:[%s6769_s23 + $0x60] sm:$0xff]  ;;  %v401_v14 = vld [vmem:[%s6769_s23 + $0x68] sm:$0xff]  ;;  %v402_v15 = vld [vmem:[%s6769_s23 + $0x70] sm:$0xff]  ;;  %319 = vst.msk [vmem:[#allocation2 + $0x60] sm:$0x1] %vm315_vm3, %v6663_v33  ;;  %6197 = vmatprep.subr.bf16.mxu0 %v6528_v36  ;;  %s5587_s20 = sshll.u32 %s10904_s18, 4  ;;  %s10983_s22 = scalar_lea.hbm %s11051_s8, %s5913_s19  ;;  %s10985_s20 = int_to_ptr.vmem [resolvable:$true] %s5587_s20 }
  0x1e   : > { %v403_v16 = vld [vmem:[%s6769_s23 + $0x78] sm:$0xff]  ;;  %v404_v17 = vld [vmem:[%s6769_s23 + $0x80] sm:$0xff]  ;;  %v405_v18 = vld [vmem:[%s6769_s23 + $0x88] sm:$0xff]  ;;  %320 = vst.msk [vmem:[#allocation2 + $0x78] sm:$0x1] %vm315_vm3, %v6663_v33  ;;  %s6601_s24 = scalar_lea.vmem %s10985_s20, 4096 }
  0x1f   : > { %6115 = vmatmul.mubr.msk.f32.gmra.mxu0 %vm421_vm1, %v391_v4  ;;  %v406_v19 = vld [vmem:[%s6769_s23 + $0x90] sm:$0xff]  ;;  %v407_v20 = vld [vmem:[%s6769_s23 + $0x98] sm:$0xff]  ;;  %v408_v21 = vld [vmem:[%s6769_s23 + $0xa0] sm:$0xff]  ;;  %321 = vst.msk [vmem:[#allocation2 + $0x90] sm:$0x1] %vm315_vm3, %v6663_v33  ;;  %p6602_p11 = scmp.ne.s32.totalorder %s10985_s20, %s6601_s24  ;;  %s6665_s25 = smov [#allocation4]  }
  0x20   : > { %6117 = vmatprep.mubr.msk.f32.mxu0 %vm421_vm1, %v392_v5  ;;  %v409_v22 = vld [vmem:[%s6769_s23 + $0xa8] sm:$0xff]  ;;  %v410_v23 = vld [vmem:[%s6769_s23 + $0xb0] sm:$0xff]  ;;  %v411_v24 = vld [vmem:[%s6769_s23 + $0xb8] sm:$0xff]  ;;  %322 = vst.msk [vmem:[#allocation2 + $0xa8] sm:$0x1] %vm315_vm3, %v6663_v33  ;;  %6198 = vmatpush3.bf16.msra.mxu0 %v6528_v36  ;;  %s6605_s26 = sshll.u32 %s6665_s25, 4  ;;  %s6606_s26 = int_to_ptr.vmem [resolvable:$false] %s6605_s26 }
  0x21   : > { %v412_v25 = vld [vmem:[%s6769_s23 + $0xc0] sm:$0xff]  ;;  %v413_v26 = vld [vmem:[%s6769_s23 + $0xc8] sm:$0xff]  ;;  %v414_v27 = vld [vmem:[%s6769_s23 + $0xd0] sm:$0xff]  ;;  %323 = vst.msk [vmem:[#allocation2 + $0xc0] sm:$0x1] %vm315_vm3, %v6663_v33  ;;  %p6603_p12 = pnand %p6602_p11, %p6751_p5  ;;  %p6608_p0 = scmp.lt.s32.totalorder %s10985_s20, %s6606_s26 }
  0x22   : > { %v415_v28 = vld [vmem:[%s6769_s23 + $0xd8] sm:$0xff]  ;;  %v416_v29 = vld [vmem:[%s6769_s23 + $0xe0] sm:$0xff]  ;;  %v417_v30 = vld [vmem:[%s6769_s23 + $0xe8] sm:$0xff]  ;;  %324 = vst.msk [vmem:[#allocation2 + $0xd8] sm:$0x1] %vm315_vm3, %v6663_v33 }
  0x23   : > { %6118 = vmatmul.mubr.msk.f32.gmra.mxu0 %vm421_vm1, %v393_v6  ;;  %v418_v31 = vld [vmem:[%s6769_s23 + $0xf0] sm:$0xff]  ;;  %v419_v32 = vld [vmem:[%s6769_s23 + $0xf8] sm:$0xff]  ;;  %325 = vst.msk [vmem:[#allocation2 + $0xf0] sm:$0x1] %vm315_vm3, %v6663_v33  ;;  %326 = vst.msk [vmem:[#allocation2 + $0x108] sm:$0x1] %vm315_vm3, %v6663_v33  ;;  %p6604_p13 = pneg %p6603_p12 }
  0x24   : > { %6120 = vmatprep.mubr.msk.f32.mxu0 %vm421_vm1, %v394_v7  ;;  %327 = vst.msk [vmem:[#allocation2 + $0x120] sm:$0x1] %vm315_vm3, %v6663_v33  ;;  %328 = vst.msk [vmem:[#allocation2 + $0x138] sm:$0x1] %vm315_vm3, %v6663_v33  ;;  %v885_v38 = vld [vmem:[#allocation2] sm:$0xff]  ;;  %v886_v40 = vld [vmem:[#allocation2 + $0x8] sm:$0xff] }
  0x25   : > { %329 = vst.msk [vmem:[#allocation2 + $0x150] sm:$0x1] %vm315_vm3, %v6663_v33  ;;  %330 = vst.msk [vmem:[#allocation2 + $0x168] sm:$0x1] %vm315_vm3, %v6663_v33  ;;  %v986_v44 = vmul.f32 %v6999_v37, %v885_v38  ;;  %v987_v46 = vmul.f32 %v6999_v37, %v886_v40  ;;  %v2750_v47 = vld [vmem:[#allocation3] sm:$0xff]  ;;  %v2751_v48 = vld [vmem:[#allocation3 + $0x8] sm:$0xff]  ;;  %v1235_v1 = vmul.f32 %v7022_v54, %v885_v38 }
  0x26   : > { %331 = vst.msk [vmem:[#allocation2 + $0x180] sm:$0x1] %vm315_vm3, %v6663_v33  ;;  %332 = vst.msk [vmem:[#allocation2 + $0x29] sm:$0x1] %vm315_vm3, %v6663_v33  ;;  %v2804_v52 = vpack.c.bf16 %v2751_v48, %v2750_v47  ;;  %v1236_v2 = vmul.f32 %v7022_v54, %v886_v40  ;;  %v946_v7 = vmul.f32 %v7031_v60, %v885_v38  ;;  %s11003_s23 = scalar_lea.sflag [#allocation5], %s296_s13 }
  0x27   : > { %6121 = vmatmul.mubr.msk.f32.gmra.mxu0 %vm421_vm1, %v395_v8  ;;  %334 = vst.msk [vmem:[#allocation2 + $0x59] sm:$0x1] %vm315_vm3, %v6663_v33  ;;  %335 = vst.msk [vmem:[#allocation2 + $0x71] sm:$0x1] %vm315_vm3, %v6663_v33  ;;  %v1083_v57 = vrot.slane %v986_v44, 1  ;;  %v1084_v62 = vrot.slane %v987_v46, 1  ;;  %v947_v8 = vmul.f32 %v7031_v60, %v886_v40 }
  0x28   : > { %6123 = vmatprep.mubr.msk.f32.mxu0 %vm421_vm1, %v396_v9  ;;  %336 = vst.msk [vmem:[#allocation2 + $0x89] sm:$0x1] %vm315_vm3, %v6663_v33  ;;  %337 = vst.msk [vmem:[#allocation2 + $0xa1] sm:$0x1] %vm315_vm3, %v6663_v33  ;;  %v7095_v46 = vld [vmem:[%s11045_s2 + $0x8] ss:$0 sm:$0xff] }
  0x29   : > { %338 = vst.msk [vmem:[#allocation2 + $0xb9] sm:$0x1] %vm315_vm3, %v6663_v33  ;;  %339 = vst.msk [vmem:[#allocation2 + $0xd1] sm:$0x1] %vm315_vm3, %v6663_v33 }
  0x2a   : > { %340 = vst.msk [vmem:[#allocation2 + $0xe9] sm:$0x1] %vm315_vm3, %v6663_v33  ;;  %341 = vst.msk [vmem:[#allocation2 + $0x101] sm:$0x1] %vm315_vm3, %v6663_v33 }
  0x2b   : > { %6124 = vmatmul.mubr.msk.f32.gmra.mxu0 %vm421_vm1, %v397_v10  ;;  %342 = vst.msk [vmem:[#allocation2 + $0x119] sm:$0x1] %vm315_vm3, %v6663_v33  ;;  %343 = vst.msk [vmem:[#allocation2 + $0x131] sm:$0x1] %vm315_vm3, %v6663_v33 }
  0x2c   : > { %6126 = vmatprep.mubr.msk.f32.mxu0 %vm421_vm1, %v398_v11  ;;  %344 = vst.msk [vmem:[#allocation2 + $0x149] sm:$0x1] %vm315_vm3, %v6663_v33  ;;  %345 = vst.msk [vmem:[#allocation2 + $0x161] sm:$0x1] %vm315_vm3, %v6663_v33 }
  0x2d   : > { %346 = vst.msk [vmem:[#allocation2 + $0x179] sm:$0x1] %vm315_vm3, %v6663_v33  ;;  %347 = vst.msk [vmem:[#allocation2 + $0x191] sm:$0x1] %vm315_vm3, %v6663_v33 }
  0x2e   : > { %356 = vst.msk [vmem:[#allocation3 + $0x18] sm:$0x1] %vm315_vm3, %v6663_v33  ;;  %357 = vst.msk [vmem:[#allocation3 + $0x30] sm:$0x1] %vm315_vm3, %v6663_v33 }
  0x2f   : > { %6127 = vmatmul.mubr.msk.f32.gmra.mxu0 %vm421_vm1, %v399_v12  ;;  %358 = vst.msk [vmem:[#allocation3 + $0x48] sm:$0x1] %vm315_vm3, %v6663_v33  ;;  %359 = vst.msk [vmem:[#allocation3 + $0x60] sm:$0x1] %vm315_vm3, %v6663_v33  ;;  %v1085_v12 = vsel %vm1082_vm5, %v1083_v57, %v1084_v62 }
  0x30   : > { %6129 = vmatprep.mubr.msk.f32.mxu0 %vm421_vm1, %v400_v13  ;;  %360 = vst.msk [vmem:[#allocation3 + $0x78] sm:$0x1] %vm315_vm3, %v6663_v33  ;;  %361 = vst.msk [vmem:[#allocation3 + $0x90] sm:$0x1] %vm315_vm3, %v6663_v33 }
  0x31   : > { %362 = vst.msk [vmem:[#allocation3 + $0xa8] sm:$0x1] %vm315_vm3, %v6663_v33  ;;  %363 = vst.msk [vmem:[#allocation3 + $0xc0] sm:$0x1] %vm315_vm3, %v6663_v33 }
  0x32   : > { %364 = vst.msk [vmem:[#allocation3 + $0xd8] sm:$0x1] %vm315_vm3, %v6663_v33  ;;  %365 = vst.msk [vmem:[#allocation3 + $0xf0] sm:$0x1] %vm315_vm3, %v6663_v33 }
  0x33   : > { %6130 = vmatmul.mubr.msk.f32.gmra.mxu0 %vm421_vm1, %v401_v14  ;;  %366 = vst.msk [vmem:[#allocation3 + $0x108] sm:$0x1] %vm315_vm3, %v6663_v33  ;;  %367 = vst.msk [vmem:[#allocation3 + $0x120] sm:$0x1] %vm315_vm3, %v6663_v33 }
  0x34   : > { %6132 = vmatprep.mubr.msk.f32.mxu0 %vm421_vm1, %v402_v15  ;;  %368 = vst.msk [vmem:[#allocation3 + $0x138] sm:$0x1] %vm315_vm3, %v6663_v33  ;;  %369 = vst.msk [vmem:[#allocation3 + $0x150] sm:$0x1] %vm315_vm3, %v6663_v33  ;;  %v1332_v15 = vrot.slane %v1235_v1, 2 }
  0x35   : > { %370 = vst.msk [vmem:[#allocation3 + $0x168] sm:$0x1] %vm315_vm3, %v6663_v33  ;;  %371 = vst.msk [vmem:[#allocation3 + $0x180] sm:$0x1] %vm315_vm3, %v6663_v33 }
  0x36   : > { %372 = vst.msk [vmem:[#allocation3 + $0x29] sm:$0x1] %vm315_vm3, %v6663_v33  ;;  %373 = vst.msk [vmem:[#allocation3 + $0x41] sm:$0x1] %vm315_vm3, %v6663_v33 }
  0x37   : > { %6133 = vmatmul.mubr.msk.f32.gmra.mxu0 %vm421_vm1, %v403_v16  ;;  %374 = vst.msk [vmem:[#allocation3 + $0x59] sm:$0x1] %vm315_vm3, %v6663_v33  ;;  %375 = vst.msk [vmem:[#allocation3 + $0x71] sm:$0x1] %vm315_vm3, %v6663_v33  ;;  %v1333_v16 = vrot.slane %v1236_v2, 2 }
  0x38   : > { %6135 = vmatprep.mubr.msk.f32.mxu0 %vm421_vm1, %v404_v17  ;;  %376 = vst.msk [vmem:[#allocation3 + $0x89] sm:$0x1] %vm315_vm3, %v6663_v33  ;;  %377 = vst.msk [vmem:[#allocation3 + $0xa1] sm:$0x1] %vm315_vm3, %v6663_v33 }
  0x39   : > { %378 = vst.msk [vmem:[#allocation3 + $0xb9] sm:$0x1] %vm315_vm3, %v6663_v33  ;;  %379 = vst.msk [vmem:[#allocation3 + $0xd1] sm:$0x1] %vm315_vm3, %v6663_v33 }
  0x3a   : > { %380 = vst.msk [vmem:[#allocation3 + $0xe9] sm:$0x1] %vm315_vm3, %v6663_v33  ;;  %381 = vst.msk [vmem:[#allocation3 + $0x101] sm:$0x1] %vm315_vm3, %v6663_v33 }
  0x3b   : > { %6136 = vmatmul.mubr.msk.f32.gmra.mxu0 %vm421_vm1, %v405_v18  ;;  %382 = vst.msk [vmem:[#allocation3 + $0x119] sm:$0x1] %vm315_vm3, %v6663_v33  ;;  %383 = vst.msk [vmem:[#allocation3 + $0x131] sm:$0x1] %vm315_vm3, %v6663_v33 }
  0x3c   : > { %6138 = vmatprep.mubr.msk.f32.mxu0 %vm421_vm1, %v406_v19  ;;  %384 = vst.msk [vmem:[#allocation3 + $0x149] sm:$0x1] %vm315_vm3, %v6663_v33  ;;  %385 = vst.msk [vmem:[#allocation3 + $0x161] sm:$0x1] %vm315_vm3, %v6663_v33 }
  0x3d   : > { %386 = vst.msk [vmem:[#allocation3 + $0x179] sm:$0x1] %vm315_vm3, %v6663_v33  ;;  %387 = vst.msk [vmem:[#allocation3 + $0x191] sm:$0x1] %vm315_vm3, %v6663_v33 }
  0x3e   : > { %309 = vst.msk [vmem:[#allocation2 + $0x10] sm:$0x3] %vm308_vm4, %v6663_v33  ;;  %313 = vst.msk [vmem:[#allocation2 + $0x1a8] sm:$0x3] %vm308_vm4, %v6663_v33 }
  0x3f   : > { %6139 = vmatmul.mubr.msk.f32.gmra.mxu0 %vm421_vm1, %v407_v20  ;;  %350 = vst.msk [vmem:[#allocation3 + $0x10] sm:$0x3] %vm308_vm4, %v6663_v33  ;;  %354 = vst.msk [vmem:[#allocation3 + $0x1a8] sm:$0x3] %vm308_vm4, %v6663_v33 }
  0x40   : > { %6141 = vmatprep.mubr.msk.f32.mxu0 %vm421_vm1, %v408_v21 }
  0x43   : > { %6142 = vmatmul.mubr.msk.f32.gmra.mxu0 %vm421_vm1, %v409_v22  ;;  %v1195_v22 = vadd.f32 %v1085_v12, %v946_v7 }
  0x44   : > { %6144 = vmatprep.mubr.msk.f32.mxu0 %vm421_vm1, %v410_v23 }
  0x45   : > { %v887_v41 = vld [vmem:[#allocation2 + $0x10] sm:$0x3] }
  0x46   : > { %v988_v50 = vmul.f32 %v6999_v37, %v887_v41  ;;  %v1237_v3 = vmul.f32 %v7022_v54, %v887_v41 }
  0x47   : > { %6145 = vmatmul.mubr.msk.f32.gmra.mxu0 %vm421_vm1, %v411_v24  ;;  %v7055_v24 = vld [vmem:[%s11045_s2 + $0x4] ss:$0 sm:$0xff] }
  0x48   : > { %6147 = vmatprep.mubr.msk.f32.mxu0 %vm421_vm1, %v412_v25  ;;  %v1086_v0 = vrot.slane %v988_v50, 1  ;;  %v1335_v17 = vrot.slane %v1237_v3, 2  ;;  %v7060_v25 = vld [vmem:[%s11045_s2 + $0x5] ss:$0 sm:$0xff] }
  0x4a   : > { %v1087_v14 = vsel %vm1082_vm5, %v1084_v62, %v1086_v0 }
  0x4b   : > { %6148 = vmatmul.mubr.msk.f32.gmra.mxu0 %vm421_vm1, %v413_v26  ;;  %v1196_v26 = vadd.f32 %v1087_v14, %v947_v8 }
  0x4c   : > { %6150 = vmatprep.mubr.msk.f32.mxu0 %vm421_vm1, %v414_v27 }
  0x4f   : > { %6151 = vmatmul.mubr.msk.f32.gmra.mxu0 %vm421_vm1, %v415_v28 }
  0x50   : > { %6153 = vmatprep.mubr.msk.f32.mxu0 %vm421_vm1, %v416_v29 }
  0x53   : > { %6154 = vmatmul.mubr.msk.f32.gmra.mxu0 %vm421_vm1, %v417_v30 }
  0x54   : > { %6156 = vmatprep.mubr.msk.f32.mxu0 %vm421_vm1, %v418_v31  ;;  %v1334_v31 = vsel %vm1331_vm6, %v1332_v15, %v1333_v16 }
  0x55   : > { %v7097_v47 = vadd.f32 %v1334_v31, %v1195_v22 }
  0x57   : > { %6157 = vmatmul.mubr.msk.f32.gmra.mxu0 %vm421_vm1, %v419_v32  ;;  %v1336_v32 = vsel %vm1331_vm6, %v1333_v16, %v1335_v17 }
  0x58   : > { %6199 = vmatprep.mubr.msk.bf16.mxu0 %vm305_vm2, %v2804_v52  ;;  %v7099_v48 = vadd.f32 %v1336_v32, %v1196_v26 }
  0xdb   : > { %v6113_v42 = vpop.f32.mrf.mxu0 }
  0xdc   : > { %v753_v45 = vmul.f32 %v6113_v42, %v7004_v39 }
  0xdd   : > { %v588_v49 = vpop.f32.mrf.mxu0 }
  0xde   : > { %v752_v53 = vmul.f32 %v7004_v39, %v588_v49  ;;  %v790_v55 = vadd.f32 %v7009_v43, %v753_v45  ;;  %v7090_v45 = vld [vmem:[%s11045_s2 + $0x7] ss:$0 sm:$0xff] }
  0xdf   : > { %v6116_v56 = vpop.f32.mrf.mxu0 }
  0xe0   : > { %v755_v58 = vmul.f32 %v6116_v56, %v7004_v39  ;;  %5383 = vrot.lane.b32.xlu1 %v790_v55, %s6664_s10  ;;  %v822_v59 = vmax.f32 %v790_v55, 0.0  ;;  %v789_v61 = vadd.f32 %v7009_v43, %v752_v53 }
  0xe1   : > { %v598_v63 = vpop.f32.mrf.mxu0 }
  0xe2   : > { %v792_v4 = vadd.f32 %v7009_v43, %v755_v58  ;;  %854 = vst.msk [vmem:[#allocation2 + $0x21] sm:$0xff] %vm305_vm2, %v822_v59  ;;  %v754_v5 = vmul.f32 %v7004_v39, %v598_v63  ;;  %5381 = vrot.lane.b32.xlu0 %v789_v61, %s6664_s10  ;;  %v821_v6 = vmax.f32 %v789_v61, 0.0 }
  0xe3   : > { %v6119_v9 = vpop.f32.mrf.mxu0 }
  0xe4   : > { %v824_v10 = vmax.f32 %v792_v4, 0.0  ;;  %v791_v11 = vadd.f32 %v7009_v43, %v754_v5  ;;  %853 = vst.msk [vmem:[#allocation2 + $0x19] sm:$0xff] %vm305_vm2, %v821_v6  ;;  %v757_v13 = vmul.f32 %v6119_v9, %v7004_v39  ;;  %5387 = vrot.lane.b32.xlu1 %v792_v4, %s6664_s10 }
  0xe5   : > { %v608_v18 = vpop.f32.mrf.mxu0 }
  0xe6   : > { %856 = vst.msk [vmem:[#allocation2 + $0x39] sm:$0xff] %vm305_vm2, %v824_v10  ;;  %v823_v19 = vmax.f32 %v791_v11, 0.0  ;;  %v794_v20 = vadd.f32 %v7009_v43, %v757_v13  ;;  %v756_v21 = vmul.f32 %v7004_v39, %v608_v18 }
  0xe7   : > { %v6122_v23 = vpop.f32.mrf.mxu0 }
  0xe8   : > { %855 = vst.msk [vmem:[#allocation2 + $0x31] sm:$0xff] %vm305_vm2, %v823_v19  ;;  %v826_v27 = vmax.f32 %v794_v20, 0.0  ;;  %v793_v28 = vadd.f32 %v7009_v43, %v756_v21  ;;  %v759_v29 = vmul.f32 %v6122_v23, %v7004_v39  ;;  %5385 = vrot.lane.b32.xlu1 %v791_v11, %s6664_s10 }
  0xe9   : > { %v890_v30 = vld [vmem:[#allocation2 + $0x28] sm:$0x3]  ;;  %v618_v33 = vpop.f32.mrf.mxu0 }
  0xea   : > { %v7069_v34 = vmul.f32 %v6999_v37, %v890_v30  ;;  %v7072_v35 = vmul.f32 %v7022_v54, %v890_v30  ;;  %858 = vst.msk [vmem:[#allocation2 + $0x51] sm:$0xff] %vm305_vm2, %v826_v27  ;;  %v7076_v36 = vmul.f32 %v7055_v24, %v890_v30  ;;  %v7079_v38 = vmul.f32 %v7060_v25, %v890_v30 }
  0xeb   : > { %v7081_v40 = vld [vmem:[#allocation2 + $0x18] sm:$0xff]  ;;  %v7083_v41 = vld [vmem:[#allocation2 + $0x20] sm:$0xff]  ;;  %v825_v42 = vmax.f32 %v793_v28, 0.0  ;;  %v7085_v44 = vpop.f32.mrf.mxu0  ;;  %v7102_v49 = vadd.f32 %v7009_v43, %v759_v29  ;;  %v7105_v50 = vmul.f32 %v7004_v39, %v618_v33 }
  0xec   : > { %5391 = vrot.lane.b32.xlu1 %v794_v20, %s6664_s10  ;;  %v1091_v52 = vrot.slane %v7069_v34, 1  ;;  %v989_v55 = vmul.f32 %v6999_v37, %v7081_v40  ;;  %v990_v56 = vmul.f32 %v6999_v37, %v7083_v41  ;;  %v948_v6 = vmul.f32 %v7031_v60, %v7081_v40 }
  0xed   : > { %v893_v51 = vld [vmem:[#allocation2 + $0x40] sm:$0x3]  ;;  %857 = vst.msk [vmem:[#allocation2 + $0x49] sm:$0xff] %vm305_vm2, %v825_v42  ;;  %v7115_v57 = vpop.f32.mrf.mxu0  ;;  %v949_v7 = vmul.f32 %v7031_v60, %v7083_v41  ;;  %v1238_v20 = vmul.f32 %v7022_v54, %v7081_v40  ;;  %v1239_v19 = vmul.f32 %v7022_v54, %v7083_v41 }
  0xee   : > { %v994_v58 = vmul.f32 %v6999_v37, %v893_v51  ;;  %v7119_v59 = vmul.f32 %v7022_v54, %v893_v51  ;;  %v7122_v61 = vmul.f32 %v7055_v24, %v893_v51  ;;  %v7125_v62 = vmul.f32 %v7060_v25, %v893_v51 }
  0xef   : > { %v7128_v63 = vmul.f32 %v7090_v45, %v893_v51  ;;  %v7131_v0 = vmul.f32 %v7095_v46, %v893_v51  ;;  %v7135_v3 = vld [vmem:[#allocation2 + $0x30] sm:$0xff]  ;;  %v7137_v4 = vld [vmem:[#allocation2 + $0x38] sm:$0xff]  ;;  %v7139_v5 = vpop.f32.mrf.mxu0  ;;  %v1088_v8 = vrot.slane %v989_v55, 1  ;;  %v1089_v9 = vrot.slane %v990_v56, 1 }
  0xf0   : > { %11264 = vst [vmem:[#allocation7_spill] sm:$0xff] %v7119_v59  ;;  %5389 = vrot.lane.b32.xlu1 %v793_v28, %s6664_s10  ;;  %v1096_v10 = vrot.slane %v994_v58, 1  ;;  %v992_v15 = vmul.f32 %v6999_v37, %v7135_v3  ;;  %v993_v16 = vmul.f32 %v6999_v37, %v7137_v4  ;;  %v7157_v17 = vmul.f32 %v7022_v54, %v7135_v3  ;;  %v7202_v58 = vld [vmem:[%s11045_s2 + $0x3] ss:$0 sm:$0xff] }
  0xf1   : > { %v7149_v14 = vpop.f32.mrf.mxu0  ;;  %v7161_v18 = vmul.f32 %v7022_v54, %v7137_v4  ;;  %v950_v21 = vmul.f32 %v7031_v60, %v7135_v3  ;;  %v951_v22 = vmul.f32 %v7031_v60, %v7137_v4  ;;  %v1559_v28 = vmul.f32 %v7055_v24, %v7135_v3 }
  0xf2   : > { %v1093_v26 = vrot.slane %v992_v15, 1  ;;  %v1094_v27 = vrot.slane %v993_v16, 1  ;;  %v1560_v29 = vmul.f32 %v7055_v24, %v7137_v4  ;;  %v7179_v30 = vmul.f32 %v7060_v25, %v7135_v3 }
  0xf3   : > { %v7169_v23 = vpop.f32.mrf.mxu0  ;;  %v7183_v31 = vmul.f32 %v7060_v25, %v7137_v4  ;;  %v7187_v32 = vmul.f32 %v7090_v45, %v7135_v3  ;;  %v7191_v33 = vmul.f32 %v7090_v45, %v7137_v4  ;;  %v7206_v15 = vmul.f32 %v7095_v46, %v7135_v3 }
  0xf4   : > { %5395 = vrot.lane.b32.xlu1 %v7102_v49, %s6664_s10  ;;  %v1095_v42 = vsel %vm1082_vm5, %v1093_v26, %v1094_v27  ;;  %v1097_v51 = vsel %vm1082_vm5, %v1094_v27, %v1096_v10  ;;  %v7210_v16 = vmul.f32 %v7095_v46, %v7137_v4  ;;  %v1090_v26 = vsel %vm1082_vm5, %v1088_v8, %v1089_v9 }
  0xf5   : > { %v7193_v34 = vpop.f32.mrf.mxu0  ;;  %v1092_v10 = vsel %vm1082_vm5, %v1089_v9, %v1091_v52  ;;  %v7216_v11 = vadd.f32 %v1095_v42, %v950_v21  ;;  %v7218_v55 = vadd.f32 %v1097_v51, %v951_v22  ;;  %v2220_v56 = vrot.slane %v7187_v32, 1 }
  0xf6   : > { %v2221_v13 = vrot.slane %v7191_v33, 1  ;;  %v1484_v8 = vmul.f32 %v7202_v58, %v7081_v40  ;;  %v1485_v52 = vmul.f32 %v7202_v58, %v7083_v41  ;;  %v1197_v21 = vadd.f32 %v1090_v26, %v948_v6 }
  0xf7   : > { %v7214_v27 = vpop.f32.mrf.mxu0  ;;  %11265 = vst [vmem:[#allocation8_spill] sm:$0xff] %v7216_v11  ;;  %11266 = vst [vmem:[#allocation9_spill] sm:$0xff] %v7218_v55  ;;  %v1198_v22 = vadd.f32 %v1092_v10, %v949_v7  ;;  %v1556_v32 = vmul.f32 %v7055_v24, %v7081_v40  ;;  %v1557_v33 = vmul.f32 %v7055_v24, %v7083_v41  ;;  %v1337_v42 = vrot.slane %v1238_v20, 2 }
  0xf8   : > { %v1338_v51 = vrot.slane %v1239_v19, 2  ;;  %v1516_v2 = vadd.f32 %v1484_v8, %v7097_v47  ;;  %v1517_v12 = vadd.f32 %v1485_v52, %v7099_v48  ;;  %v1657_v55 = vrot.slane %v1559_v28, 1 }
  0xf9   : > { %v7230_v9 = vpop.f32.mrf.mxu0  ;;  %v1652_v1 = vrot.slane %v1556_v32, 1  ;;  %v1653_v53 = vrot.slane %v1557_v33, 1  ;;  %v1658_v11 = vrot.slane %v1560_v29, 1  ;;  %v11267_v6 = vrot.slane %v7072_v35, 2  ;;  %v5703_v35 = vld [vmem:[%s11045_s2 + $0x6] ss:$0 sm:$0xff] }
  0xfa   : > { %v1339_v59 = vsel %vm1331_vm6, %v1337_v42, %v1338_v51  ;;  %v1804_v26 = vmul.f32 %v7060_v25, %v7081_v40  ;;  %v1805_v19 = vmul.f32 %v7060_v25, %v7083_v41  ;;  %v11268_v28 = vrot.slane %v7076_v36, 1 }
  0xfb   : > { %v1341_v7 = vsel %vm1331_vm6, %v1338_v51, %v11267_v6  ;;  %v7246_v20 = vpop.f32.mrf.mxu0  ;;  %v1446_v47 = vadd.f32 %v1339_v59, %v1197_v21  ;;  %v1654_v10 = vsel %vm1082_vm5, %v1652_v1, %v1653_v53  ;;  %v1486_v40 = vmul.f32 %v7202_v58, %v7135_v3 }
  0xfc   : > { %v1447_v48 = vadd.f32 %v1341_v7, %v1198_v22  ;;  %v1656_v29 = vsel %vm1082_vm5, %v1653_v53, %v11268_v28  ;;  %v1487_v41 = vmul.f32 %v7202_v58, %v7137_v4  ;;  %v1764_v8 = vadd.f32 %v1654_v10, %v1516_v2  ;;  %v896_v22 = vld [vmem:[#allocation2 + $0x58] sm:$0x3] }
  0xfd   : > { %v1765_v52 = vadd.f32 %v1656_v29, %v1517_v12  ;;  %v1900_v21 = vrot.slane %v1804_v26, 2  ;;  %v1901_v36 = vrot.slane %v1805_v19, 2  ;;  %v1518_v53 = vadd.f32 %v1486_v40, %v1446_v47  ;;  %v7265_v6 = vpop.f32.mrf.mxu0 }
  0xfe   : > { %v1519_v32 = vadd.f32 %v1487_v41, %v1447_v48  ;;  %v1659_v33 = vsel %vm1082_vm5, %v1657_v55, %v1658_v11  ;;  %v11269_v42 = vrot.slane %v7122_v61, 1  ;;  %v11270_v12 = vrot.slane %v7079_v38, 2 }
  0xff   : > { %v1902_v2 = vsel %vm1331_vm6, %v1900_v21, %v1901_v36  ;;  %v2052_v26 = vmul.f32 %v5703_v35, %v7135_v3  ;;  %v2053_v19 = vmul.f32 %v5703_v35, %v7137_v4  ;;  %v997_v55 = vmul.f32 %v6999_v37, %v896_v22  ;;  %v6530_v4 = vld [vmem:[%s11046_s3 + $0x28] sm:$0xff]   ;;  %v7296_v21 = vpop.f32.mrf.mxu0 }
 0x100   : > { %v1661_v51 = vsel %vm1082_vm5, %v1658_v11, %v11269_v42  ;;  %v1904_v7 = vsel %vm1331_vm6, %v1901_v36, %v11270_v12  ;;  %v2012_v47 = vadd.f32 %v1902_v2, %v1764_v8  ;;  %v7275_v61 = vmul.f32 %v7022_v54, %v896_v22  ;;  %v894_v8 = vld [vmem:[#allocation2 + $0x48] sm:$0xff]  ;;  %6231 = vmatprep.subr.bf16.mxu1 %v6530_v4 }
 0x101   : > { %v2013_v48 = vadd.f32 %v1904_v7, %v1765_v52  ;;  %v7278_v11 = vmul.f32 %v7055_v24, %v896_v22  ;;  %v7281_v10 = vmul.f32 %v7060_v25, %v896_v22  ;;  %v7284_v38 = vmul.f32 %v7090_v45, %v896_v22  ;;  %v895_v52 = vld [vmem:[#allocation2 + $0x50] sm:$0xff] }
 0x102   : > { %11271 = vst [vmem:[#allocation10_spill] sm:$0xff] %v7275_v61  ;;  %v7287_v3 = vmul.f32 %v7095_v46, %v896_v22  ;;  %v2084_v28 = vadd.f32 %v2052_v26, %v2012_v47  ;;  %v2222_v35 = vsel %vm1082_vm5, %v2220_v56, %v2221_v13  ;;  %v11272_v40 = vrot.slane %v7128_v63, 1 }
 0x103   : > { %v2085_v29 = vadd.f32 %v2053_v19, %v2013_v48  ;;  %v7298_v36 = vadd.f32 %v1659_v33, %v1518_v53  ;;  %v7300_v22 = vadd.f32 %v1661_v51, %v1519_v32  ;;  %v1101_v42 = vrot.slane %v997_v55, 1  ;;  %v7325_v48 = vpop.f32.mrf.mxu0 }
 0x104   : > { %v2224_v41 = vsel %vm1082_vm5, %v2221_v13, %v11272_v40  ;;  %v995_v7 = vmul.f32 %v6999_v37, %v894_v8  ;;  %v996_v26 = vmul.f32 %v6999_v37, %v895_v52  ;;  %v7310_v53 = vmul.f32 %v7022_v54, %v894_v8 }
 0x105   : > { %v7313_v32 = vmul.f32 %v7022_v54, %v895_v52  ;;  %v7315_v33 = vadd.f32 %v2222_v35, %v2084_v28  ;;  %v7317_v51 = vadd.f32 %v2224_v41, %v2085_v29  ;;  %v7320_v19 = vmul.f32 %v7055_v24, %v894_v8  ;;  %v6143_v59 = vpop.f32.mrf.mxu0 }
 0x106   : > { %11273 = vst [vmem:[#allocation11_spill] sm:$0xff] %v7310_v53  ;;  %v7323_v47 = vmul.f32 %v7055_v24, %v895_v52  ;;  %v952_v55 = vmul.f32 %v7031_v60, %v894_v8  ;;  %v953_v4 = vmul.f32 %v7031_v60, %v895_v52  ;;  %v1098_v40 = vrot.slane %v995_v7, 1 }
 0x107   : > { %11274 = vst [vmem:[#allocation12_spill] sm:$0xff] %v7313_v32  ;;  %v1099_v2 = vrot.slane %v996_v26, 1  ;;  %v7332_v29 = vmul.f32 %v7202_v58, %v894_v8  ;;  %v7335_v35 = vmul.f32 %v7202_v58, %v895_v52  ;;  %v828_v13 = vmax.f32 %v7102_v49, 0.0 }
 0x108   : > { %v795_v7 = vadd.f32 %v7009_v43, %v7105_v50  ;;  %v7345_v28 = vmul.f32 %v7060_v25, %v894_v8  ;;  %v7348_v63 = vmul.f32 %v7060_v25, %v895_v52  ;;  %v761_v49 = vmul.f32 %v7085_v44, %v7004_v39 }
 0x109   : > { %v1100_v26 = vsel %vm1082_vm5, %v1098_v40, %v1099_v2  ;;  %v1102_v56 = vsel %vm1082_vm5, %v1099_v2, %v1101_v42  ;;  %860 = vst.msk [vmem:[#allocation2 + $0x69] sm:$0xff] %vm305_vm2, %v828_v13  ;;  %v760_v50 = vmul.f32 %v7004_v39, %v7115_v57  ;;  %v763_v40 = vmul.f32 %v7139_v5, %v7004_v39 }
 0x10a   : > { %v827_v41 = vmax.f32 %v795_v7, 0.0  ;;  %5393 = vrot.lane.b32.xlu1 %v795_v7, %s6664_s10  ;;  %v762_v8 = vmul.f32 %v7004_v39, %v7149_v14  ;;  %v765_v52 = vmul.f32 %v7169_v23, %v7004_v39  ;;  %v764_v42 = vmul.f32 %v7004_v39, %v7193_v34 }
 0x10b   : > { %v767_v44 = vmul.f32 %v7214_v27, %v7004_v39  ;;  %v798_v57 = vadd.f32 %v7009_v43, %v761_v49  ;;  %v797_v5 = vadd.f32 %v7009_v43, %v760_v50  ;;  %v800_v2 = vadd.f32 %v7009_v43, %v763_v40  ;;  %v688_v27 = vpop.f32.mrf.mxu0 }
 0x10c   : > { %859 = vst.msk [vmem:[#allocation2 + $0x61] sm:$0xff] %vm305_vm2, %v827_v41  ;;  %v766_v14 = vmul.f32 %v7004_v39, %v7230_v9  ;;  %v799_v13 = vadd.f32 %v7009_v43, %v762_v8  ;;  %v802_v23 = vadd.f32 %v7009_v43, %v765_v52  ;;  %v801_v34 = vadd.f32 %v7009_v43, %v764_v42 }
 0x10d   : > { %v7376_v7 = vadd.f32 %v7009_v43, %v767_v44  ;;  %v830_v41 = vmax.f32 %v798_v57, 0.0  ;;  %v829_v12 = vmax.f32 %v797_v5, 0.0  ;;  %v832_v49 = vmax.f32 %v800_v2, 0.0  ;;  %5397 = vrot.lane.b32.xlu0 %v797_v5, %s6664_s10 }
 0x10e   : > { %v7380_v50 = vadd.f32 %v7009_v43, %v766_v14  ;;  %5399 = vrot.lane.b32.xlu1 %v798_v57, %s6664_s10  ;;  %v831_v9 = vmax.f32 %v799_v13, 0.0  ;;  %v834_v40 = vmax.f32 %v802_v23, 0.0  ;;  %v833_v8 = vmax.f32 %v801_v34, 0.0 }
 0x10f   : > { %v836_v52 = vmax.f32 %v7376_v7, 0.0  ;;  %v7384_v42 = vadd.f32 %v1100_v26, %v952_v55  ;;  %862 = vst.msk [vmem:[#allocation2 + $0x81] sm:$0xff] %vm305_vm2, %v830_v41  ;;  %861 = vst.msk [vmem:[#allocation2 + $0x79] sm:$0xff] %vm305_vm2, %v829_v12  ;;  %v769_v5 = vmul.f32 %v7246_v20, %v7004_v39  ;;  %v768_v57 = vmul.f32 %v7004_v39, %v7265_v6  ;;  %v6146_v6 = vpop.f32.mrf.mxu0 }
 0x110   : > { %11275 = vst [vmem:[#allocation13_spill] sm:$0xff] %v7380_v50  ;;  %864 = vst.msk [vmem:[#allocation2 + $0x99] sm:$0xff] %vm305_vm2, %v832_v49  ;;  %v835_v44 = vmax.f32 %v7380_v50, 0.0  ;;  %v7394_v14 = vadd.f32 %v1102_v56, %v953_v4  ;;  %v899_v26 = vld [vmem:[#allocation2 + $0x70] sm:$0x3]  ;;  %v7404_v20 = vmul.f32 %v7296_v21, %v7004_v39  ;;  %v7442_v1 = vmul.f32 %v6146_v6, %v7004_v39 }
 0x111   : > { %11276 = vst [vmem:[#allocation14_spill] sm:$0xff] %v7384_v42  ;;  %863 = vst.msk [vmem:[#allocation2 + $0x91] sm:$0xff] %vm305_vm2, %v831_v9  ;;  %v1000_v12 = vmul.f32 %v6999_v37, %v899_v26  ;;  %v7408_v56 = vmul.f32 %v7022_v54, %v899_v26  ;;  %v7411_v4 = vmul.f32 %v7055_v24, %v899_v26  ;;  %5401 = vrot.lane.b32.xlu0 %v799_v13, %s6664_s10 }
 0x112   : > { %11277 = vst [vmem:[#allocation15_spill] sm:$0xff] %v7394_v14  ;;  %866 = vst.msk [vmem:[#allocation2 + $0xb1] sm:$0xff] %vm305_vm2, %v834_v40  ;;  %v7414_v41 = vmul.f32 %v7060_v25, %v899_v26  ;;  %v7419_v49 = vmul.f32 %v7090_v45, %v899_v26  ;;  %v7422_v21 = vmul.f32 %v7095_v46, %v899_v26  ;;  %5403 = vrot.lane.b32.xlu1 %v800_v2, %s6664_s10 }
 0x113   : > { %865 = vst.msk [vmem:[#allocation2 + $0xa9] sm:$0xff] %vm305_vm2, %v833_v8  ;;  %868 = vst.msk [vmem:[#allocation2 + $0xc9] sm:$0xff] %vm305_vm2, %v836_v52  ;;  %v897_v9 = vld [vmem:[#allocation2 + $0x60] sm:$0xff]  ;;  %v898_v40 = vld [vmem:[#allocation2 + $0x68] sm:$0xff]  ;;  %v7427_v8 = vmul.f32 %v7004_v39, %v7325_v48  ;;  %v7430_v52 = vmul.f32 %v6143_v59, %v7004_v39  ;;  %v7433_v13 = vadd.f32 %v7009_v43, %v769_v5  ;;  %v1106_v2 = vrot.slane %v1000_v12, 1 }
 0x114   : > { %11278 = vst [vmem:[#allocation16_spill] sm:$0xff] %v7408_v56  ;;  %11279 = vst [vmem:[#allocation17_spill] sm:$0xff] %v7411_v4  ;;  %v7439_v26 = vmul.f32 %v7004_v39, %v688_v27  ;;  %v998_v50 = vmul.f32 %v6999_v37, %v897_v9  ;;  %v999_v5 = vmul.f32 %v6999_v37, %v898_v40 }
 0x115   : > { %11280 = vst [vmem:[#allocation18_spill] sm:$0xff] %v7414_v41  ;;  %867 = vst.msk [vmem:[#allocation2 + $0xc1] sm:$0xff] %vm305_vm2, %v835_v44  ;;  %v7436_v44 = vadd.f32 %v7009_v43, %v768_v57  ;;  %v7450_v57 = vmul.f32 %v7022_v54, %v897_v9  ;;  %v7453_v27 = vmul.f32 %v7022_v54, %v898_v40  ;;  %5405 = vrot.lane.b32.xlu0 %v801_v34, %s6664_s10 }
 0x116   : > { %11281 = vst [vmem:[#allocation19_spill] sm:$0xff] %v7422_v21  ;;  %v7459_v55 = vmul.f32 %v7055_v24, %v897_v9  ;;  %v7462_v59 = vmul.f32 %v7055_v24, %v898_v40  ;;  %v902_v48 = vld [vmem:[#allocation2 + $0x88] sm:$0x3]  ;;  %5407 = vrot.lane.b32.xlu1 %v802_v23, %s6664_s10  ;;  %v954_v56 = vmul.f32 %v7031_v60, %v897_v9  ;;  %v1103_v4 = vrot.slane %v998_v50, 1 }
 0x117   : > { %11282 = vst [vmem:[#allocation20_spill] sm:$0xff] %v7436_v44  ;;  %11283 = vst [vmem:[#allocation21_spill] sm:$0xff] %v7450_v57  ;;  %v955_v41 = vmul.f32 %v7031_v60, %v898_v40  ;;  %v1104_v14 = vrot.slane %v999_v5, 1  ;;  %v7470_v12 = vmul.f32 %v7202_v58, %v897_v9  ;;  %v7473_v42 = vmul.f32 %v7202_v58, %v898_v40  ;;  %v900_v57 = vld [vmem:[#allocation2 + $0x78] sm:$0xff] }
 0x118   : > { %11284 = vst [vmem:[#allocation22_spill] sm:$0xff] %v7453_v27  ;;  %11285 = vst [vmem:[#allocation23_spill] sm:$0xff] %v7459_v55  ;;  %v1003_v61 = vmul.f32 %v6999_v37, %v902_v48  ;;  %v7479_v53 = vmul.f32 %v7022_v54, %v902_v48  ;;  %v7484_v34 = vmul.f32 %v7055_v24, %v902_v48  ;;  %v901_v27 = vld [vmem:[#allocation2 + $0x80] sm:$0xff]  ;;  %v904_v32 = vld [vmem:[#allocation2 + $0x98] sm:$0xff] }
 0x119   : > { %11286 = vst [vmem:[#allocation24_spill] sm:$0xff] %v7462_v59  ;;  %11287 = vst [vmem:[#allocation25_spill] sm:$0xff] %v7470_v12  ;;  %v1105_v21 = vsel %vm1082_vm5, %v1103_v4, %v1104_v14  ;;  %v1107_v23 = vsel %vm1082_vm5, %v1104_v14, %v1106_v2  ;;  %v7487_v6 = vmul.f32 %v7060_v25, %v902_v48  ;;  %v903_v12 = vld [vmem:[#allocation2 + $0x90] sm:$0xff] }
 0x11a   : > { %11288 = vst [vmem:[#allocation26_spill] sm:$0xff] %v7473_v42  ;;  %11289 = vst [vmem:[#allocation27_spill] sm:$0xff] %v7479_v53  ;;  %5411 = vrot.lane.b32.xlu1 %v7376_v7, %s6664_s10  ;;  %v7491_v14 = vadd.f32 %v1105_v21, %v954_v56  ;;  %v7493_v4 = vadd.f32 %v1107_v23, %v955_v41  ;;  %v7496_v2 = vmul.f32 %v7060_v25, %v897_v9 }
 0x11b   : > { %11290 = vst [vmem:[#allocation28_spill] sm:$0xff] %v7484_v34  ;;  %11291 = vst [vmem:[#allocation29_spill] sm:$0xff] %v7487_v6  ;;  %v7499_v50 = vmul.f32 %v7060_v25, %v898_v40  ;;  %v1111_v5 = vrot.slane %v1003_v61, 1  ;;  %v7503_v59 = vmul.f32 %v7090_v45, %v902_v48  ;;  %v7506_v42 = vmul.f32 %v7095_v46, %v902_v48 }
 0x11c   : > { %11292 = vst [vmem:[#allocation30_spill] sm:$0xff] %v7491_v14  ;;  %11293 = vst [vmem:[#allocation31_spill] sm:$0xff] %v7493_v4  ;;  %v1001_v41 = vmul.f32 %v6999_v37, %v900_v57  ;;  %v1002_v21 = vmul.f32 %v6999_v37, %v901_v27  ;;  %v956_v9 = vmul.f32 %v7031_v60, %v900_v57  ;;  %v905_v14 = vld [vmem:[#allocation2 + $0xa0] sm:$0x3] }
 0x11d   : > { %11294 = vst [vmem:[#allocation32_spill] sm:$0xff] %v7496_v2  ;;  %11295 = vst [vmem:[#allocation33_spill] sm:$0xff] %v7499_v50  ;;  %v957_v61 = vmul.f32 %v7031_v60, %v901_v27  ;;  %v7515_v40 = vmul.f32 %v7022_v54, %v900_v57  ;;  %v7518_v23 = vmul.f32 %v7022_v54, %v901_v27 }
 0x11e   : > { %11296 = vst [vmem:[#allocation34_spill] sm:$0xff] %v7503_v59  ;;  %11297 = vst [vmem:[#allocation35_spill] sm:$0xff] %v7506_v42  ;;  %5415 = vrot.lane.b32.xlu1 %v7433_v13, %s6664_s10  ;;  %v1108_v48 = vrot.slane %v1001_v41, 1  ;;  %v1109_v55 = vrot.slane %v1002_v21, 1  ;;  %v7523_v56 = vmul.f32 %v7055_v24, %v900_v57  ;;  %v7526_v7 = vmul.f32 %v7055_v24, %v901_v27 }
 0x11f   : > { %11298 = vst [vmem:[#allocation36_spill] sm:$0xff] %v7515_v40  ;;  %11299 = vst [vmem:[#allocation37_spill] sm:$0xff] %v7518_v23  ;;  %v7531_v34 = vmul.f32 %v7060_v25, %v900_v57  ;;  %v7534_v4 = vmul.f32 %v7060_v25, %v901_v27  ;;  %v7539_v50 = vmul.f32 %v7202_v58, %v900_v57 }
 0x120   : > { %11300 = vst [vmem:[#allocation38_spill] sm:$0xff] %v7523_v56  ;;  %11301 = vst [vmem:[#allocation39_spill] sm:$0xff] %v7526_v7  ;;  %v1110_v41 = vsel %vm1082_vm5, %v1108_v48, %v1109_v55  ;;  %v1112_v21 = vsel %vm1082_vm5, %v1109_v55, %v1111_v5  ;;  %v7542_v2 = vmul.f32 %v7202_v58, %v901_v27  ;;  %v698_v7 = vpop.f32.mrf.mxu0 }
 0x121   : > { %11302 = vst [vmem:[#allocation40_spill] sm:$0xff] %v7531_v34  ;;  %11303 = vst [vmem:[#allocation41_spill] sm:$0xff] %v7534_v4  ;;  %v1006_v48 = vmul.f32 %v6999_v37, %v905_v14  ;;  %v7550_v55 = vmul.f32 %v7022_v54, %v905_v14  ;;  %v7553_v57 = vmul.f32 %v7055_v24, %v905_v14 }
 0x122   : > { %11304 = vst [vmem:[#allocation42_spill] sm:$0xff] %v7539_v50  ;;  %11305 = vst [vmem:[#allocation43_spill] sm:$0xff] %v7542_v2  ;;  %v7556_v27 = vmul.f32 %v7060_v25, %v905_v14  ;;  %v7558_v5 = vadd.f32 %v1110_v41, %v956_v9  ;;  %v7560_v53 = vadd.f32 %v1112_v21, %v957_v61 }
 0x123   : > { %11306 = vst [vmem:[#allocation44_spill] sm:$0xff] %v7550_v55  ;;  %11307 = vst [vmem:[#allocation45_spill] sm:$0xff] %v7553_v57  ;;  %v7565_v59 = vmul.f32 %v7090_v45, %v905_v14  ;;  %v7568_v40 = vmul.f32 %v7095_v46, %v905_v14  ;;  %v958_v23 = vmul.f32 %v7031_v60, %v903_v12  ;;  %v1116_v50 = vrot.slane %v1006_v48, 1  ;;  %v908_v55 = vld [vmem:[#allocation2 + $0xb8] sm:$0x3] }
 0x124   : > { %11308 = vst [vmem:[#allocation46_spill] sm:$0xff] %v7556_v27  ;;  %11309 = vst [vmem:[#allocation47_spill] sm:$0xff] %v7558_v5  ;;  %v959_v2 = vmul.f32 %v7031_v60, %v904_v32  ;;  %v1004_v61 = vmul.f32 %v6999_v37, %v903_v12  ;;  %v1005_v41 = vmul.f32 %v6999_v37, %v904_v32 }
 0x125   : > { %11310 = vst [vmem:[#allocation48_spill] sm:$0xff] %v7560_v53  ;;  %11311 = vst [vmem:[#allocation49_spill] sm:$0xff] %v7565_v59  ;;  %v7578_v42 = vmul.f32 %v7022_v54, %v903_v12  ;;  %v7581_v14 = vmul.f32 %v7022_v54, %v904_v32  ;;  %v7584_v48 = vmul.f32 %v7055_v24, %v903_v12 }
 0x126   : > { %11312 = vst [vmem:[#allocation50_spill] sm:$0xff] %v7568_v40  ;;  %v1113_v53 = vrot.slane %v1004_v61, 1  ;;  %v1114_v5 = vrot.slane %v1005_v41, 1  ;;  %v7587_v9 = vmul.f32 %v7055_v24, %v904_v32  ;;  %v7592_v6 = vmul.f32 %v7202_v58, %v903_v12  ;;  %v907_v40 = vld [vmem:[#allocation2 + $0xb0] sm:$0xff] }
 0x127   : > { %11313 = vst [vmem:[#allocation51_spill] sm:$0xff] %v7578_v42  ;;  %11314 = vst [vmem:[#allocation52_spill] sm:$0xff] %v7581_v14  ;;  %v7595_v27 = vmul.f32 %v7202_v58, %v904_v32  ;;  %v7602_v56 = vmul.f32 %v7060_v25, %v903_v12  ;;  %v7605_v34 = vmul.f32 %v7060_v25, %v904_v32 }
 0x128   : > { %11315 = vst [vmem:[#allocation53_spill] sm:$0xff] %v7584_v48  ;;  %11316 = vst [vmem:[#allocation54_spill] sm:$0xff] %v7587_v9  ;;  %v1115_v61 = vsel %vm1082_vm5, %v1113_v53, %v1114_v5  ;;  %v1117_v41 = vsel %vm1082_vm5, %v1114_v5, %v1116_v50  ;;  %v1009_v21 = vmul.f32 %v6999_v37, %v908_v55 }
 0x129   : > { %11317 = vst [vmem:[#allocation55_spill] sm:$0xff] %v7592_v6  ;;  %11318 = vst [vmem:[#allocation56_spill] sm:$0xff] %v7595_v27  ;;  %v7609_v6 = vmul.f32 %v7022_v54, %v908_v55  ;;  %v906_v27 = vld [vmem:[#allocation2 + $0xa8] sm:$0xff]  ;;  %v7614_v5 = vmul.f32 %v7055_v24, %v908_v55  ;;  %v7617_v12 = vmul.f32 %v7060_v25, %v908_v55 }
 0x12a   : > { %11319 = vst [vmem:[#allocation57_spill] sm:$0xff] %v7602_v56  ;;  %11320 = vst [vmem:[#allocation58_spill] sm:$0xff] %v7605_v34  ;;  %v7619_v57 = vadd.f32 %v1115_v61, %v958_v23  ;;  %v7621_v32 = vadd.f32 %v1117_v41, %v959_v2  ;;  %v7624_v4 = vmul.f32 %v7090_v45, %v908_v55  ;;  %v1121_v14 = vrot.slane %v1009_v21, 1 }
 0x12b   : > { %11321 = vst [vmem:[#allocation59_spill] sm:$0xff] %v7609_v6  ;;  %11322 = vst [vmem:[#allocation60_spill] sm:$0xff] %v7614_v5  ;;  %v7627_v42 = vmul.f32 %v7095_v46, %v908_v55  ;;  %v960_v50 = vmul.f32 %v7031_v60, %v906_v27  ;;  %v961_v34 = vmul.f32 %v7031_v60, %v907_v40  ;;  %v911_v6 = vld [vmem:[#allocation2 + $0xd0] sm:$0x3] }
 0x12c   : > { %11323 = vst [vmem:[#allocation61_spill] sm:$0xff] %v7617_v12  ;;  %11324 = vst [vmem:[#allocation62_spill] sm:$0xff] %v7619_v57  ;;  %v1007_v2 = vmul.f32 %v6999_v37, %v906_v27  ;;  %v1008_v61 = vmul.f32 %v6999_v37, %v907_v40  ;;  %v7637_v41 = vmul.f32 %v7022_v54, %v906_v27 }
 0x12d   : > { %11325 = vst [vmem:[#allocation63_spill] sm:$0xff] %v7621_v32  ;;  %11326 = vst [vmem:[#allocation64_spill] sm:$0xff] %v7624_v4  ;;  %v7640_v55 = vmul.f32 %v7022_v54, %v907_v40  ;;  %v7643_v21 = vmul.f32 %v7055_v24, %v906_v27  ;;  %v7646_v53 = vmul.f32 %v7055_v24, %v907_v40 }
 0x12e   : > { %11327 = vst [vmem:[#allocation65_spill] sm:$0xff] %v7627_v42  ;;  %11328 = vst [vmem:[#allocation66_spill] sm:$0xff] %v7637_v41  ;;  %v1118_v12 = vrot.slane %v1007_v2, 1  ;;  %v1119_v5 = vrot.slane %v1008_v61, 1  ;;  %v7651_v32 = vmul.f32 %v7202_v58, %v906_v27  ;;  %v7654_v57 = vmul.f32 %v7202_v58, %v907_v40  ;;  %v909_v42 = vld [vmem:[#allocation2 + $0xc0] sm:$0xff]  ;;  %v6149_v41 = vpop.f32.mrf.mxu0 }
 0x12f   : > { %11329 = vst [vmem:[#allocation67_spill] sm:$0xff] %v7640_v55  ;;  %v7657_v59 = vmul.f32 %v7060_v25, %v906_v27  ;;  %v7660_v48 = vmul.f32 %v7060_v25, %v907_v40  ;;  %v1012_v23 = vmul.f32 %v6999_v37, %v911_v6  ;;  %v7666_v2 = vmul.f32 %v7022_v54, %v911_v6  ;;  %v910_v40 = vld [vmem:[#allocation2 + $0xc8] sm:$0xff] }
 0x130   : > { %11330 = vst [vmem:[#allocation68_spill] sm:$0xff] %v7651_v32  ;;  %11331 = vst [vmem:[#allocation69_spill] sm:$0xff] %v7654_v57  ;;  %v1120_v9 = vsel %vm1082_vm5, %v1118_v12, %v1119_v5  ;;  %v1122_v56 = vsel %vm1082_vm5, %v1119_v5, %v1121_v14  ;;  %v7677_v14 = vmul.f32 %v7055_v24, %v911_v6 }
 0x131   : > { %11332 = vst [vmem:[#allocation70_spill] sm:$0xff] %v7657_v59  ;;  %11333 = vst [vmem:[#allocation71_spill] sm:$0xff] %v7660_v48  ;;  %v7672_v4 = vadd.f32 %v1120_v9, %v960_v50  ;;  %v7674_v12 = vadd.f32 %v1122_v56, %v961_v34  ;;  %v7680_v5 = vmul.f32 %v7060_v25, %v911_v6  ;;  %v1126_v9 = vrot.slane %v1012_v23, 1 }
 0x132   : > { %11334 = vst [vmem:[#allocation72_spill] sm:$0xff] %v7666_v2  ;;  %11337 = vst [vmem:[#allocation75_spill] sm:$0xff] %v7677_v14  ;;  %v7685_v57 = vmul.f32 %v7090_v45, %v911_v6  ;;  %v7688_v27 = vmul.f32 %v7095_v46, %v911_v6  ;;  %v1010_v56 = vmul.f32 %v6999_v37, %v909_v42  ;;  %v837_v48 = vmax.f32 %v7436_v44, 0.0 }
 0x133   : > { %11335 = vst [vmem:[#allocation73_spill] sm:$0xff] %v7672_v4  ;;  %11336 = vst [vmem:[#allocation74_spill] sm:$0xff] %v7674_v12  ;;  %v1011_v50 = vmul.f32 %v6999_v37, %v910_v40  ;;  %v962_v12 = vmul.f32 %v7031_v60, %v909_v42  ;;  %v7695_v4 = vmul.f32 %v7031_v60, %v910_v40 }
 0x134   : > { %11338 = vst [vmem:[#allocation76_spill] sm:$0xff] %v7680_v5  ;;  %v7698_v61 = vmul.f32 %v7022_v54, %v909_v42  ;;  %v7701_v32 = vmul.f32 %v7022_v54, %v910_v40  ;;  %v1123_v34 = vrot.slane %v1010_v56, 1  ;;  %v7708_v60 = vmul.f32 %v7202_v58, %v909_v42  ;;  %869 = vst.msk [vmem:[#allocation2 + $0xd9] sm:$0xff] %vm305_vm2, %v837_v48  ;;  %v7767_v48 = vld [vmem:[%s11049_s6] ss:$0 sm:$0xff] }
 0x135   : > { %v1124_v2 = vrot.slane %v1011_v50, 1  ;;  %v7711_v59 = vmul.f32 %v7202_v58, %v910_v40  ;;  %v7716_v6 = vmul.f32 %v7055_v24, %v909_v42  ;;  %v7719_v56 = vmul.f32 %v7055_v24, %v910_v40  ;;  %v7830_v5 = vld [vmem:[%s11045_s2 + $0x1] ss:$0 sm:$0xff] }
 0x136   : > { %11339 = vst [vmem:[#allocation77_spill] sm:$0xff] %v7698_v61  ;;  %11340 = vst [vmem:[#allocation78_spill] sm:$0xff] %v7701_v32  ;;  %v7724_v55 = vmul.f32 %v7060_v25, %v909_v42  ;;  %v7727_v37 = vmul.f32 %v7060_v25, %v910_v40  ;;  %v838_v54 = vmax.f32 %v7433_v13, 0.0  ;;  %v808_v61 = vadd.f32 %v7009_v43, %v7404_v20 }
 0x137   : > { %11341 = vst [vmem:[#allocation79_spill] sm:$0xff] %v7711_v59  ;;  %11342 = vst [vmem:[#allocation80_spill] sm:$0xff] %v7716_v6  ;;  %v1125_v50 = vsel %vm1082_vm5, %v1123_v34, %v1124_v2  ;;  %v1127_v23 = vsel %vm1082_vm5, %v1124_v2, %v1126_v9  ;;  %v7735_v32 = vadd.f32 %v7009_v43, %v7427_v8  ;;  %v708_v34 = vpop.f32.mrf.mxu0 }
 0x138   : > { %11343 = vst [vmem:[#allocation81_spill] sm:$0xff] %v7724_v55  ;;  %11344 = vst [vmem:[#allocation82_spill] sm:$0xff] %v7727_v37  ;;  %v810_v2 = vadd.f32 %v7009_v43, %v7430_v52  ;;  %v7741_v42 = vadd.f32 %v7009_v43, %v7439_v26  ;;  %v7745_v13 = vadd.f32 %v7009_v43, %v7442_v1  ;;  %v840_v8 = vmax.f32 %v808_v61, 0.0 }
 0x139   : > { %11345 = vst [vmem:[#allocation83_spill] sm:$0xff] %v7735_v32  ;;  %v774_v40 = vmul.f32 %v7004_v39, %v698_v7  ;;  %v7748_v9 = vadd.f32 %v1125_v50, %v962_v12  ;;  %870 = vst.msk [vmem:[#allocation2 + $0xe1] sm:$0xff] %vm305_vm2, %v838_v54  ;;  %v839_v52 = vmax.f32 %v7735_v32, 0.0  ;;  %5419 = vrot.lane.b32.xlu1 %v808_v61, %s6664_s10  ;;  %v7760_v7 = vld [vmem:[#allocation3 + $0x10] sm:$0x3]  ;;  %v11350_v12 = vrot.slane %v7210_v16, 2 }
 0x13a   : > { %11346 = vst [vmem:[#allocation84_spill] sm:$0xff] %v7741_v42  ;;  %v842_v26 = vmax.f32 %v810_v2, 0.0  ;;  %v841_v44 = vmax.f32 %v7741_v42, 0.0  ;;  %v844_v1 = vmax.f32 %v7745_v13, 0.0  ;;  %11349 = vst [vmem:[#allocation87_spill] sm:$0xff] %v7760_v7  ;;  %v777_v61 = vmul.f32 %v7767_v48, %v6149_v41  ;;  %v6152_v41 = vpop.f32.mrf.mxu0 }
 0x13b   : > { %11347 = vst [vmem:[#allocation85_spill] sm:$0xff] %v7748_v9  ;;  %v7758_v39 = vadd.f32 %v7009_v43, %v774_v40  ;;  %872 = vst.msk [vmem:[#allocation2 + $0xf9] sm:$0xff] %vm305_vm2, %v840_v8  ;;  %v11351_v54 = vrot.slane %v7206_v15, 2  ;;  %v11352_v50 = vrot.slane %v7131_v0, 2  ;;  %v11353_v40 = vmov %v11350_v12  ;;  %v912_v42 = vld [vmem:[#allocation2 + $0xd8] sm:$0xff] }
 0x13c   : > { %871 = vst.msk [vmem:[#allocation2 + $0xf1] sm:$0xff] %vm305_vm2, %v839_v52  ;;  %v7783_v52 = vld [vmem:[%s11050_s7] ss:$0 sm:$0xff]  ;;  %v776_v20 = vmul.f32 %v7767_v48, %v708_v34  ;;  %874 = vst.msk [vmem:[#allocation2 + $0x111] sm:$0xff] %vm305_vm2, %v842_v26  ;;  %v7798_v34 = vld [vmem:[%s11049_s6 + $0x1] ss:$0 sm:$0xff] }
 0x13d   : > { %11348 = vst [vmem:[#allocation86_spill] sm:$0xff] %v7758_v39  ;;  %v2470_v43 = vsel %vm1331_vm6, %v11351_v54, %v11350_v12  ;;  %v2472_v8 = vsel %vm1331_vm6, %v11353_v40, %v11352_v50  ;;  %873 = vst.msk [vmem:[#allocation2 + $0x109] sm:$0xff] %vm305_vm2, %v841_v44  ;;  %v843_v0 = vmax.f32 %v7758_v39, 0.0  ;;  %v7792_v12 = vld [vmem:[#allocation3] sm:$0xff]  ;;  %v814_v26 = vadd.f32 %v7798_v34, %v777_v61 }
 0x13e   : > { %876 = vst.msk [vmem:[#allocation2 + $0x129] sm:$0xff] %vm305_vm2, %v844_v1  ;;  %v2580_v15 = vadd.f32 %v2470_v43, %v7315_v33  ;;  %v2581_v16 = vadd.f32 %v2472_v8, %v7317_v51  ;;  %11354 = vst [vmem:[#allocation88_spill] sm:$0xff] %v7792_v12  ;;  %v2872_v54 = vrot.slane %v7792_v12, 1  ;;  %v7802_v44 = vadd.f32 %v7798_v34, %v776_v20  ;;  %v7804_v1 = vld [vmem:[#allocation3 + $0x8] sm:$0xff]  ;;  %v7817_v8 = vld [vmem:[%s11050_s7 + $0x1] ss:$0 sm:$0xff] }
 0x13f   : > { %11356 = vst [vmem:[#allocation90_spill] sm:$0xff] %v7804_v1  ;;  %v2873_v33 = vrot.slane %v7804_v1, 1  ;;  %v2875_v51 = vrot.slane %v7760_v7, 1  ;;  %5423 = vrot.lane.b32.xlu1 %v810_v2, %s6664_s10  ;;  %875 = vst.msk [vmem:[#allocation2 + $0x121] sm:$0xff] %vm305_vm2, %v843_v0  ;;  %v779_v61 = vmul.f32 %v7767_v48, %v6152_v41  ;;  %v846_v20 = vmax.f32 %v814_v26, 0.0 }
 0x140   : > { %11355 = vst [vmem:[#allocation89_spill] sm:$0xff] %v7802_v44  ;;  %v2618_v50 = vmul.f32 %v7783_v52, %v2580_v15  ;;  %v2619_v40 = vmul.f32 %v7783_v52, %v2581_v16  ;;  %v845_v39 = vmax.f32 %v7802_v44, 0.0  ;;  %v7823_v0 = vadd.f32 %v1127_v23, %v7695_v4  ;;  %v914_v15 = vld [vmem:[#allocation2 + $0xe8] sm:$0x3]  ;;  %v913_v16 = vld [vmem:[#allocation2 + $0xe0] sm:$0xff] }
 0x141   : > { %v2874_v2 = vsel %vm1082_vm5, %v2872_v54, %v2873_v33  ;;  %v2876_v43 = vsel %vm1082_vm5, %v2873_v33, %v2875_v51  ;;  %v1015_v54 = vmul.f32 %v7830_v5, %v914_v15  ;;  %v7836_v4 = vld [vmem:[%s11045_s2 + $0x2] ss:$0 sm:$0xff]  ;;  %v7842_v33 = vmul.f32 %v7055_v24, %v914_v15  ;;  %878 = vst.msk [vmem:[#allocation2 + $0x141] sm:$0xff] %vm305_vm2, %v846_v20  ;;  %v7890_v24 = vld [vmem:[%s11045_s2 + $0x4] ss:$0 sm:$0xff] }
 0x142   : > { %11357 = vst [vmem:[#allocation91_spill] sm:$0xff] %v7823_v0  ;;  %v2984_v9 = vpack.c.bf16 %v2876_v43, %v2874_v2  ;;  %v7839_v23 = vmul.f32 %v7836_v4, %v914_v15  ;;  %v7845_v51 = vmul.f32 %v7060_v25, %v914_v15  ;;  %877 = vst.msk [vmem:[#allocation2 + $0x139] sm:$0xff] %vm305_vm2, %v845_v39  ;;  %v917_v1 = vld [vmem:[#allocation2 + $0x100] sm:$0x3] }
 0x143   : > { %11359 = vst [vmem:[#allocation93_spill] sm:$0xff] %v7842_v33  ;;  %5427 = vrot.lane.b32.xlu1 %v7745_v13, %s6664_s10  ;;  %v7852_v43 = vadd.f32 %v7817_v8, %v2618_v50  ;;  %v7855_v2 = vadd.f32 %v7817_v8, %v2619_v40  ;;  %v7860_v25 = vadd.f32 %v7798_v34, %v779_v61  ;;  %v7871_v13 = vld [vmem:[%s11045_s2] ss:$0 sm:$0xff]  ;;  %v1131_v40 = vrot.slane %v1015_v54, 1  ;;  %v915_v14 = vld [vmem:[#allocation2 + $0xf0] sm:$0xff]  ;;  %v916_v37 = vld [vmem:[#allocation2 + $0xf8] sm:$0xff] }
 0x144   : > { %11358 = vst [vmem:[#allocation92_spill] sm:$0xff] %v7839_v23  ;;  %11360 = vst [vmem:[#allocation94_spill] sm:$0xff] %v7845_v51  ;;  %6163 = vmatprep.mubr.msk.bf16.mxu1 %vm305_vm2, %v2984_v9  ;;  %v7863_v20 = vmul.f32 %v7090_v45, %v914_v15  ;;  %v7866_v39 = vmul.f32 %v7095_v46, %v914_v15  ;;  %v964_v50 = vmul.f32 %v7871_v13, %v912_v42 }
 0x145   : > { %v965_v9 = vmul.f32 %v7871_v13, %v913_v16  ;;  %v1013_v61 = vmul.f32 %v7830_v5, %v912_v42  ;;  %v1014_v45 = vmul.f32 %v7830_v5, %v913_v16  ;;  %v7881_v15 = vmul.f32 %v7836_v4, %v912_v42 }
 0x146   : > { %11361 = vst [vmem:[#allocation95_spill] sm:$0xff] %v7863_v20  ;;  %11362 = vst [vmem:[#allocation96_spill] sm:$0xff] %v7866_v39  ;;  %v7884_v32 = vmul.f32 %v7836_v4, %v913_v16  ;;  %v7893_v7 = vmul.f32 %v7890_v24, %v912_v42  ;;  %v7896_v46 = vmul.f32 %v7890_v24, %v913_v16  ;;  %v7944_v20 = vld [vmem:[%s11045_s2 + $0x7] ss:$0 sm:$0xff] }
 0x147   : > { %11363 = vst [vmem:[#allocation97_spill] sm:$0xff] %v7881_v15  ;;  %5431 = vrot.lane.b32.xlu1 %v814_v26, %s6664_s10  ;;  %v1128_v44 = vrot.slane %v1013_v61, 1  ;;  %v1129_v54 = vrot.slane %v1014_v45, 1  ;;  %v7903_v26 = vld [vmem:[%s11045_s2 + $0x5] ss:$0 sm:$0xff]  ;;  %v7914_v41 = vmul.f32 %v7202_v58, %v912_v42  ;;  %v7917_v12 = vmul.f32 %v7202_v58, %v913_v16 }
 0x148   : > { %11364 = vst [vmem:[#allocation98_spill] sm:$0xff] %v7884_v32  ;;  %11365 = vst [vmem:[#allocation99_spill] sm:$0xff] %v7893_v7  ;;  %v7906_v61 = vmul.f32 %v7903_v26, %v912_v42  ;;  %v7909_v45 = vmul.f32 %v7903_v26, %v913_v16  ;;  %v7927_v42 = vmul.f32 %v7836_v4, %v917_v1  ;;  %v7952_v32 = vld [vmem:[%s11045_s2 + $0x8] ss:$0 sm:$0xff] }
 0x149   : > { %11366 = vst [vmem:[#allocation100_spill] sm:$0xff] %v7896_v46  ;;  %v1130_v23 = vsel %vm1082_vm5, %v1128_v44, %v1129_v54  ;;  %v1132_v51 = vsel %vm1082_vm5, %v1129_v54, %v1131_v40  ;;  %11369 = vst [vmem:[#allocation103_spill] sm:$0xff] %v7914_v41  ;;  %v1018_v44 = vmul.f32 %v7830_v5, %v917_v1 }
 0x14a   : > { %11367 = vst [vmem:[#allocation101_spill] sm:$0xff] %v7906_v61  ;;  %11368 = vst [vmem:[#allocation102_spill] sm:$0xff] %v7909_v45  ;;  %v7930_v16 = vmul.f32 %v7890_v24, %v917_v1  ;;  %v7933_v40 = vmul.f32 %v7903_v26, %v917_v1  ;;  %v7935_v54 = vadd.f32 %v1130_v23, %v964_v50 }
 0x14b   : > { %11370 = vst [vmem:[#allocation104_spill] sm:$0xff] %v7917_v12  ;;  %5435 = vrot.lane.b32.xlu1 %v7860_v25, %s6664_s10  ;;  %11371 = vst [vmem:[#allocation105_spill] sm:$0xff] %v7927_v42  ;;  %v7937_v33 = vadd.f32 %v1132_v51, %v965_v9  ;;  %v7947_v15 = vmul.f32 %v7944_v20, %v917_v1  ;;  %v7955_v23 = vmul.f32 %v7952_v32, %v917_v1  ;;  %v920_v42 = vld [vmem:[#allocation2 + $0x118] sm:$0x3] }
 0x14c   : > { %11372 = vst [vmem:[#allocation106_spill] sm:$0xff] %v7930_v16  ;;  %11373 = vst [vmem:[#allocation107_spill] sm:$0xff] %v7933_v40  ;;  %v966_v51 = vmul.f32 %v7871_v13, %v915_v14  ;;  %v967_v50 = vmul.f32 %v7871_v13, %v916_v37  ;;  %v1136_v9 = vrot.slane %v1018_v44, 1  ;;  %v1016_v0 = vmul.f32 %v7830_v5, %v915_v14 }
 0x14d   : > { %11374 = vst [vmem:[#allocation108_spill] sm:$0xff] %v7935_v54  ;;  %11375 = vst [vmem:[#allocation109_spill] sm:$0xff] %v7937_v33  ;;  %v1017_v33 = vmul.f32 %v7830_v5, %v916_v37  ;;  %v7965_v45 = vmul.f32 %v7836_v4, %v915_v14  ;;  %v7968_v1 = vmul.f32 %v7836_v4, %v916_v37 }
 0x14e   : > { %11376 = vst [vmem:[#allocation110_spill] sm:$0xff] %v7947_v15  ;;  %11377 = vst [vmem:[#allocation111_spill] sm:$0xff] %v7955_v23  ;;  %v1133_v7 = vrot.slane %v1016_v0, 1  ;;  %v7971_v44 = vmul.f32 %v7890_v24, %v915_v14  ;;  %v7974_v39 = vmul.f32 %v7890_v24, %v916_v37  ;;  %v7979_v61 = vmul.f32 %v7202_v58, %v915_v14 }
 0x14f   : > { %11378 = vst [vmem:[#allocation112_spill] sm:$0xff] %v7965_v45  ;;  %11379 = vst [vmem:[#allocation113_spill] sm:$0xff] %v7968_v1  ;;  %v1134_v46 = vrot.slane %v1017_v33, 1  ;;  %v7982_v40 = vmul.f32 %v7202_v58, %v916_v37  ;;  %v7989_v59 = vmul.f32 %v7903_v26, %v915_v14  ;;  %v7992_v12 = vmul.f32 %v7903_v26, %v916_v37  ;;  %v918_v58 = vld [vmem:[#allocation2 + $0x108] sm:$0xff] }
 0x150   : > { %11380 = vst [vmem:[#allocation114_spill] sm:$0xff] %v7971_v44  ;;  %11381 = vst [vmem:[#allocation115_spill] sm:$0xff] %v7974_v39  ;;  %v1021_v54 = vmul.f32 %v7830_v5, %v920_v42  ;;  %v7996_v23 = vmul.f32 %v7836_v4, %v920_v42  ;;  %v8004_v14 = vmul.f32 %v7903_v26, %v920_v42 }
 0x151   : > { %11382 = vst [vmem:[#allocation116_spill] sm:$0xff] %v7979_v61  ;;  %11383 = vst [vmem:[#allocation117_spill] sm:$0xff] %v7982_v40  ;;  %v1135_v0 = vsel %vm1082_vm5, %v1133_v7, %v1134_v46  ;;  %v1137_v33 = vsel %vm1082_vm5, %v1134_v46, %v1136_v9  ;;  %v919_v40 = vld [vmem:[#allocation2 + $0x110] sm:$0xff]  ;;  %v8001_v9 = vmul.f32 %v7890_v24, %v920_v42  ;;  %v921_v61 = vld [vmem:[#allocation2 + $0x120] sm:$0xff] }
 0x152   : > { %11384 = vst [vmem:[#allocation118_spill] sm:$0xff] %v7989_v59  ;;  %11385 = vst [vmem:[#allocation119_spill] sm:$0xff] %v7992_v12  ;;  %v8006_v16 = vadd.f32 %v1135_v0, %v966_v51  ;;  %v8008_v37 = vadd.f32 %v1137_v33, %v967_v50  ;;  %v8011_v41 = vmul.f32 %v7944_v20, %v920_v42  ;;  %v1141_v1 = vrot.slane %v1021_v54, 1 }
 0x153   : > { %11386 = vst [vmem:[#allocation120_spill] sm:$0xff] %v7996_v23  ;;  %11387 = vst [vmem:[#allocation121_spill] sm:$0xff] %v8001_v9  ;;  %v8014_v45 = vmul.f32 %v7952_v32, %v920_v42  ;;  %v968_v46 = vmul.f32 %v7871_v13, %v918_v58  ;;  %v969_v12 = vmul.f32 %v7871_v13, %v919_v40  ;;  %v923_v23 = vld [vmem:[#allocation2 + $0x130] sm:$0x3] }
 0x154   : > { %11388 = vst [vmem:[#allocation122_spill] sm:$0xff] %v8004_v14  ;;  %11389 = vst [vmem:[#allocation123_spill] sm:$0xff] %v8006_v16  ;;  %v1019_v50 = vmul.f32 %v7830_v5, %v918_v58  ;;  %v1020_v0 = vmul.f32 %v7830_v5, %v919_v40  ;;  %v8024_v33 = vmul.f32 %v7836_v4, %v918_v58 }
 0x155   : > { %11390 = vst [vmem:[#allocation124_spill] sm:$0xff] %v8008_v37  ;;  %11391 = vst [vmem:[#allocation125_spill] sm:$0xff] %v8011_v41  ;;  %v8027_v42 = vmul.f32 %v7836_v4, %v919_v40  ;;  %v8030_v54 = vmul.f32 %v7890_v24, %v918_v58  ;;  %v8033_v7 = vmul.f32 %v7890_v24, %v919_v40  ;;  %v8040_v37 = vld [vmem:[%s11045_s2 + $0x3] ss:$0 sm:$0xff] }
 0x156   : > { %11392 = vst [vmem:[#allocation126_spill] sm:$0xff] %v8014_v45  ;;  %11393 = vst [vmem:[#allocation127_spill] sm:$0xff] %v8024_v33  ;;  %v1138_v14 = vrot.slane %v1019_v50, 1  ;;  %v1139_v9 = vrot.slane %v1020_v0, 1  ;;  %v8043_v16 = vmul.f32 %v8040_v37, %v918_v58  ;;  %v8046_v44 = vmul.f32 %v8040_v37, %v919_v40 }
 0x157   : > { %11394 = vst [vmem:[#allocation128_spill] sm:$0xff] %v8027_v42  ;;  %11395 = vst [vmem:[#allocation129_spill] sm:$0xff] %v8030_v54  ;;  %v8049_v39 = vmul.f32 %v7903_v26, %v918_v58  ;;  %v8052_v59 = vmul.f32 %v7903_v26, %v919_v40  ;;  %v1024_v51 = vmul.f32 %v7830_v5, %v923_v23  ;;  %v922_v40 = vld [vmem:[#allocation2 + $0x128] sm:$0xff] }
 0x158   : > { %11396 = vst [vmem:[#allocation130_spill] sm:$0xff] %v8033_v7  ;;  %11397 = vst [vmem:[#allocation131_spill] sm:$0xff] %v8043_v16  ;;  %v1140_v50 = vsel %vm1082_vm5, %v1138_v14, %v1139_v9  ;;  %v1142_v0 = vsel %vm1082_vm5, %v1139_v9, %v1141_v1  ;;  %v8058_v45 = vmul.f32 %v7836_v4, %v923_v23  ;;  %v926_v54 = vld [vmem:[#allocation2 + $0x148] sm:$0x3] }
 0x159   : > { %11398 = vst [vmem:[#allocation132_spill] sm:$0xff] %v8046_v44  ;;  %11399 = vst [vmem:[#allocation133_spill] sm:$0xff] %v8049_v39  ;;  %v8064_v15 = vadd.f32 %v1140_v50, %v968_v46  ;;  %v8066_v14 = vadd.f32 %v1142_v0, %v969_v12  ;;  %v8069_v1 = vmul.f32 %v7890_v24, %v923_v23  ;;  %v1146_v46 = vrot.slane %v1024_v51, 1 }
 0x15a   : > { %11400 = vst [vmem:[#allocation134_spill] sm:$0xff] %v8052_v59  ;;  %11401 = vst [vmem:[#allocation135_spill] sm:$0xff] %v8058_v45  ;;  %v8072_v9 = vmul.f32 %v7903_v26, %v923_v23  ;;  %v8077_v44 = vmul.f32 %v7944_v20, %v923_v23  ;;  %v8080_v58 = vmul.f32 %v7952_v32, %v923_v23 }
 0x15b   : > { %11402 = vst [vmem:[#allocation136_spill] sm:$0xff] %v8064_v15  ;;  %11403 = vst [vmem:[#allocation137_spill] sm:$0xff] %v8066_v14  ;;  %v1022_v50 = vmul.f32 %v7830_v5, %v921_v61  ;;  %v1023_v0 = vmul.f32 %v7830_v5, %v922_v40  ;;  %v970_v14 = vmul.f32 %v7871_v13, %v921_v61 }
 0x15c   : > { %11404 = vst [vmem:[#allocation138_spill] sm:$0xff] %v8069_v1  ;;  %11405 = vst [vmem:[#allocation139_spill] sm:$0xff] %v8072_v9  ;;  %v971_v15 = vmul.f32 %v7871_v13, %v922_v40  ;;  %v8088_v16 = vmul.f32 %v7836_v4, %v921_v61  ;;  %v8091_v41 = vmul.f32 %v7836_v4, %v922_v40  ;;  %v925_v9 = vld [vmem:[#allocation2 + $0x140] sm:$0xff] }
 0x15d   : > { %11406 = vst [vmem:[#allocation140_spill] sm:$0xff] %v8077_v44  ;;  %11407 = vst [vmem:[#allocation141_spill] sm:$0xff] %v8080_v58  ;;  %v1143_v33 = vrot.slane %v1022_v50, 1  ;;  %v1144_v12 = vrot.slane %v1023_v0, 1  ;;  %v8098_v39 = vmul.f32 %v8040_v37, %v921_v61  ;;  %v8101_v59 = vmul.f32 %v8040_v37, %v922_v40 }
 0x15e   : > { %11408 = vst [vmem:[#allocation142_spill] sm:$0xff] %v8088_v16  ;;  %11409 = vst [vmem:[#allocation143_spill] sm:$0xff] %v8091_v41  ;;  %v8106_v23 = vmul.f32 %v7890_v24, %v921_v61  ;;  %v8109_v50 = vmul.f32 %v7890_v24, %v922_v40  ;;  %v8114_v42 = vmul.f32 %v7903_v26, %v921_v61 }
 0x15f   : > { %11410 = vst [vmem:[#allocation144_spill] sm:$0xff] %v8098_v39  ;;  %11411 = vst [vmem:[#allocation145_spill] sm:$0xff] %v8101_v59  ;;  %v1145_v0 = vsel %vm1082_vm5, %v1143_v33, %v1144_v12  ;;  %v1147_v51 = vsel %vm1082_vm5, %v1144_v12, %v1146_v46  ;;  %v8117_v45 = vmul.f32 %v7903_v26, %v922_v40  ;;  %v2686_v40 = vmax.f32 %v7852_v43, 0.0  ;;  %v924_v12 = vld [vmem:[#allocation2 + $0x138] sm:$0xff] }
 0x160   : > { %11412 = vst [vmem:[#allocation146_spill] sm:$0xff] %v8106_v23  ;;  %11413 = vst [vmem:[#allocation147_spill] sm:$0xff] %v8109_v50  ;;  %v1027_v7 = vmul.f32 %v7830_v5, %v926_v54  ;;  %v8121_v55 = vmul.f32 %v7836_v4, %v926_v54  ;;  %v8124_v16 = vmul.f32 %v7890_v24, %v926_v54  ;;  %v2687_v46 = vmax.f32 %v7855_v2, 0.0 }
 0x161   : > { %11414 = vst [vmem:[#allocation148_spill] sm:$0xff] %v8114_v42  ;;  %11415 = vst [vmem:[#allocation149_spill] sm:$0xff] %v8117_v45  ;;  %v8127_v41 = vmul.f32 %v7903_v26, %v926_v54  ;;  %v8130_v33 = vmul.f32 %v7944_v20, %v926_v54  ;;  %v8133_v61 = vmul.f32 %v7952_v32, %v926_v54 }
 0x162   : > { %11416 = vst [vmem:[#allocation150_spill] sm:$0xff] %v8121_v55  ;;  %11417 = vst [vmem:[#allocation151_spill] sm:$0xff] %v8124_v16  ;;  %v8137_v1 = vadd.f32 %v1145_v0, %v970_v14  ;;  %v8139_v59 = vadd.f32 %v1147_v51, %v971_v15  ;;  %v1151_v39 = vrot.slane %v1027_v7, 1  ;;  %v1025_v15 = vmul.f32 %v7830_v5, %v924_v12 }
 0x163   : > { %11418 = vst [vmem:[#allocation152_spill] sm:$0xff] %v8127_v41  ;;  %11419 = vst [vmem:[#allocation153_spill] sm:$0xff] %v8130_v33  ;;  %v1026_v14 = vmul.f32 %v7830_v5, %v925_v9  ;;  %v8153_v7 = vmul.f32 %v7836_v4, %v924_v12  ;;  %v8156_v51 = vmul.f32 %v7836_v4, %v925_v9  ;;  %v848_v16 = vmax.f32 %v7860_v25, 0.0 }
 0x164   : > { %11420 = vst [vmem:[#allocation154_spill] sm:$0xff] %v8133_v61  ;;  %11421 = vst [vmem:[#allocation155_spill] sm:$0xff] %v8137_v1  ;;  %v8159_v0 = vmul.f32 %v7890_v24, %v924_v12  ;;  %v972_v58 = vmul.f32 %v7871_v13, %v924_v12  ;;  %v973_v44 = vmul.f32 %v7871_v13, %v925_v9  ;;  %v1148_v2 = vrot.slane %v1025_v15, 1 }
 0x165   : > { %11422 = vst [vmem:[#allocation156_spill] sm:$0xff] %v8139_v59  ;;  %2718 = vst.msk [vmem:[#allocation3 + $0x19] sm:$0xff] %vm305_vm2, %v2686_v40  ;;  %v8162_v40 = vmul.f32 %v7890_v24, %v925_v9  ;;  %v1149_v54 = vrot.slane %v1026_v14, 1  ;;  %v8167_v43 = vmul.f32 %v8040_v37, %v924_v12  ;;  %v8170_v45 = vmul.f32 %v8040_v37, %v925_v9 }
 0x166   : > { %2719 = vst.msk [vmem:[#allocation3 + $0x21] sm:$0xff] %vm305_vm2, %v2687_v46  ;;  %11423 = vst [vmem:[#allocation157_spill] sm:$0xff] %v8153_v7  ;;  %v718_v46 = vpop.f32.mrf.mxu0  ;;  %v8173_v42 = vmul.f32 %v7903_v26, %v924_v12  ;;  %v8176_v55 = vmul.f32 %v7903_v26, %v925_v9 }
 0x167   : > { %11424 = vst [vmem:[#allocation158_spill] sm:$0xff] %v8156_v51  ;;  %11425 = vst [vmem:[#allocation159_spill] sm:$0xff] %v8159_v0  ;;  %v1150_v41 = vsel %vm1082_vm5, %v1148_v2, %v1149_v54  ;;  %v1152_v61 = vsel %vm1082_vm5, %v1149_v54, %v1151_v39  ;;  %v778_v15 = vmul.f32 %v7767_v48, %v718_v46  ;;  %v1905_v39 = vrot.slane %v7179_v30, 2 }
 0x168   : > { %11426 = vst [vmem:[#allocation160_spill] sm:$0xff] %v8162_v40  ;;  %11427 = vst [vmem:[#allocation161_spill] sm:$0xff] %v8167_v43  ;;  %v8190_v1 = vadd.f32 %v1150_v41, %v972_v58  ;;  %v1906_v54 = vrot.slane %v7183_v31, 2  ;;  %v8204_v14 = vadd.f32 %v1152_v61, %v973_v44  ;;  %v11438_v44 = vrot.slane %v7125_v62, 2  ;;  %v8221_v41 = vld [vmem:[%s11045_s2 + $0x6] ss:$0 sm:$0xff] }
 0x169   : > { %11428 = vst [vmem:[#allocation162_spill] sm:$0xff] %v8170_v45  ;;  %11429 = vst [vmem:[#allocation163_spill] sm:$0xff] %v8173_v42  ;;  %v8196_v25 = vadd.f32 %v7798_v34, %v778_v15  ;;  %v6561_v43 = vld [vmem:[#allocation2 + $0x48] sm:$0xff] }
 0x16a   : > { %11430 = vst [vmem:[#allocation164_spill] sm:$0xff] %v8176_v55  ;;  %11433 = vst [vmem:[#allocation167_spill] sm:$0xff] %v8190_v1  ;;  %v1907_v31 = vsel %vm1331_vm6, %v1905_v39, %v1906_v54  ;;  %v1909_v61 = vsel %vm1331_vm6, %v1906_v54, %v11438_v44  ;;  %v2054_v45 = vmul.f32 %v6561_v43, %v8221_v41  ;;  %v6562_v44 = vld [vmem:[#allocation2 + $0x50] sm:$0xff]  ;;  %v11455_v55 = vrot.slane %v7161_v18, 2  ;;  %v11456_v40 = vld [vmem:[#allocation8_spill] sm:$0xff] }
 0x16b   : > { %880 = vst.msk [vmem:[#allocation2 + $0x159] sm:$0xff] %vm305_vm2, %v848_v16  ;;  %11435 = vst [vmem:[#allocation169_spill] sm:$0xff] %v8196_v25  ;;  %v847_v30 = vmax.f32 %v8196_v25, 0.0  ;;  %v2127_v12 = vmul.f32 %v6561_v43, %v7944_v20  ;;  %v6155_v25 = vpop.f32.mrf.mxu0  ;;  %v2014_v62 = vadd.f32 %v1907_v31, %v7298_v36  ;;  %v2015_v39 = vadd.f32 %v1909_v61, %v7300_v22 }
 0x16c   : > { %v8186_v59 = vld [vmem:[#allocation3 + $0x18] sm:$0xff]  ;;  %11437 = vst [vmem:[#allocation171_spill] sm:$0xff] %v8204_v14  ;;  %v2055_v1 = vmul.f32 %v6562_v44, %v8221_v41  ;;  %v2128_v7 = vmul.f32 %v6562_v44, %v7944_v20  ;;  %v2375_v51 = vmul.f32 %v6561_v43, %v7952_v32 }
 0x16d   : > { %11431 = vst [vmem:[#allocation165_spill] sm:$0xff] %v8186_v59  ;;  %v8188_v9 = vld [vmem:[#allocation3 + $0x20] sm:$0xff]  ;;  %v8192_v2 = vld [vmem:[#allocation3 + $0x28] sm:$0x3]  ;;  %v2877_v58 = vrot.slane %v8186_v59, 1  ;;  %879 = vst.msk [vmem:[#allocation2 + $0x151] sm:$0xff] %vm305_vm2, %v847_v30  ;;  %v2086_v22 = vadd.f32 %v2054_v45, %v2014_v62  ;;  %v2376_v30 = vmul.f32 %v6562_v44, %v7952_v32  ;;  %v728_v31 = vpop.f32.mrf.mxu0 }
 0x16e   : > { %11432 = vst [vmem:[#allocation166_spill] sm:$0xff] %v8188_v9  ;;  %11434 = vst [vmem:[#allocation168_spill] sm:$0xff] %v8192_v2  ;;  %v8202_v46 = vpack.c.bf16 %v8188_v9, %v8186_v59  ;;  %v2878_v16 = vrot.slane %v8188_v9, 1  ;;  %v2880_v15 = vrot.slane %v8192_v2, 1  ;;  %v6563_v45 = vld [vmem:[%s11046_s3 + $0x28] sm:$0xff]   ;;  %v2473_v62 = vrot.slane %v2375_v51, 2 }
 0x16f   : > { %v11445_v2 = vrot.slane %v7161_v18, 2 }
 0x170   : > { %11436 = vst [vmem:[#allocation170_spill] sm:$0xff] %v8202_v46  ;;  %6200 = vmatmul.mubr.msk.bf16.vlgmr.msra.gmra.mxu0 %vm305_vm2, %v8202_v46  ;;  %v2879_v14 = vsel %vm1082_vm5, %v2877_v58, %v2878_v16  ;;  %v2881_v46 = vsel %vm1082_vm5, %v2878_v16, %v2880_v15  ;;  %v2225_v15 = vrot.slane %v2127_v12, 1  ;;  %v11444_v16 = vrot.slane %v7284_v38, 1 }
 0x171   : > { %v8230_v54 = vpack.c.bf16 %v2881_v46, %v2879_v14  ;;  %v2087_v14 = vadd.f32 %v2055_v1, %v2015_v39  ;;  %v2226_v46 = vrot.slane %v2128_v7, 1  ;;  %v781_v39 = vmul.f32 %v7767_v48, %v6155_v25 }
 0x172   : > { %v929_v36 = vld [vmem:[#allocation2 + $0x160] sm:$0x3] }
 0x173   : > { %11439 = vst [vmem:[#allocation172_spill] sm:$0xff] %v8230_v54  ;;  %6164 = vmatmul.mubr.msk.bf16.vlgmr.msra.gmra.mxu1 %vm305_vm2, %v8230_v54  ;;  %v8242_v61 = vmul.f32 %v7830_v5, %v929_v36  ;;  %v8245_v43 = vmul.f32 %v7836_v4, %v929_v36  ;;  %v8248_v42 = vmul.f32 %v7890_v24, %v929_v36 }
 0x174   : > { %v8251_v12 = vmul.f32 %v7903_v26, %v929_v36  ;;  %6232 = vmatpush3.bf16.msra.mxu1 %v6563_v45  ;;  %v8257_v1 = vmul.f32 %v7944_v20, %v929_v36  ;;  %v8260_v7 = vmul.f32 %v7952_v32, %v929_v36  ;;  %v2227_v44 = vsel %vm1082_vm5, %v2225_v15, %v2226_v46  ;;  %v927_v9 = vld [vmem:[#allocation2 + $0x150] sm:$0xff]  ;;  %v8277_v38 = vld [vmem:[#allocation2 + $0x158] sm:$0xff] }
 0x175   : > { %11440 = vst [vmem:[#allocation173_spill] sm:$0xff] %v8248_v42  ;;  %v2229_v58 = vsel %vm1082_vm5, %v2226_v46, %v11444_v16  ;;  %v780_v54 = vmul.f32 %v7767_v48, %v728_v31  ;;  %v11446_v45 = vrot.slane %v7157_v17, 2  ;;  %v8282_v31 = vmul.f32 %v7830_v5, %v927_v9 }
 0x176   : > { %11441 = vst [vmem:[#allocation174_spill] sm:$0xff] %v8251_v12  ;;  %11442 = vst [vmem:[#allocation175_spill] sm:$0xff] %v8257_v1  ;;  %v8286_v17 = vmul.f32 %v7830_v5, %v8277_v38  ;;  %v2334_v15 = vadd.f32 %v2227_v44, %v2086_v22  ;;  %v2335_v25 = vadd.f32 %v2229_v58, %v2087_v14 }
 0x177   : > { %11443 = vst [vmem:[#allocation176_spill] sm:$0xff] %v8260_v7  ;;  %v1344_v59 = vsel %vm1331_vm6, %v11446_v45, %v11445_v2  ;;  %v8289_v2 = vmul.f32 %v7836_v4, %v927_v9  ;;  %v8293_v45 = vmul.f32 %v7836_v4, %v8277_v38  ;;  %v8296_v16 = vmul.f32 %v7871_v13, %v927_v9  ;;  %v11453_v7 = vld [vmem:[#allocation7_spill] sm:$0xff] }
 0x178   : > { %v8300_v46 = vmul.f32 %v7871_v13, %v8277_v38  ;;  %v8303_v51 = vmul.f32 %v8040_v37, %v927_v9  ;;  %v8307_v36 = vmul.f32 %v8040_v37, %v8277_v38  ;;  %v8312_v58 = vmul.f32 %v7890_v24, %v927_v9 }
 0x179   : > { %v8316_v22 = vmul.f32 %v7890_v24, %v8277_v38  ;;  %v818_v42 = vadd.f32 %v7798_v34, %v781_v39  ;;  %v8325_v12 = vadd.f32 %v7798_v34, %v780_v54  ;;  %v11454_v1 = vrot.slane %v11453_v7, 2 }
 0x17a   : > { %11447 = vst [vmem:[#allocation177_spill] sm:$0xff] %v8303_v51  ;;  %11448 = vst [vmem:[#allocation178_spill] sm:$0xff] %v8307_v36  ;;  %v2474_v51 = vrot.slane %v2376_v30, 2  ;;  %v8322_v36 = vmul.f32 %v7903_v26, %v927_v9  ;;  %v1448_v33 = vadd.f32 %v1344_v59, %v11456_v40  ;;  %v11457_v30 = vrot.slane %v7287_v3, 2  ;;  %v11458_v9 = vld [vmem:[#allocation9_spill] sm:$0xff] }
 0x17b   : > { %11449 = vst [vmem:[#allocation179_spill] sm:$0xff] %v8312_v58  ;;  %11450 = vst [vmem:[#allocation180_spill] sm:$0xff] %v8316_v22  ;;  %v1346_v0 = vsel %vm1331_vm6, %v11455_v55, %v11454_v1  ;;  %v850_v44 = vmax.f32 %v818_v42, 0.0  ;;  %5439 = vrot.lane.b32.xlu1 %v818_v42, %s6664_s10  ;;  %v849_v7 = vmax.f32 %v8325_v12, 0.0  ;;  %v11459_v55 = vrot.slane %v7323_v47, 1  ;;  %v11494_v22 = vld [vmem:[#allocation33_spill] sm:$0xff] }
 0x17c   : > { %11451 = vst [vmem:[#allocation181_spill] sm:$0xff] %v8322_v36  ;;  %11452 = vst [vmem:[#allocation182_spill] sm:$0xff] %v8325_v12  ;;  %v2475_v14 = vsel %vm1331_vm6, %v2473_v62, %v2474_v51  ;;  %v2477_v39 = vsel %vm1331_vm6, %v2474_v51, %v11457_v30  ;;  %v1449_v36 = vadd.f32 %v1346_v0, %v11458_v9  ;;  %v11460_v3 = vrot.slane %v7320_v19, 1 }
 0x17d   : > { %v2582_v54 = vadd.f32 %v2475_v14, %v2334_v15  ;;  %v2583_v23 = vadd.f32 %v2477_v39, %v2335_v25  ;;  %v1520_v18 = vadd.f32 %v7332_v29, %v1448_v33  ;;  %882 = vst.msk [vmem:[#allocation2 + $0x171] sm:$0xff] %vm305_vm2, %v850_v44  ;;  %v11461_v0 = vrot.slane %v7278_v11, 1  ;;  %881 = vst.msk [vmem:[#allocation2 + $0x169] sm:$0xff] %vm305_vm2, %v849_v7  ;;  %v6564_v15 = vld [vmem:[#allocation2 + $0x60] sm:$0xff]  ;;  %v6565_v44 = vld [vmem:[#allocation2 + $0x68] sm:$0xff] }
 0x17e   : > { %v1521_v59 = vadd.f32 %v7335_v35, %v1449_v36  ;;  %v1664_v40 = vsel %vm1082_vm5, %v11460_v3, %v11459_v55  ;;  %v11462_v42 = vmov %v11459_v55  ;;  %v11463_v62 = vrot.slane %v7348_v63, 2 }
 0x17f   : > { %v1666_v1 = vsel %vm1082_vm5, %v11462_v42, %v11461_v0  ;;  %v11464_v29 = vrot.slane %v7345_v28, 2  ;;  %v2620_v35 = vmul.f32 %v7783_v52, %v2582_v54  ;;  %v2621_v36 = vmul.f32 %v7783_v52, %v2583_v23  ;;  %v6531_v23 = vld [vmem:[%s11046_s3 + $0x20] sm:$0xff]  }
 0x180   : > { %v1768_v19 = vadd.f32 %v1664_v40, %v1520_v18  ;;  %v11465_v51 = vrot.slane %v7281_v10, 2  ;;  %v11466_v11 = vmov %v11463_v62  ;;  %v1769_v25 = vadd.f32 %v1666_v1, %v1521_v59  ;;  %6233 = vmatprep.subr.bf16.mxu1 %v6531_v23  ;;  %v11480_v1 = vld [vmem:[#allocation14_spill] sm:$0xff] }
 0x181   : > { %v1912_v33 = vsel %vm1331_vm6, %v11464_v29, %v11463_v62  ;;  %v2056_v14 = vmul.f32 %v6564_v15, %v8221_v41  ;;  %v2130_v28 = vmul.f32 %v6564_v15, %v7944_v20  ;;  %v2131_v30 = vmul.f32 %v6565_v44, %v7944_v20  ;;  %6234 = vmatpush3.bf16.msra.mxu1 %v6531_v23 }
 0x182   : > { %v1914_v47 = vsel %vm1331_vm6, %v11466_v11, %v11465_v51  ;;  %v2656_v39 = vadd.f32 %v7817_v8, %v2620_v35  ;;  %v2657_v10 = vadd.f32 %v7817_v8, %v2621_v36  ;;  %v2016_v63 = vadd.f32 %v1912_v33, %v1768_v19 }
 0x183   : > { %v2378_v9 = vmul.f32 %v6564_v15, %v7952_v32  ;;  %v2017_v54 = vadd.f32 %v1914_v47, %v1769_v25  ;;  %v2230_v7 = vrot.slane %v2130_v28, 1  ;;  %v2231_v18 = vrot.slane %v2131_v30, 1 }
 0x184   : > { %v2379_v59 = vmul.f32 %v6565_v44, %v7952_v32  ;;  %v2688_v55 = vmax.f32 %v2656_v39, 0.0  ;;  %v2689_v3 = vmax.f32 %v2657_v10, 0.0  ;;  %v2057_v40 = vmul.f32 %v6565_v44, %v8221_v41  ;;  %v932_v33 = vld [vmem:[#allocation2 + $0x178] sm:$0x3]  ;;  %v8403_v28 = vld [vmem:[#allocation2 + $0x170] sm:$0xff] }
 0x185   : > { %v2088_v0 = vadd.f32 %v2056_v14, %v2016_v63  ;;  %v8381_v62 = vmul.f32 %v7903_v26, %v8277_v38  ;;  %v2478_v29 = vrot.slane %v2378_v9, 2  ;;  %v2232_v36 = vsel %vm1082_vm5, %v2230_v7, %v2231_v18  ;;  %v8401_v14 = vld [vmem:[#allocation2 + $0x168] sm:$0xff]  ;;  %v11473_v7 = vld [vmem:[#allocation11_spill] sm:$0xff] }
 0x186   : > { %2720 = vst.msk [vmem:[#allocation3 + $0x31] sm:$0xff] %vm305_vm2, %v2688_v55  ;;  %2721 = vst.msk [vmem:[#allocation3 + $0x39] sm:$0xff] %vm305_vm2, %v2689_v3  ;;  %v2089_v35 = vadd.f32 %v2057_v40, %v2017_v54  ;;  %v11468_v19 = vrot.slane %v7419_v49, 1  ;;  %v2479_v11 = vrot.slane %v2379_v59, 2  ;;  %v8390_v47 = vmul.f32 %v7830_v5, %v932_v33  ;;  %v6158_v49 = vpop.f32.mrf.mxu0  ;;  %v11471_v9 = vld [vmem:[#allocation12_spill] sm:$0xff]  ;;  %v11475_v55 = vld [vmem:[#allocation10_spill] sm:$0xff] }
 0x187   : > { %11467 = vst [vmem:[#allocation7_spill] sm:$0xff] %v8381_v62  ;;  %v8393_v38 = vmul.f32 %v7836_v4, %v932_v33  ;;  %v8396_v25 = vmul.f32 %v7890_v24, %v932_v33  ;;  %v8399_v15 = vmul.f32 %v7903_v26, %v932_v33  ;;  %v8406_v44 = vmul.f32 %v7944_v20, %v932_v33  ;;  %v11487_v62 = vld [vmem:[#allocation23_spill] sm:$0xff] }
 0x188   : > { %v2234_v51 = vsel %vm1082_vm5, %v2231_v18, %v11468_v19  ;;  %v8409_v30 = vmul.f32 %v7952_v32, %v932_v33  ;;  %v2336_v23 = vadd.f32 %v2232_v36, %v2088_v0  ;;  %v783_v39 = vmul.f32 %v7767_v48, %v6158_v49  ;;  %v11484_v49 = vld [vmem:[#allocation26_spill] sm:$0xff] }
 0x189   : > { %11469 = vst [vmem:[#allocation8_spill] sm:$0xff] %v8406_v44  ;;  %v8414_v10 = vmul.f32 %v7830_v5, %v8401_v14  ;;  %v8418_v63 = vmul.f32 %v7830_v5, %v8403_v28  ;;  %v11472_v54 = vrot.slane %v11471_v9, 2  ;;  %v11474_v18 = vrot.slane %v11473_v7, 2  ;;  %v11485_v44 = vld [vmem:[#allocation24_spill] sm:$0xff] }
 0x18a   : > { %11470 = vst [vmem:[#allocation9_spill] sm:$0xff] %v8409_v30  ;;  %v11476_v3 = vrot.slane %v11475_v55, 2  ;;  %v2337_v42 = vadd.f32 %v2234_v51, %v2089_v35 }
 0x18b   : > { %v1349_v59 = vsel %vm1331_vm6, %v11474_v18, %v11472_v54  ;;  %v11477_v40 = vmov %v11472_v54  ;;  %v2480_v54 = vsel %vm1331_vm6, %v2478_v29, %v2479_v11  ;;  %v11478_v18 = vld [vmem:[#allocation19_spill] sm:$0xff] }
 0x18c   : > { %v1351_v0 = vsel %vm1331_vm6, %v11477_v40, %v11476_v3  ;;  %v11479_v55 = vrot.slane %v11478_v18, 2  ;;  %v2584_v3 = vadd.f32 %v2480_v54, %v2336_v23  ;;  %v820_v40 = vadd.f32 %v7798_v34, %v783_v39  ;;  %v11481_v29 = vld [vmem:[#allocation15_spill] sm:$0xff] }
 0x18d   : > { %v1450_v36 = vadd.f32 %v1349_v59, %v11480_v1  ;;  %v8442_v33 = vld [vmem:[#allocation3 + $0x30] sm:$0xff]  ;;  %v8444_v19 = vld [vmem:[#allocation3 + $0x38] sm:$0xff]  ;;  %v2758_v5 = vld [vmem:[#allocation3 + $0x40] sm:$0x3]  ;;  %v1451_v7 = vadd.f32 %v1351_v0, %v11481_v29  ;;  %v8457_v39 = vmul.f32 %v7890_v24, %v8401_v14 }
 0x18e   : > { %v2482_v9 = vsel %vm1331_vm6, %v2479_v11, %v11479_v55  ;;  %v8451_v11 = vpack.c.bf16 %v8444_v19, %v8442_v33  ;;  %v2882_v23 = vrot.slane %v8442_v33, 1  ;;  %v2883_v1 = vrot.slane %v8444_v19, 1  ;;  %5443 = vrot.lane.b32.xlu1 %v820_v40, %s6664_s10 }
 0x18f   : > { %v2585_v51 = vadd.f32 %v2482_v9, %v2337_v42  ;;  %v2885_v59 = vrot.slane %v2758_v5, 1  ;;  %v8462_v42 = vmul.f32 %v7890_v24, %v8403_v28  ;;  %v2622_v0 = vmul.f32 %v7783_v52, %v2584_v3  ;;  %v11483_v9 = vld [vmem:[#allocation25_spill] sm:$0xff] }
 0x190   : > { %11482 = vst [vmem:[#allocation12_spill] sm:$0xff] %v8451_v11  ;;  %6203 = vmatprep.mubr.msk.bf16.mxu0 %vm305_vm2, %v8451_v11  ;;  %v2884_v18 = vsel %vm1082_vm5, %v2882_v23, %v2883_v1  ;;  %v852_v55 = vmax.f32 %v820_v40, 0.0  ;;  %v1522_v29 = vadd.f32 %v11483_v9, %v1450_v36  ;;  %v1523_v35 = vadd.f32 %v11484_v49, %v1451_v7  ;;  %v11490_v40 = vld [vmem:[#allocation17_spill] sm:$0xff] }
 0x191   : > { %v2623_v54 = vmul.f32 %v7783_v52, %v2585_v51  ;;  %v2886_v5 = vsel %vm1082_vm5, %v2883_v1, %v2885_v59  ;;  %v2658_v12 = vadd.f32 %v7817_v8, %v2622_v0  ;;  %v11486_v3 = vrot.slane %v11485_v44, 1  ;;  %v11493_v1 = vld [vmem:[#allocation32_spill] sm:$0xff] }
 0x192   : > { %v11488_v51 = vrot.slane %v11487_v62, 1  ;;  %v8479_v11 = vpack.c.bf16 %v2886_v5, %v2884_v18  ;;  %884 = vst.msk [vmem:[#allocation2 + $0x189] sm:$0xff] %vm305_vm2, %v852_v55  ;;  %v11491_v36 = vrot.slane %v11490_v40, 1  ;;  %v1915_v59 = vrot.slane %v11493_v1, 2  ;;  %v6566_v18 = vld [vmem:[#allocation2 + $0x78] sm:$0xff]  ;;  %v6567_v5 = vld [vmem:[#allocation2 + $0x80] sm:$0xff] }
 0x193   : > { %v2659_v30 = vadd.f32 %v7817_v8, %v2623_v54  ;;  %v11492_v49 = vmov %v11486_v3  ;;  %v2690_v0 = vmax.f32 %v2658_v12, 0.0  ;;  %v1916_v62 = vrot.slane %v11494_v22, 2  ;;  %v11495_v22 = vld [vmem:[#allocation18_spill] sm:$0xff] }
 0x194   : > { %v1669_v58 = vsel %vm1082_vm5, %v11488_v51, %v11486_v3  ;;  %11489 = vst [vmem:[#allocation11_spill] sm:$0xff] %v8479_v11  ;;  %v1671_v7 = vsel %vm1082_vm5, %v11492_v49, %v11491_v36  ;;  %6167 = vmatprep.mubr.msk.bf16.mxu1 %vm305_vm2, %v8479_v11  ;;  %v2058_v55 = vmul.f32 %v6566_v18, %v8221_v41 }
 0x195   : > { %v1770_v23 = vadd.f32 %v1669_v58, %v1522_v29  ;;  %v2691_v54 = vmax.f32 %v2659_v30, 0.0  ;;  %v1771_v9 = vadd.f32 %v1671_v7, %v1523_v35  ;;  %v2059_v3 = vmul.f32 %v6567_v5, %v8221_v41  ;;  %v738_v29 = vpop.f32.mrf.mxu0  ;;  %2722 = vst.msk [vmem:[#allocation3 + $0x49] sm:$0xff] %vm305_vm2, %v2690_v0 }
 0x196   : > { %v2133_v44 = vmul.f32 %v6566_v18, %v7944_v20  ;;  %v2134_v58 = vmul.f32 %v6567_v5, %v7944_v20  ;;  %v1917_v12 = vsel %vm1331_vm6, %v1915_v59, %v1916_v62  ;;  %v11496_v30 = vrot.slane %v11495_v22, 2 }
 0x197   : > { %2723 = vst.msk [vmem:[#allocation3 + $0x51] sm:$0xff] %vm305_vm2, %v2691_v54  ;;  %v2381_v51 = vmul.f32 %v6566_v18, %v7952_v32  ;;  %v2382_v40 = vmul.f32 %v6567_v5, %v7952_v32  ;;  %v2018_v36 = vadd.f32 %v1917_v12, %v1770_v23  ;;  %v782_v54 = vmul.f32 %v7767_v48, %v738_v29 }
 0x198   : > { %v1919_v35 = vsel %vm1331_vm6, %v1916_v62, %v11496_v30  ;;  %v2235_v7 = vrot.slane %v2133_v44, 1  ;;  %v2236_v1 = vrot.slane %v2134_v58, 1  ;;  %v1723_v22 = vrot.slane %v8462_v42, 1  ;;  %v11498_v58 = vld [vmem:[#allocation34_spill] sm:$0xff] }
 0x199   : > { %v2019_v49 = vadd.f32 %v1919_v35, %v1771_v9  ;;  %v2483_v50 = vrot.slane %v2381_v51, 2  ;;  %v2484_v0 = vrot.slane %v2382_v40, 2  ;;  %v2090_v6 = vadd.f32 %v2058_v55, %v2018_v36  ;;  %v935_v30 = vld [vmem:[#allocation2 + $0x190] sm:$0x3]  ;;  %v11500_v51 = vld [vmem:[#allocation35_spill] sm:$0xff] }
 0x19a   : > { %v2237_v23 = vsel %vm1082_vm5, %v2235_v7, %v2236_v1  ;;  %v8510_v9 = vadd.f32 %v7798_v34, %v782_v54  ;;  %v976_v5 = vmul.f32 %v7871_v13, %v8401_v14  ;;  %v8515_v44 = vmul.f32 %v7890_v24, %v935_v30 }
 0x19b   : > { %v2091_v62 = vadd.f32 %v2059_v3, %v2019_v49  ;;  %v8518_v48 = vmul.f32 %v7903_v26, %v935_v30  ;;  %v11499_v55 = vrot.slane %v11498_v58, 1  ;;  %v2485_v29 = vsel %vm1331_vm6, %v2483_v50, %v2484_v0 }
 0x19c   : > { %11497 = vst [vmem:[#allocation10_spill] sm:$0xff] %v8510_v9  ;;  %v2338_v12 = vadd.f32 %v2237_v23, %v2090_v6  ;;  %v11501_v34 = vrot.slane %v11500_v51, 2  ;;  %v851_v36 = vmax.f32 %v8510_v9, 0.0  ;;  %v8528_v49 = vld [vmem:[#allocation3 + $0x48] sm:$0xff]  ;;  %v8533_v59 = vmul.f32 %v7944_v20, %v935_v30 }
 0x19d   : > { %v2239_v3 = vsel %vm1082_vm5, %v2236_v1, %v11499_v55  ;;  %v977_v1 = vmul.f32 %v7871_v13, %v8403_v28  ;;  %v11502_v6 = vrot.slane %v8286_v17, 1  ;;  %v11503_v50 = vrot.slane %v8282_v31, 1 }
 0x19e   : > { %v2339_v35 = vadd.f32 %v2239_v3, %v2091_v62  ;;  %v2487_v40 = vsel %vm1331_vm6, %v2484_v0, %v11501_v34  ;;  %v8530_v7 = vld [vmem:[#allocation3 + $0x50] sm:$0xff]  ;;  %v2761_v54 = vld [vmem:[#allocation3 + $0x58] sm:$0x3]  ;;  %v11504_v0 = vrot.slane %v8242_v61, 1  ;;  %v2887_v3 = vrot.slane %v8528_v49, 1  ;;  %883 = vst.msk [vmem:[#allocation2 + $0x181] sm:$0xff] %vm305_vm2, %v851_v36 }
 0x19f   : > { %v1155_v62 = vsel %vm1082_vm5, %v11503_v50, %v11502_v6  ;;  %v11505_v23 = vmov %v11502_v6  ;;  %v8549_v55 = vpack.c.bf16 %v8530_v7, %v8528_v49  ;;  %v2888_v13 = vrot.slane %v8530_v7, 1 }
 0x1a0   : > { %v1157_v58 = vsel %vm1082_vm5, %v11505_v23, %v11504_v0  ;;  %v11507_v31 = vrot.slane %v8418_v63, 1  ;;  %v11508_v51 = vrot.slane %v8414_v10, 1  ;;  %v2890_v34 = vrot.slane %v2761_v54, 1 }
 0x1a1   : > { %11506 = vst [vmem:[#allocation19_spill] sm:$0xff] %v8549_v55  ;;  %v8562_v50 = vmul.f32 %v7952_v32, %v935_v30  ;;  %6204 = vmatmul.mubr.msk.bf16.gmra.mxu0 %vm305_vm2, %v8549_v55  ;;  %v2889_v0 = vsel %vm1082_vm5, %v2887_v3, %v2888_v13  ;;  %v2586_v36 = vadd.f32 %v2485_v29, %v2338_v12  ;;  %v11509_v18 = vrot.slane %v8390_v47, 1 }
 0x1a2   : > { %v1160_v61 = vsel %vm1082_vm5, %v11508_v51, %v11507_v31  ;;  %v2587_v23 = vadd.f32 %v2487_v40, %v2339_v35  ;;  %v11510_v10 = vmov %v11507_v31  ;;  %v2891_v31 = vsel %vm1082_vm5, %v2888_v13, %v2890_v34 }
 0x1a3   : > { %v1162_v54 = vsel %vm1082_vm5, %v11510_v10, %v11509_v18  ;;  %v1223_v51 = vadd.f32 %v1155_v62, %v8296_v16  ;;  %v1224_v30 = vadd.f32 %v1157_v58, %v8300_v46  ;;  %v1225_v6 = vadd.f32 %v1160_v61, %v976_v5 }
 0x1a4   : > { %v8575_v17 = vpack.c.bf16 %v2891_v31, %v2889_v0  ;;  %v2624_v11 = vmul.f32 %v7783_v52, %v2586_v36  ;;  %v2625_v29 = vmul.f32 %v7783_v52, %v2587_v23  ;;  %v1226_v12 = vadd.f32 %v1162_v54, %v977_v1 }
 0x1a5   : > { %v1280_v47 = vmul.f32 %v7836_v4, %v8401_v14  ;;  %v1281_v63 = vmul.f32 %v7836_v4, %v8403_v28  ;;  %v11512_v18 = vrot.slane %v8293_v45, 2  ;;  %v11513_v16 = vrot.slane %v8289_v2, 2  ;;  %v8597_v58 = vld [vmem:[#allocation2 + $0x180] sm:$0xff]  ;;  %v8599_v2 = vld [vmem:[#allocation2 + $0x188] sm:$0xff] }
 0x1a6   : > { %11511 = vst [vmem:[#allocation14_spill] sm:$0xff] %v8575_v17  ;;  %v11514_v5 = vrot.slane %v8245_v43, 2  ;;  %6168 = vmatmul.mubr.msk.bf16.gmra.mxu1 %vm305_vm2, %v8575_v17  ;;  %v2660_v52 = vadd.f32 %v7817_v8, %v2624_v11  ;;  %v2661_v1 = vadd.f32 %v7817_v8, %v2625_v29  ;;  %v1512_v43 = vmul.f32 %v8040_v37, %v8401_v14 }
 0x1a7   : > { %v1404_v46 = vsel %vm1331_vm6, %v11513_v16, %v11512_v18  ;;  %v11515_v35 = vmov %v11512_v18  ;;  %v1407_v3 = vrot.slane %v1280_v47, 2  ;;  %v1408_v13 = vrot.slane %v1281_v63, 2 }
 0x1a8   : > { %v1406_v40 = vsel %vm1331_vm6, %v11515_v35, %v11514_v5  ;;  %v1472_v4 = vadd.f32 %v1404_v46, %v1223_v51  ;;  %v1513_v45 = vmul.f32 %v8040_v37, %v8403_v28  ;;  %v2692_v34 = vmax.f32 %v2660_v52, 0.0 }
 0x1a9   : > { %v1473_v62 = vadd.f32 %v1406_v40, %v1224_v30  ;;  %v2693_v11 = vmax.f32 %v2661_v1, 0.0  ;;  %v1514_v8 = vmul.f32 %v8040_v37, %v8597_v58  ;;  %v1409_v0 = vsel %vm1331_vm6, %v1407_v3, %v1408_v13 }
 0x1aa   : > { %v1515_v36 = vmul.f32 %v8040_v37, %v8599_v2  ;;  %v1544_v23 = vadd.f32 %v1512_v43, %v1472_v4  ;;  %2724 = vst.msk [vmem:[#allocation3 + $0x61] sm:$0xff] %vm305_vm2, %v2692_v34  ;;  %v11516_v54 = vrot.slane %v8393_v38, 2  ;;  %v1474_v51 = vadd.f32 %v1409_v0, %v1225_v6 }
 0x1ab   : > { %v1545_v10 = vadd.f32 %v1513_v45, %v1473_v62  ;;  %2725 = vst.msk [vmem:[#allocation3 + $0x69] sm:$0xff] %vm305_vm2, %v2693_v11  ;;  %v1601_v30 = vmul.f32 %v7890_v24, %v8597_v58  ;;  %v1602_v29 = vmul.f32 %v7890_v24, %v8599_v2  ;;  %v11517_v37 = vrot.slane %v8457_v39, 1 }
 0x1ac   : > { %v1411_v31 = vsel %vm1331_vm6, %v1408_v13, %v11516_v54  ;;  %v1846_v18 = vmul.f32 %v7903_v26, %v8401_v14  ;;  %v1847_v38 = vmul.f32 %v7903_v26, %v8403_v28  ;;  %v1546_v6 = vadd.f32 %v1514_v8, %v1474_v51 }
 0x1ad   : > { %v1475_v47 = vadd.f32 %v1411_v31, %v1226_v12  ;;  %v1724_v63 = vsel %vm1082_vm5, %v11517_v37, %v1723_v22  ;;  %v11518_v16 = vrot.slane %v8396_v25, 1  ;;  %v1727_v12 = vrot.slane %v1601_v30, 1 }
 0x1ae   : > { %v1728_v46 = vrot.slane %v1602_v29, 1  ;;  %v1792_v5 = vadd.f32 %v1724_v63, %v1544_v23  ;;  %v1849_v39 = vmul.f32 %v7903_v26, %v8597_v58  ;;  %v1850_v14 = vmul.f32 %v7903_v26, %v8599_v2 }
 0x1af   : > { %v1726_v24 = vsel %vm1082_vm5, %v1723_v22, %v11518_v16  ;;  %v1970_v52 = vrot.slane %v1846_v18, 2  ;;  %v1971_v25 = vrot.slane %v1847_v38, 2  ;;  %v1547_v1 = vadd.f32 %v1515_v36, %v1475_v47 }
 0x1b0   : > { %v1793_v35 = vadd.f32 %v1726_v24, %v1545_v10  ;;  %v1729_v28 = vsel %vm1082_vm5, %v1727_v12, %v1728_v46  ;;  %v1975_v22 = vrot.slane %v1849_v39, 2  ;;  %v1976_v4 = vrot.slane %v1850_v14, 2  ;;  %v11527_v12 = vld [vmem:[#allocation22_spill] sm:$0xff] }
 0x1b1   : > { %v11519_v3 = vrot.slane %v8515_v44, 1  ;;  %v1972_v43 = vsel %vm1331_vm6, %v1970_v52, %v1971_v25  ;;  %v11520_v26 = vrot.slane %v8399_v15, 2  ;;  %v8649_v34 = vld [vmem:[#allocation3 + $0x60] sm:$0xff]  ;;  %v8653_v8 = vadd.f32 %v1729_v28, %v1546_v6  ;;  %v11531_v52 = vld [vmem:[#allocation16_spill] sm:$0xff] }
 0x1b2   : > { %v8651_v11 = vld [vmem:[#allocation3 + $0x68] sm:$0xff]  ;;  %v2040_v0 = vadd.f32 %v1972_v43, %v1792_v5  ;;  %v2080_v23 = vmul.f32 %v8221_v41, %v8597_v58  ;;  %v2892_v10 = vrot.slane %v8649_v34, 1  ;;  %v2081_v54 = vmul.f32 %v8221_v41, %v8599_v2  ;;  %v2764_v31 = vld [vmem:[#allocation3 + $0x70] sm:$0x3]  ;;  %v11529_v5 = vld [vmem:[#allocation21_spill] sm:$0xff] }
 0x1b3   : > { %v1731_v13 = vsel %vm1082_vm5, %v1728_v46, %v11519_v3  ;;  %v1974_v45 = vsel %vm1331_vm6, %v1971_v25, %v11520_v26  ;;  %11521 = vst [vmem:[#allocation15_spill] sm:$0xff] %v8653_v8  ;;  %v8659_v44 = vpack.c.bf16 %v8651_v11, %v8649_v34  ;;  %v2893_v15 = vrot.slane %v8651_v11, 1  ;;  %v11535_v43 = vld [vmem:[#allocation31_spill] sm:$0xff] }
 0x1b4   : > { %v2041_v36 = vadd.f32 %v1974_v45, %v1793_v35  ;;  %v8666_v30 = vadd.f32 %v1731_v13, %v1547_v1  ;;  %v8669_v29 = vsel %vm1331_vm6, %v1975_v22, %v1976_v4  ;;  %v11525_v47 = vrot.slane %v8518_v48, 2  ;;  %v11536_v45 = vld [vmem:[#allocation39_spill] sm:$0xff] }
 0x1b5   : > { %11522 = vst [vmem:[#allocation25_spill] sm:$0xff] %v8659_v44  ;;  %11524 = vst [vmem:[#allocation24_spill] sm:$0xff] %v8669_v29  ;;  %6207 = vmatprep.mubr.msk.bf16.mxu0 %vm305_vm2, %v8659_v44  ;;  %v8679_v18 = vadd.f32 %v2080_v23, %v2040_v0  ;;  %v8685_v6 = vmul.f32 %v7944_v20, %v8597_v58  ;;  %v8689_v16 = vmul.f32 %v7944_v20, %v8599_v2 }
 0x1b6   : > { %11523 = vst [vmem:[#allocation26_spill] sm:$0xff] %v8666_v30  ;;  %v8674_v37 = vsel %vm1331_vm6, %v1976_v4, %v11525_v47  ;;  %v8681_v38 = vadd.f32 %v2081_v54, %v2041_v36  ;;  %v2894_v48 = vsel %vm1082_vm5, %v2892_v10, %v2893_v15  ;;  %v2895_v24 = vrot.slane %v2764_v31, 1  ;;  %v11534_v4 = vld [vmem:[#allocation30_spill] sm:$0xff] }
 0x1b7   : > { %11526 = vst [vmem:[#allocation23_spill] sm:$0xff] %v8674_v37  ;;  %v11528_v46 = vrot.slane %v11527_v12, 2  ;;  %v11530_v35 = vrot.slane %v11529_v5, 2  ;;  %v8699_v14 = vmul.f32 %v7952_v32, %v8597_v58  ;;  %v8703_v28 = vmul.f32 %v7952_v32, %v8599_v2  ;;  %v11538_v58 = vld [vmem:[#allocation38_spill] sm:$0xff]  ;;  %v11540_v2 = vld [vmem:[#allocation28_spill] sm:$0xff]  ;;  %v11545_v5 = vld [vmem:[#allocation41_spill] sm:$0xff] }
 0x1b8   : > { %v11532_v25 = vrot.slane %v11531_v52, 2  ;;  %v2896_v13 = vsel %vm1082_vm5, %v2893_v15, %v2895_v24  ;;  %v11537_v0 = vrot.slane %v11536_v45, 1  ;;  %v11539_v36 = vrot.slane %v11538_v58, 1  ;;  %v11544_v12 = vld [vmem:[#allocation42_spill] sm:$0xff]  ;;  %v11547_v24 = vld [vmem:[#allocation40_spill] sm:$0xff]  ;;  %v11549_v52 = vld [vmem:[#allocation29_spill] sm:$0xff] }
 0x1b9   : > { %v1354_v39 = vsel %vm1331_vm6, %v11530_v35, %v11528_v46  ;;  %v11533_v1 = vmov %v11528_v46  ;;  %v11541_v10 = vrot.slane %v11540_v2, 1  ;;  %v8723_v47 = vpack.c.bf16 %v2896_v13, %v2894_v48  ;;  %v6568_v45 = vld [vmem:[#allocation2 + $0x90] sm:$0xff]  ;;  %v6569_v13 = vld [vmem:[#allocation2 + $0x98] sm:$0xff] }
 0x1ba   : > { %v1356_v22 = vsel %vm1331_vm6, %v11533_v1, %v11532_v25  ;;  %v1452_v3 = vadd.f32 %v1354_v39, %v11534_v4  ;;  %v1674_v23 = vsel %vm1082_vm5, %v11539_v36, %v11537_v0  ;;  %v11542_v54 = vmov %v11537_v0  ;;  %v11552_v4 = vld [vmem:[#allocation43_spill] sm:$0xff] }
 0x1bb   : > { %v1453_v26 = vadd.f32 %v1356_v22, %v11535_v43  ;;  %v1676_v31 = vsel %vm1082_vm5, %v11542_v54, %v11541_v10  ;;  %11543 = vst [vmem:[#allocation17_spill] sm:$0xff] %v8723_v47  ;;  %v11546_v15 = vrot.slane %v11545_v5, 2  ;;  %v11548_v35 = vrot.slane %v11547_v24, 2  ;;  %6171 = vmatprep.mubr.msk.bf16.mxu1 %vm305_vm2, %v8723_v47 }
 0x1bc   : > { %v1524_v46 = vadd.f32 %v11544_v12, %v1452_v3  ;;  %v11550_v25 = vrot.slane %v11549_v52, 2  ;;  %v2060_v48 = vmul.f32 %v6568_v45, %v8221_v41  ;;  %v2061_v3 = vmul.f32 %v6569_v13, %v8221_v41  ;;  %v11553_v12 = vld [vmem:[#allocation37_spill] sm:$0xff]  ;;  %v11557_v52 = vld [vmem:[#allocation27_spill] sm:$0xff] }
 0x1bd   : > { %v1922_v39 = vsel %vm1331_vm6, %v11548_v35, %v11546_v15  ;;  %v11551_v1 = vmov %v11546_v15  ;;  %v1525_v43 = vadd.f32 %v11552_v4, %v1453_v26  ;;  %v2136_v0 = vmul.f32 %v6568_v45, %v7944_v20  ;;  %v11555_v15 = vld [vmem:[#allocation36_spill] sm:$0xff] }
 0x1be   : > { %v1924_v22 = vsel %vm1331_vm6, %v11551_v1, %v11550_v25  ;;  %v1772_v58 = vadd.f32 %v1674_v23, %v1524_v46  ;;  %v2137_v36 = vmul.f32 %v6569_v13, %v7944_v20  ;;  %v2384_v2 = vmul.f32 %v6568_v45, %v7952_v32 }
 0x1bf   : > { %v2385_v10 = vmul.f32 %v6569_v13, %v7952_v32  ;;  %v1773_v54 = vadd.f32 %v1676_v31, %v1525_v43  ;;  %v2240_v26 = vrot.slane %v2136_v0, 1  ;;  %v11554_v5 = vrot.slane %v11553_v12, 2  ;;  %v11560_v32 = vld [vmem:[#allocation47_spill] sm:$0xff]  ;;  %v11561_v43 = vld [vmem:[#allocation48_spill] sm:$0xff]  ;;  %v11562_v0 = vld [vmem:[#allocation54_spill] sm:$0xff] }
 0x1c0   : > { %v11556_v24 = vrot.slane %v11555_v15, 2  ;;  %v11558_v25 = vrot.slane %v11557_v52, 2  ;;  %v2020_v46 = vadd.f32 %v1922_v39, %v1772_v58  ;;  %v2241_v20 = vrot.slane %v2137_v36, 1  ;;  %v11564_v15 = vld [vmem:[#allocation53_spill] sm:$0xff]  ;;  %v11568_v36 = vld [vmem:[#allocation50_spill] sm:$0xff] }
 0x1c1   : > { %v11559_v1 = vmov %v11554_v5  ;;  %v2488_v4 = vrot.slane %v2384_v2, 2  ;;  %v2489_v45 = vrot.slane %v2385_v10, 2  ;;  %v2021_v51 = vadd.f32 %v1924_v22, %v1773_v54  ;;  %v11566_v52 = vld [vmem:[#allocation49_spill] sm:$0xff]  ;;  %v11570_v54 = vld [vmem:[#allocation55_spill] sm:$0xff] }
 0x1c2   : > { %v1359_v35 = vsel %vm1331_vm6, %v11556_v24, %v11554_v5  ;;  %v1361_v23 = vsel %vm1331_vm6, %v11559_v1, %v11558_v25  ;;  %v11563_v63 = vrot.slane %v11562_v0, 1  ;;  %v11565_v61 = vrot.slane %v11564_v15, 1  ;;  %v11571_v1 = vld [vmem:[#allocation56_spill] sm:$0xff] }
 0x1c3   : > { %v1454_v31 = vadd.f32 %v1359_v35, %v11560_v32  ;;  %v1455_v13 = vadd.f32 %v1361_v23, %v11561_v43  ;;  %v2092_v24 = vadd.f32 %v2060_v48, %v2020_v46  ;;  %v2242_v12 = vsel %vm1082_vm5, %v2240_v26, %v2241_v20  ;;  %v11575_v46 = vld [vmem:[#allocation57_spill] sm:$0xff]  ;;  %v11576_v43 = vld [vmem:[#allocation58_spill] sm:$0xff] }
 0x1c4   : > { %v1679_v5 = vsel %vm1082_vm5, %v11565_v61, %v11563_v63  ;;  %v11567_v25 = vrot.slane %v11566_v52, 1  ;;  %v2490_v58 = vsel %vm1331_vm6, %v2488_v4, %v2489_v45  ;;  %v2093_v22 = vadd.f32 %v2061_v3, %v2021_v51  ;;  %v11572_v61 = vld [vmem:[#allocation45_spill] sm:$0xff]  ;;  %v6570_v52 = vld [vmem:[#allocation2 + $0xa8] sm:$0xff] }
 0x1c5   : > { %v11569_v2 = vrot.slane %v11568_v36, 2  ;;  %v1526_v35 = vadd.f32 %v11570_v54, %v1454_v31  ;;  %v1527_v23 = vadd.f32 %v11571_v1, %v1455_v13  ;;  %v2340_v32 = vadd.f32 %v2242_v12, %v2092_v24  ;;  %v11577_v24 = vld [vmem:[#allocation46_spill] sm:$0xff] }
 0x1c6   : > { %v2244_v39 = vsel %vm1082_vm5, %v2241_v20, %v11567_v25  ;;  %v11573_v63 = vrot.slane %v11572_v61, 1  ;;  %v11574_v48 = vrot.slane %v11562_v0, 1  ;;  %v1925_v20 = vrot.slane %v11575_v46, 2  ;;  %v6571_v0 = vld [vmem:[#allocation2 + $0xb0] sm:$0xff]  ;;  %v6532_v46 = vld [vmem:[%s11046_s3 + $0x38] sm:$0xff]  }
 0x1c7   : > { %v2492_v10 = vsel %vm1331_vm6, %v2489_v45, %v11569_v2  ;;  %v1926_v4 = vrot.slane %v11576_v43, 2  ;;  %v2341_v51 = vadd.f32 %v2244_v39, %v2093_v22  ;;  %v1774_v3 = vadd.f32 %v1679_v5, %v1526_v35  ;;  %v8788_v5 = vld [vmem:[%s11045_s2 + $0x7] ss:$0 sm:$0xff]  ;;  %6267 = vmatprep.subr.bf16.mxu0 %v6532_v46 }
 0x1c8   : > { %v1681_v26 = vsel %vm1082_vm5, %v11574_v48, %v11573_v63  ;;  %v2062_v45 = vmul.f32 %v6570_v52, %v8221_v41  ;;  %v2588_v31 = vadd.f32 %v2490_v58, %v2340_v32  ;;  %v11578_v12 = vrot.slane %v11577_v24, 2  ;;  %v8794_v58 = vld [vmem:[%s11050_s7] ss:$0 sm:$0xff]  ;;  %6268 = vmatpush3.bf16.msra.mxu0 %v6532_v46  ;;  %v11594_v46 = vld [vmem:[#allocation60_spill] sm:$0xff] }
 0x1c9   : > { %v1775_v15 = vadd.f32 %v1681_v26, %v1527_v23  ;;  %v1927_v13 = vsel %vm1331_vm6, %v1925_v20, %v1926_v4  ;;  %v2063_v36 = vmul.f32 %v6571_v0, %v8221_v41  ;;  %v2589_v2 = vadd.f32 %v2492_v10, %v2341_v51  ;;  %v8801_v10 = vld [vmem:[%s11045_s2 + $0x8] ss:$0 sm:$0xff]  ;;  %v8812_v20 = vld [vmem:[%s11050_s7 + $0x1] ss:$0 sm:$0xff] }
 0x1ca   : > { %v1929_v25 = vsel %vm1331_vm6, %v1926_v4, %v11578_v12  ;;  %v2022_v54 = vadd.f32 %v1927_v13, %v1774_v3  ;;  %v2139_v39 = vmul.f32 %v8788_v5, %v6570_v52  ;;  %v2626_v22 = vmul.f32 %v8794_v58, %v2588_v31  ;;  %v11581_v13 = vld [vmem:[#allocation51_spill] sm:$0xff] }
 0x1cb   : > { %v2023_v1 = vadd.f32 %v1929_v25, %v1775_v15  ;;  %v2140_v35 = vmul.f32 %v8788_v5, %v6571_v0  ;;  %v2387_v23 = vmul.f32 %v8801_v10, %v6570_v52  ;;  %v2388_v32 = vmul.f32 %v8801_v10, %v6571_v0  ;;  %v11583_v25 = vld [vmem:[#allocation44_spill] sm:$0xff]  ;;  %v11633_v15 = vld [vmem:[#allocation77_spill] sm:$0xff] }
 0x1cc   : > { %v2627_v61 = vmul.f32 %v8794_v58, %v2589_v2  ;;  %v2094_v63 = vadd.f32 %v2062_v45, %v2022_v54  ;;  %v2245_v26 = vrot.slane %v2139_v39, 1  ;;  %v2662_v43 = vadd.f32 %v8812_v20, %v2626_v22  ;;  %v11579_v45 = vld [vmem:[#allocation52_spill] sm:$0xff] }
 0x1cd   : > { %v2095_v48 = vadd.f32 %v2063_v36, %v2023_v1  ;;  %v2246_v4 = vrot.slane %v2140_v35, 1  ;;  %v2493_v51 = vrot.slane %v2387_v23, 2  ;;  %v2494_v3 = vrot.slane %v2388_v32, 2  ;;  %v11586_v39 = vld [vmem:[#allocation64_spill] sm:$0xff] }
 0x1ce   : > { %v2663_v52 = vadd.f32 %v8812_v20, %v2627_v61  ;;  %v11580_v31 = vrot.slane %v11579_v45, 2  ;;  %v11582_v24 = vrot.slane %v11581_v13, 2  ;;  %v11584_v0 = vrot.slane %v11583_v25, 2  ;;  %v6533_v45 = vld [vmem:[%s11046_s3 + $0x30] sm:$0xff]  }
 0x1cf   : > { %v2694_v54 = vmax.f32 %v2662_v43, 0.0  ;;  %v2247_v1 = vsel %vm1082_vm5, %v2245_v26, %v2246_v4  ;;  %v11587_v22 = vrot.slane %v11586_v39, 1  ;;  %v11588_v23 = vrot.slane %v7646_v53, 1  ;;  %6269 = vmatprep.subr.bf16.mxu0 %v6533_v45  ;;  %v11603_v53 = vld [vmem:[#allocation68_spill] sm:$0xff] }
 0x1d0   : > { %v1364_v12 = vsel %vm1331_vm6, %v11582_v24, %v11580_v31  ;;  %v11585_v36 = vmov %v11580_v31  ;;  %v11589_v32 = vrot.slane %v7643_v21, 1  ;;  %v2695_v31 = vmax.f32 %v2663_v52, 0.0  ;;  %v11590_v24 = vld [vmem:[#allocation65_spill] sm:$0xff]  ;;  %6270 = vmatpush3.bf16.msra.mxu0 %v6533_v45 }
 0x1d1   : > { %v1366_v2 = vsel %vm1331_vm6, %v11585_v36, %v11584_v0  ;;  %v2249_v35 = vsel %vm1082_vm5, %v2246_v4, %v11587_v22  ;;  %v2342_v13 = vadd.f32 %v2247_v1, %v2094_v63  ;;  %v2495_v26 = vsel %vm1331_vm6, %v2493_v51, %v2494_v3  ;;  %2726 = vst.msk [vmem:[#allocation3 + $0x79] sm:$0xff] %vm305_vm2, %v2694_v54  ;;  %v11592_v0 = vld [vmem:[#allocation62_spill] sm:$0xff]  ;;  %v11593_v36 = vld [vmem:[#allocation63_spill] sm:$0xff] }
 0x1d2   : > { %v1684_v61 = vsel %vm1082_vm5, %v11589_v32, %v11588_v23  ;;  %v2343_v43 = vadd.f32 %v2249_v35, %v2095_v48  ;;  %v11591_v4 = vrot.slane %v11590_v24, 2  ;;  %v1456_v21 = vadd.f32 %v1364_v12, %v11592_v0  ;;  %2727 = vst.msk [vmem:[#allocation3 + $0x81] sm:$0xff] %vm305_vm2, %v2695_v31  ;;  %v11596_v51 = vld [vmem:[#allocation71_spill] sm:$0xff]  ;;  %v11598_v1 = vld [vmem:[#allocation70_spill] sm:$0xff]  ;;  %v11600_v12 = vld [vmem:[#allocation61_spill] sm:$0xff] }
 0x1d3   : > { %v1457_v39 = vadd.f32 %v1366_v2, %v11593_v36  ;;  %v11595_v22 = vrot.slane %v11594_v46, 1  ;;  %v2590_v63 = vadd.f32 %v2495_v26, %v2342_v13  ;;  %v11597_v54 = vrot.slane %v11596_v51, 2  ;;  %v11604_v0 = vld [vmem:[#allocation69_spill] sm:$0xff]  ;;  %v6576_v46 = vld [vmem:[#allocation2 + $0xc0] sm:$0xff] }
 0x1d4   : > { %v2497_v25 = vsel %vm1331_vm6, %v2494_v3, %v11591_v4  ;;  %v11599_v35 = vrot.slane %v11598_v1, 2  ;;  %v11601_v32 = vrot.slane %v11600_v12, 2  ;;  %v1528_v4 = vadd.f32 %v11603_v53, %v1456_v21  ;;  %v6534_v21 = vld [vmem:[%s11046_s3 + $0x48] sm:$0xff]  }
 0x1d5   : > { %v1686_v52 = vsel %vm1082_vm5, %v11588_v23, %v11595_v22  ;;  %v2591_v48 = vadd.f32 %v2497_v25, %v2343_v43  ;;  %v11602_v2 = vmov %v11597_v54  ;;  %v1529_v36 = vadd.f32 %v11604_v0, %v1457_v39  ;;  %v6577_v25 = vld [vmem:[#allocation2 + $0xc8] sm:$0xff]  ;;  %6303 = vmatprep.subr.bf16.mxu1 %v6534_v21 }
 0x1d6   : > { %v1932_v3 = vsel %vm1331_vm6, %v11599_v35, %v11597_v54  ;;  %v1934_v24 = vsel %vm1331_vm6, %v11602_v2, %v11601_v32  ;;  %v2064_v31 = vmul.f32 %v6576_v46, %v8221_v41  ;;  %v2142_v13 = vmul.f32 %v6576_v46, %v8788_v5 }
 0x1d7   : > { %v2628_v43 = vmul.f32 %v8794_v58, %v2590_v63  ;;  %v2629_v26 = vmul.f32 %v8794_v58, %v2591_v48  ;;  %v2143_v22 = vmul.f32 %v6577_v25, %v8788_v5  ;;  %v2390_v23 = vmul.f32 %v6576_v46, %v8801_v10 }
 0x1d8   : > { %v1776_v39 = vadd.f32 %v1684_v61, %v1528_v4  ;;  %v1777_v51 = vadd.f32 %v1686_v52, %v1529_v36  ;;  %v2250_v54 = vrot.slane %v2142_v13, 1  ;;  %v2391_v1 = vmul.f32 %v6577_v25, %v8801_v10  ;;  %v8878_v46 = vld [vmem:[#allocation3 + $0x78] sm:$0xff]  ;;  %v11605_v4 = vld [vmem:[#allocation67_spill] sm:$0xff]  ;;  %v11607_v13 = vld [vmem:[#allocation66_spill] sm:$0xff] }
 0x1d9   : > { %v2664_v45 = vadd.f32 %v8812_v20, %v2628_v43  ;;  %v2665_v63 = vadd.f32 %v8812_v20, %v2629_v26  ;;  %v2065_v48 = vmul.f32 %v6577_v25, %v8221_v41  ;;  %v2251_v35 = vrot.slane %v2143_v22, 1  ;;  %v8885_v40 = vld [vmem:[#allocation3 + $0x80] sm:$0xff] }
 0x1da   : > { %v2024_v12 = vadd.f32 %v1932_v3, %v1776_v39  ;;  %v2025_v32 = vadd.f32 %v1934_v24, %v1777_v51  ;;  %v2498_v2 = vrot.slane %v2390_v23, 2  ;;  %v2499_v53 = vrot.slane %v2391_v1, 2  ;;  %v8888_v3 = vld [vmem:[#allocation3 + $0x88] sm:$0x3] }
 0x1db   : > { %v2696_v61 = vmax.f32 %v2664_v45, 0.0  ;;  %v2697_v52 = vmax.f32 %v2665_v63, 0.0  ;;  %v11606_v36 = vrot.slane %v11605_v4, 2  ;;  %v11608_v43 = vrot.slane %v11607_v13, 2  ;;  %v11615_v13 = vld [vmem:[#allocation73_spill] sm:$0xff] }
 0x1dc   : > { %v2897_v25 = vrot.slane %v8878_v46, 1  ;;  %v2096_v24 = vadd.f32 %v2064_v31, %v2024_v12  ;;  %v2097_v22 = vadd.f32 %v2065_v48, %v2025_v32  ;;  %v2252_v23 = vsel %vm1082_vm5, %v2250_v54, %v2251_v35 }
 0x1dd   : > { %v1369_v26 = vsel %vm1331_vm6, %v11608_v43, %v11606_v36  ;;  %v8893_v21 = vpack.c.bf16 %v8885_v40, %v8878_v46  ;;  %v2898_v39 = vrot.slane %v8885_v40, 1  ;;  %v2900_v51 = vrot.slane %v8888_v3, 1  ;;  %2728 = vst.msk [vmem:[#allocation3 + $0x91] sm:$0xff] %vm305_vm2, %v2696_v61  ;;  %2729 = vst.msk [vmem:[#allocation3 + $0x99] sm:$0xff] %vm305_vm2, %v2697_v52  ;;  %v11612_v52 = vld [vmem:[#allocation59_spill] sm:$0xff] }
 0x1de   : > { %v11610_v1 = vrot.slane %v7685_v57, 1  ;;  %v2344_v31 = vadd.f32 %v2252_v23, %v2096_v24  ;;  %v2500_v54 = vsel %vm1331_vm6, %v2498_v2, %v2499_v53  ;;  %v11611_v48 = vrot.slane %v7688_v27, 2 }
 0x1df   : > { %11609 = vst [vmem:[#allocation32_spill] sm:$0xff] %v8893_v21  ;;  %6208 = vmatmul.mubr.msk.bf16.gmra.mxu0 %vm305_vm2, %v8893_v21  ;;  %v2899_v32 = vsel %vm1082_vm5, %v2897_v25, %v2898_v39  ;;  %v2901_v61 = vsel %vm1082_vm5, %v2898_v39, %v2900_v51  ;;  %v11613_v36 = vrot.slane %v11612_v52, 2  ;;  %v11614_v57 = vrot.slane %v11605_v4, 2  ;;  %v11619_v51 = vld [vmem:[#allocation80_spill] sm:$0xff] }
 0x1e0   : > { %v2254_v45 = vsel %vm1082_vm5, %v2251_v35, %v11610_v1  ;;  %v2502_v12 = vsel %vm1331_vm6, %v2499_v53, %v11611_v48  ;;  %v1458_v43 = vadd.f32 %v1369_v26, %v11615_v13  ;;  %v8916_v2 = vpack.c.bf16 %v2901_v61, %v2899_v32  ;;  %v11617_v53 = vld [vmem:[#allocation74_spill] sm:$0xff]  ;;  %v11624_v61 = vld [vmem:[#allocation75_spill] sm:$0xff] }
 0x1e1   : > { %v2345_v63 = vadd.f32 %v2254_v45, %v2097_v22  ;;  %v1371_v35 = vsel %vm1331_vm6, %v11614_v57, %v11613_v36  ;;  %v2592_v27 = vadd.f32 %v2500_v54, %v2344_v31  ;;  %v11618_v39 = vrot.slane %v7719_v56, 1  ;;  %v11621_v45 = vld [vmem:[#allocation81_spill] sm:$0xff]  ;;  %v6578_v13 = vld [vmem:[#allocation2 + $0xd8] sm:$0xff] }
 0x1e2   : > { %11616 = vst [vmem:[#allocation33_spill] sm:$0xff] %v8916_v2  ;;  %v1459_v22 = vadd.f32 %v1371_v35, %v11617_v53  ;;  %v1530_v25 = vadd.f32 %v7708_v60, %v1458_v43  ;;  %v11620_v1 = vrot.slane %v11619_v51, 1  ;;  %v1935_v48 = vrot.slane %v11621_v45, 2  ;;  %6172 = vmatmul.mubr.msk.bf16.gmra.mxu1 %vm305_vm2, %v8916_v2  ;;  %v6579_v45 = vld [vmem:[#allocation2 + $0xe0] sm:$0xff] }
 0x1e3   : > { %v2593_v24 = vadd.f32 %v2502_v12, %v2345_v63  ;;  %v2630_v26 = vmul.f32 %v8794_v58, %v2592_v27  ;;  %v11622_v63 = vld [vmem:[#allocation79_spill] sm:$0xff]  ;;  %v11623_v12 = vld [vmem:[#allocation82_spill] sm:$0xff]  ;;  %v11625_v52 = vrot.slane %v11624_v61, 1  ;;  %v11626_v36 = vmov %v11618_v39 }
 0x1e4   : > { %v1689_v4 = vsel %vm1082_vm5, %v11620_v1, %v11618_v39  ;;  %v1531_v54 = vadd.f32 %v11622_v63, %v1459_v22  ;;  %v1936_v32 = vrot.slane %v11623_v12, 2  ;;  %v2066_v43 = vmul.f32 %v6578_v13, %v8221_v41  ;;  %v8940_v53 = vld [vmem:[#allocation3 + $0x90] sm:$0xff]  ;;  %v8942_v27 = vld [vmem:[#allocation3 + $0x98] sm:$0xff] }
 0x1e5   : > { %v2631_v31 = vmul.f32 %v8794_v58, %v2593_v24  ;;  %v1691_v57 = vsel %vm1082_vm5, %v11626_v36, %v11625_v52  ;;  %v1778_v35 = vadd.f32 %v1689_v4, %v1530_v25  ;;  %v8944_v24 = vld [vmem:[#allocation3 + $0xa0] sm:$0x3]  ;;  %v2666_v22 = vadd.f32 %v8812_v20, %v2630_v26  ;;  %v11628_v52 = vld [vmem:[#allocation76_spill] sm:$0xff] }
 0x1e6   : > { %v1779_v51 = vadd.f32 %v1691_v57, %v1531_v54  ;;  %v2145_v1 = vmul.f32 %v6578_v13, %v8788_v5  ;;  %v8951_v56 = vpack.c.bf16 %v8942_v27, %v8940_v53  ;;  %v2902_v25 = vrot.slane %v8940_v53, 1 }
 0x1e7   : > { %v2667_v39 = vadd.f32 %v8812_v20, %v2631_v31  ;;  %v2903_v4 = vrot.slane %v8942_v27, 1  ;;  %v2067_v63 = vmul.f32 %v6579_v45, %v8221_v41  ;;  %v2905_v12 = vrot.slane %v8944_v24, 1 }
 0x1e8   : > { %11627 = vst [vmem:[#allocation18_spill] sm:$0xff] %v8951_v56  ;;  %v2698_v61 = vmax.f32 %v2666_v22, 0.0  ;;  %v1937_v31 = vsel %vm1331_vm6, %v1935_v48, %v1936_v32  ;;  %6211 = vmatprep.mubr.msk.bf16.mxu0 %vm305_vm2, %v8951_v56  ;;  %v11629_v36 = vrot.slane %v11628_v52, 2  ;;  %v2146_v23 = vmul.f32 %v6579_v45, %v8788_v5 }
 0x1e9   : > { %v2699_v26 = vmax.f32 %v2667_v39, 0.0  ;;  %v2904_v54 = vsel %vm1082_vm5, %v2902_v25, %v2903_v4  ;;  %v2026_v62 = vadd.f32 %v1937_v31, %v1778_v35  ;;  %v2906_v41 = vsel %vm1082_vm5, %v2903_v4, %v2905_v12  ;;  %v11631_v31 = vld [vmem:[#allocation78_spill] sm:$0xff] }
 0x1ea   : > { %v1939_v57 = vsel %vm1331_vm6, %v1936_v32, %v11629_v36  ;;  %2730 = vst.msk [vmem:[#allocation3 + $0xa9] sm:$0xff] %vm305_vm2, %v2698_v61  ;;  %v2255_v48 = vrot.slane %v2145_v1, 1  ;;  %v2393_v39 = vmul.f32 %v6578_v13, %v8801_v10  ;;  %v8969_v60 = vpack.c.bf16 %v2906_v41, %v2904_v54  ;;  %v11635_v61 = vld [vmem:[#allocation72_spill] sm:$0xff] }
 0x1eb   : > { %2731 = vst.msk [vmem:[#allocation3 + $0xb1] sm:$0xff] %vm305_vm2, %v2699_v26  ;;  %v2027_v22 = vadd.f32 %v1939_v57, %v1779_v51  ;;  %v2098_v25 = vadd.f32 %v2066_v43, %v2026_v62  ;;  %v2256_v42 = vrot.slane %v2146_v23, 1  ;;  %v2394_v52 = vmul.f32 %v6579_v45, %v8801_v10  ;;  %v11638_v23 = vld [vmem:[#allocation95_spill] sm:$0xff] }
 0x1ec   : > { %11630 = vst [vmem:[#allocation34_spill] sm:$0xff] %v8969_v60  ;;  %v2503_v35 = vrot.slane %v2393_v39, 2  ;;  %v11632_v36 = vrot.slane %v11631_v31, 2  ;;  %v11634_v4 = vrot.slane %v11633_v15, 2  ;;  %v11636_v26 = vrot.slane %v11635_v61, 2  ;;  %6175 = vmatprep.mubr.msk.bf16.mxu1 %vm305_vm2, %v8969_v60 }
 0x1ed   : > { %v2099_v32 = vadd.f32 %v2067_v63, %v2027_v22  ;;  %v2257_v62 = vsel %vm1082_vm5, %v2255_v48, %v2256_v42  ;;  %v11639_v43 = vrot.slane %v11638_v23, 1  ;;  %v2504_v45 = vrot.slane %v2394_v52, 2  ;;  %v11640_v63 = vld [vmem:[#allocation85_spill] sm:$0xff]  ;;  %v11641_v22 = vld [vmem:[#allocation91_spill] sm:$0xff]  ;;  %v11645_v23 = vld [vmem:[#allocation104_spill] sm:$0xff] }
 0x1ee   : > { %v1374_v12 = vsel %vm1331_vm6, %v11634_v4, %v11632_v36  ;;  %v11637_v51 = vmov %v11632_v36  ;;  %v2346_v57 = vadd.f32 %v2257_v62, %v2098_v25  ;;  %v11642_v4 = vld [vmem:[#allocation96_spill] sm:$0xff]  ;;  %v11648_v25 = vld [vmem:[#allocation99_spill] sm:$0xff] }
 0x1ef   : > { %v1376_v13 = vsel %vm1331_vm6, %v11637_v51, %v11636_v26  ;;  %v2259_v1 = vsel %vm1082_vm5, %v2256_v42, %v11639_v43  ;;  %v1460_v15 = vadd.f32 %v1374_v12, %v11640_v63  ;;  %v2505_v36 = vsel %vm1331_vm6, %v2503_v35, %v2504_v45  ;;  %v11644_v26 = vld [vmem:[#allocation103_spill] sm:$0xff]  ;;  %v11646_v43 = vld [vmem:[#allocation100_spill] sm:$0xff] }
 0x1f0   : > { %v2347_v41 = vadd.f32 %v2259_v1, %v2099_v32  ;;  %v1461_v39 = vadd.f32 %v1376_v13, %v11641_v22  ;;  %v11643_v61 = vrot.slane %v11642_v4, 2  ;;  %v2594_v42 = vadd.f32 %v2505_v36, %v2346_v57  ;;  %v11650_v22 = vld [vmem:[#allocation93_spill] sm:$0xff] }
 0x1f1   : > { %v1532_v51 = vadd.f32 %v11644_v26, %v1460_v15  ;;  %v11647_v63 = vrot.slane %v11646_v43, 1  ;;  %v11649_v32 = vrot.slane %v11648_v25, 1  ;;  %v9003_v62 = vld [vmem:[#allocation3 + $0xa8] sm:$0xff]  ;;  %v11655_v4 = vld [vmem:[#allocation101_spill] sm:$0xff] }
 0x1f2   : > { %v2507_v48 = vsel %vm1331_vm6, %v2504_v45, %v11643_v61  ;;  %v1533_v12 = vadd.f32 %v11645_v23, %v1461_v39  ;;  %v9005_v1 = vld [vmem:[#allocation3 + $0xb0] sm:$0xff]  ;;  %v9007_v35 = vld [vmem:[#allocation3 + $0xb8] sm:$0x3]  ;;  %v11651_v45 = vrot.slane %v11650_v22, 1  ;;  %v11653_v39 = vld [vmem:[#allocation102_spill] sm:$0xff]  ;;  %v11656_v61 = vrot.slane %v11655_v4, 2 }
 0x1f3   : > { %v2595_v52 = vadd.f32 %v2507_v48, %v2347_v41  ;;  %v1694_v13 = vsel %vm1082_vm5, %v11649_v32, %v11647_v63  ;;  %v11652_v15 = vmov %v11647_v63  ;;  %v11654_v36 = vrot.slane %v11653_v39, 2  ;;  %v11657_v26 = vld [vmem:[#allocation94_spill] sm:$0xff]  ;;  %v6581_v22 = vld [vmem:[#allocation2 + $0xf0] sm:$0xff] }
 0x1f4   : > { %v1696_v57 = vsel %vm1082_vm5, %v11652_v15, %v11651_v45  ;;  %v1780_v41 = vadd.f32 %v1694_v13, %v1532_v51  ;;  %v11658_v23 = vrot.slane %v11657_v26, 2  ;;  %v9026_v32 = vpack.c.bf16 %v9005_v1, %v9003_v62  ;;  %v9033_v13 = vld [vmem:[%s11045_s2 + $0x6] ss:$0 sm:$0xff]  ;;  %v6582_v4 = vld [vmem:[#allocation2 + $0xf8] sm:$0xff] }
 0x1f5   : > { %v1942_v48 = vsel %vm1331_vm6, %v11656_v61, %v11654_v36  ;;  %v11659_v63 = vmov %v11654_v36  ;;  %v2907_v43 = vrot.slane %v9003_v62, 1  ;;  %v2908_v51 = vrot.slane %v9005_v1, 1 }
 0x1f6   : > { %v1944_v25 = vsel %vm1331_vm6, %v11659_v63, %v11658_v23  ;;  %11660 = vst [vmem:[#allocation35_spill] sm:$0xff] %v9026_v32  ;;  %v2068_v45 = vmul.f32 %v6581_v22, %v9033_v13  ;;  %v2910_v15 = vrot.slane %v9007_v35, 1  ;;  %v2632_v39 = vmul.f32 %v8794_v58, %v2594_v42  ;;  %6212 = vmatmul.mubr.msk.bf16.gmra.mxu0 %vm305_vm2, %v9026_v32 }
 0x1f7   : > { %v2633_v36 = vmul.f32 %v8794_v58, %v2595_v52  ;;  %v2069_v61 = vmul.f32 %v6582_v4, %v9033_v13  ;;  %v2909_v26 = vsel %vm1082_vm5, %v2907_v43, %v2908_v51  ;;  %v1781_v23 = vadd.f32 %v1696_v57, %v1533_v12 }
 0x1f8   : > { %v2028_v63 = vadd.f32 %v1942_v48, %v1780_v41  ;;  %v2148_v54 = vmul.f32 %v6581_v22, %v8788_v5  ;;  %v2911_v31 = vsel %vm1082_vm5, %v2908_v51, %v2910_v15  ;;  %v2668_v0 = vadd.f32 %v8812_v20, %v2632_v39  ;;  %v11662_v48 = vld [vmem:[#allocation98_spill] sm:$0xff]  ;;  %v11664_v15 = vld [vmem:[#allocation97_spill] sm:$0xff] }
 0x1f9   : > { %v2669_v42 = vadd.f32 %v8812_v20, %v2633_v36  ;;  %v2149_v52 = vmul.f32 %v6582_v4, %v8788_v5  ;;  %v9048_v9 = vpack.c.bf16 %v2911_v31, %v2909_v26  ;;  %v2029_v60 = vadd.f32 %v1944_v25, %v1781_v23  ;;  %v11666_v25 = vld [vmem:[#allocation92_spill] sm:$0xff] }
 0x1fa   : > { %v2100_v2 = vadd.f32 %v2068_v45, %v2028_v63  ;;  %v2260_v47 = vrot.slane %v2148_v54, 1  ;;  %v2700_v17 = vmax.f32 %v2668_v0, 0.0  ;;  %v2396_v12 = vmul.f32 %v6581_v22, %v8801_v10  ;;  %v11669_v22 = vld [vmem:[#allocation110_spill] sm:$0xff]  ;;  %v11671_v26 = vld [vmem:[#allocation108_spill] sm:$0xff] }
 0x1fb   : > { %11661 = vst [vmem:[#allocation22_spill] sm:$0xff] %v9048_v9  ;;  %v2701_v32 = vmax.f32 %v2669_v42, 0.0  ;;  %v2261_v43 = vrot.slane %v2149_v52, 1  ;;  %6176 = vmatmul.mubr.msk.bf16.gmra.mxu1 %vm305_vm2, %v9048_v9  ;;  %v2101_v57 = vadd.f32 %v2069_v61, %v2029_v60  ;;  %v2397_v41 = vmul.f32 %v6582_v4, %v8801_v10 }
 0x1fc   : > { %v11663_v51 = vrot.slane %v11662_v48, 2  ;;  %v11665_v39 = vrot.slane %v11664_v15, 2  ;;  %v11667_v45 = vrot.slane %v11666_v25, 2  ;;  %2732 = vst.msk [vmem:[#allocation3 + $0xc1] sm:$0xff] %vm305_vm2, %v2700_v17  ;;  %v11670_v36 = vrot.slane %v11669_v22, 1  ;;  %v11674_v25 = vld [vmem:[#allocation115_spill] sm:$0xff] }
 0x1fd   : > { %2733 = vst.msk [vmem:[#allocation3 + $0xc9] sm:$0xff] %vm305_vm2, %v2701_v32  ;;  %v2262_v60 = vsel %vm1082_vm5, %v2260_v47, %v2261_v43  ;;  %v2508_v61 = vrot.slane %v2396_v12, 2  ;;  %v2509_v52 = vrot.slane %v2397_v41, 2  ;;  %v11675_v32 = vrot.slane %v11674_v25, 1  ;;  %v11678_v22 = vld [vmem:[#allocation118_spill] sm:$0xff]  ;;  %v11681_v41 = vld [vmem:[#allocation117_spill] sm:$0xff] }
 0x1fe   : > { %v1379_v31 = vsel %vm1331_vm6, %v11665_v39, %v11663_v51  ;;  %v11668_v0 = vmov %v11663_v51  ;;  %v2264_v4 = vsel %vm1082_vm5, %v2261_v43, %v11670_v36  ;;  %v2348_v63 = vadd.f32 %v2262_v60, %v2100_v2  ;;  %v11672_v51 = vld [vmem:[#allocation109_spill] sm:$0xff]  ;;  %v11673_v39 = vld [vmem:[#allocation116_spill] sm:$0xff]  ;;  %v11682_v60 = vld [vmem:[#allocation119_spill] sm:$0xff] }
 0x1ff   : > { %v1381_v54 = vsel %vm1331_vm6, %v11668_v0, %v11667_v45  ;;  %v1462_v23 = vadd.f32 %v1379_v31, %v11671_v26  ;;  %v2349_v42 = vadd.f32 %v2264_v4, %v2101_v57  ;;  %v11676_v45 = vld [vmem:[#allocation114_spill] sm:$0xff]  ;;  %v1945_v43 = vrot.slane %v11678_v22, 2  ;;  %v11679_v31 = vld [vmem:[#allocation111_spill] sm:$0xff] }
 0x200   : > { %v1463_v48 = vadd.f32 %v1381_v54, %v11672_v51  ;;  %v11677_v47 = vrot.slane %v11676_v45, 1  ;;  %v2510_v12 = vsel %vm1331_vm6, %v2508_v61, %v2509_v52  ;;  %v11680_v2 = vrot.slane %v11679_v31, 2  ;;  %v11686_v22 = vld [vmem:[#allocation107_spill] sm:$0xff] }
 0x201   : > { %v1534_v17 = vadd.f32 %v11673_v39, %v1462_v23  ;;  %v1946_v36 = vrot.slane %v11682_v60, 2  ;;  %v2596_v4 = vadd.f32 %v2510_v12, %v2348_v63  ;;  %v11683_v23 = vld [vmem:[#allocation106_spill] sm:$0xff]  ;;  %v11685_v39 = vmov %v11675_v32 }
 0x202   : > { %v1699_v0 = vsel %vm1082_vm5, %v11677_v47, %v11675_v32  ;;  %v2512_v57 = vsel %vm1331_vm6, %v2509_v52, %v11680_v2  ;;  %v1535_v54 = vadd.f32 %v11681_v41, %v1463_v48  ;;  %v11684_v51 = vrot.slane %v11683_v23, 1  ;;  %v6583_v2 = vld [vmem:[#allocation2 + $0x108] sm:$0xff]  ;;  %v6584_v41 = vld [vmem:[#allocation2 + $0x110] sm:$0xff] }
 0x203   : > { %v2597_v26 = vadd.f32 %v2512_v57, %v2349_v42  ;;  %v1782_v45 = vadd.f32 %v1699_v0, %v1534_v17  ;;  %v1947_v61 = vsel %vm1331_vm6, %v1945_v43, %v1946_v36  ;;  %v11687_v31 = vrot.slane %v11686_v22, 2  ;;  %v9099_v57 = vld [vmem:[#allocation3 + $0xc0] sm:$0xff] }
 0x204   : > { %v1701_v32 = vsel %vm1082_vm5, %v11685_v39, %v11684_v51  ;;  %v2070_v48 = vmul.f32 %v6583_v2, %v9033_v13  ;;  %v2634_v63 = vmul.f32 %v8794_v58, %v2596_v4  ;;  %v2151_v25 = vmul.f32 %v6583_v2, %v8788_v5  ;;  %v9101_v17 = vld [vmem:[#allocation3 + $0xc8] sm:$0xff]  ;;  %v9103_v0 = vld [vmem:[#allocation3 + $0xd0] sm:$0x3] }
 0x205   : > { %v1783_v47 = vadd.f32 %v1701_v32, %v1535_v54  ;;  %v1949_v52 = vsel %vm1331_vm6, %v1946_v36, %v11687_v31  ;;  %v2635_v42 = vmul.f32 %v8794_v58, %v2597_v26  ;;  %v2030_v12 = vadd.f32 %v1947_v61, %v1782_v45 }
 0x206   : > { %v2071_v54 = vmul.f32 %v6584_v41, %v9033_v13  ;;  %v2152_v60 = vmul.f32 %v6584_v41, %v8788_v5  ;;  %v2399_v36 = vmul.f32 %v6583_v2, %v8801_v10  ;;  %v9110_v4 = vpack.c.bf16 %v9101_v17, %v9099_v57 }
 0x207   : > { %v2031_v43 = vadd.f32 %v1949_v52, %v1783_v47  ;;  %v2912_v26 = vrot.slane %v9099_v57, 1  ;;  %v2913_v23 = vrot.slane %v9101_v17, 1  ;;  %v2400_v51 = vmul.f32 %v6584_v41, %v8801_v10 }
 0x208   : > { %11688 = vst [vmem:[#allocation21_spill] sm:$0xff] %v9110_v4  ;;  %v2915_v32 = vrot.slane %v9103_v0, 1  ;;  %v2670_v45 = vadd.f32 %v8812_v20, %v2634_v63  ;;  %v2671_v47 = vadd.f32 %v8812_v20, %v2635_v42  ;;  %6215 = vmatprep.mubr.msk.bf16.mxu0 %vm305_vm2, %v9110_v4  ;;  %v2102_v22 = vadd.f32 %v2070_v48, %v2030_v12  ;;  %v11690_v63 = vld [vmem:[#allocation113_spill] sm:$0xff]  ;;  %v11692_v42 = vld [vmem:[#allocation112_spill] sm:$0xff] }
 0x209   : > { %v2914_v61 = vsel %vm1082_vm5, %v2912_v26, %v2913_v23  ;;  %v2103_v31 = vadd.f32 %v2071_v54, %v2031_v43  ;;  %v2265_v52 = vrot.slane %v2151_v25, 1  ;;  %v2266_v9 = vrot.slane %v2152_v60, 1  ;;  %v11694_v12 = vld [vmem:[#allocation125_spill] sm:$0xff]  ;;  %v11696_v54 = vld [vmem:[#allocation123_spill] sm:$0xff] }
 0x20a   : > { %v2916_v2 = vsel %vm1082_vm5, %v2913_v23, %v2915_v32  ;;  %v2702_v15 = vmax.f32 %v2670_v45, 0.0  ;;  %v2703_v41 = vmax.f32 %v2671_v47, 0.0  ;;  %v2513_v56 = vrot.slane %v2399_v36, 2  ;;  %v11697_v23 = vld [vmem:[#allocation105_spill] sm:$0xff]  ;;  %v11700_v47 = vld [vmem:[#allocation126_spill] sm:$0xff] }
 0x20b   : > { %v9123_v39 = vpack.c.bf16 %v2916_v2, %v2914_v61  ;;  %v2514_v21 = vrot.slane %v2400_v51, 2  ;;  %v11691_v44 = vrot.slane %v11690_v63, 2  ;;  %v11693_v55 = vrot.slane %v11692_v42, 2  ;;  %v11703_v2 = vld [vmem:[#allocation131_spill] sm:$0xff]  ;;  %v11720_v42 = vld [vmem:[#allocation122_spill] sm:$0xff] }
 0x20c   : > { %2734 = vst.msk [vmem:[#allocation3 + $0xd9] sm:$0xff] %vm305_vm2, %v2702_v15  ;;  %2735 = vst.msk [vmem:[#allocation3 + $0xe1] sm:$0xff] %vm305_vm2, %v2703_v41  ;;  %v2267_v48 = vsel %vm1082_vm5, %v2265_v52, %v2266_v9  ;;  %v11695_v25 = vrot.slane %v11694_v12, 1  ;;  %v11698_v51 = vrot.slane %v11697_v23, 2  ;;  %v11699_v15 = vrot.slane %v11690_v63, 2  ;;  %v11709_v23 = vld [vmem:[#allocation121_spill] sm:$0xff] }
 0x20d   : > { %11689 = vst [vmem:[#allocation16_spill] sm:$0xff] %v9123_v39  ;;  %v1384_v4 = vsel %vm1331_vm6, %v11693_v55, %v11691_v44  ;;  %6179 = vmatprep.mubr.msk.bf16.mxu1 %vm305_vm2, %v9123_v39  ;;  %v2350_v55 = vadd.f32 %v2267_v48, %v2102_v22  ;;  %v2515_v45 = vsel %vm1331_vm6, %v2513_v56, %v2514_v21  ;;  %v11701_v61 = vrot.slane %v11700_v47, 2  ;;  %v11704_v48 = vld [vmem:[#allocation130_spill] sm:$0xff] }
 0x20e   : > { %v2269_v43 = vsel %vm1082_vm5, %v2266_v9, %v11695_v25  ;;  %v1464_v60 = vadd.f32 %v1384_v4, %v11696_v54  ;;  %v1386_v32 = vsel %vm1331_vm6, %v11699_v15, %v11698_v51  ;;  %v11702_v4 = vld [vmem:[#allocation124_spill] sm:$0xff]  ;;  %v11705_v12 = vrot.slane %v11704_v48, 1  ;;  %v11706_v25 = vld [vmem:[#allocation129_spill] sm:$0xff] }
 0x20f   : > { %v2351_v44 = vadd.f32 %v2269_v43, %v2103_v31  ;;  %v2517_v9 = vsel %vm1331_vm6, %v2514_v21, %v11701_v61  ;;  %v1465_v52 = vadd.f32 %v1386_v32, %v11702_v4  ;;  %v2598_v22 = vadd.f32 %v2515_v45, %v2350_v55  ;;  %v11708_v54 = vld [vmem:[#allocation132_spill] sm:$0xff]  ;;  %v11714_v61 = vld [vmem:[#allocation133_spill] sm:$0xff]  ;;  %v6585_v4 = vld [vmem:[#allocation2 + $0x120] sm:$0xff] }
 0x210   : > { %v1536_v41 = vadd.f32 %v11703_v2, %v1464_v60  ;;  %v11707_v63 = vrot.slane %v11706_v25, 1  ;;  %v11710_v51 = vrot.slane %v11709_v23, 1  ;;  %v11711_v21 = vmov %v11705_v12  ;;  %v11712_v60 = vld [vmem:[#allocation134_spill] sm:$0xff]  ;;  %v6586_v2 = vld [vmem:[#allocation2 + $0x128] sm:$0xff] }
 0x211   : > { %v2599_v31 = vadd.f32 %v2517_v9, %v2351_v44  ;;  %v1537_v56 = vadd.f32 %v11708_v54, %v1465_v52  ;;  %v11713_v47 = vrot.slane %v11712_v60, 2  ;;  %v11715_v55 = vrot.slane %v11714_v61, 2 }
 0x212   : > { %v1704_v43 = vsel %vm1082_vm5, %v11707_v63, %v11705_v12  ;;  %v1706_v15 = vsel %vm1082_vm5, %v11711_v21, %v11710_v51  ;;  %v2636_v45 = vmul.f32 %v8794_v58, %v2598_v22  ;;  %v2154_v52 = vmul.f32 %v6585_v4, %v8788_v5 }
 0x213   : > { %v1784_v32 = vadd.f32 %v1704_v43, %v1536_v41  ;;  %v1952_v44 = vsel %vm1331_vm6, %v11715_v55, %v11713_v47  ;;  %v2637_v9 = vmul.f32 %v8794_v58, %v2599_v31  ;;  %v2155_v12 = vmul.f32 %v6586_v2, %v8788_v5  ;;  %v9175_v43 = vld [vmem:[#allocation3 + $0xd8] sm:$0xff]  ;;  %v9177_v54 = vld [vmem:[#allocation3 + $0xe0] sm:$0xff]  ;;  %v9179_v23 = vld [vmem:[#allocation3 + $0xe8] sm:$0x3] }
 0x214   : > { %v1785_v48 = vadd.f32 %v1706_v15, %v1537_v56  ;;  %v2402_v41 = vmul.f32 %v6585_v4, %v8801_v10  ;;  %v2403_v63 = vmul.f32 %v6586_v2, %v8801_v10  ;;  %11716 = vst [vmem:[#allocation30_spill] sm:$0xff] %v9175_v43  ;;  %11717 = vst [vmem:[#allocation31_spill] sm:$0xff] %v9177_v54  ;;  %v2270_v51 = vrot.slane %v2154_v52, 1 }
 0x215   : > { %v2032_v25 = vadd.f32 %v1952_v44, %v1784_v32  ;;  %11718 = vst [vmem:[#allocation39_spill] sm:$0xff] %v9179_v23  ;;  %v2672_v22 = vadd.f32 %v8812_v20, %v2636_v45  ;;  %v2673_v31 = vadd.f32 %v8812_v20, %v2637_v9  ;;  %v2271_v21 = vrot.slane %v2155_v12, 1 }
 0x216   : > { %v9185_v56 = vpack.c.bf16 %v9177_v54, %v9175_v43  ;;  %v2917_v15 = vrot.slane %v9175_v43, 1  ;;  %v2918_v32 = vrot.slane %v9177_v54, 1  ;;  %v2072_v47 = vmul.f32 %v6585_v4, %v9033_v13  ;;  %v9203_v4 = vld [vmem:[%s11046_s3 + $0x58] sm:$0xff]  }
 0x217   : > { %v2920_v61 = vrot.slane %v9179_v23, 1  ;;  %v2704_v55 = vmax.f32 %v2672_v22, 0.0  ;;  %v2705_v44 = vmax.f32 %v2673_v31, 0.0  ;;  %v11721_v45 = vrot.slane %v11720_v42, 2  ;;  %11723 = vst [vmem:[#allocation28_spill] sm:$0xff] %v9203_v4  ;;  %6339 = vmatprep.subr.bf16.mxu0 %v9203_v4 }
 0x218   : > { %11719 = vst [vmem:[#allocation38_spill] sm:$0xff] %v9185_v56  ;;  %v11722_v9 = vrot.slane %v11712_v60, 2  ;;  %6216 = vmatmul.mubr.msk.bf16.gmra.mxu0 %vm305_vm2, %v9185_v56  ;;  %v2919_v12 = vsel %vm1082_vm5, %v2917_v15, %v2918_v32  ;;  %v2073_v36 = vmul.f32 %v6586_v2, %v9033_v13  ;;  %v2104_v39 = vadd.f32 %v2072_v47, %v2032_v25  ;;  %v11725_v25 = vld [vmem:[#allocation128_spill] sm:$0xff] }
 0x219   : > { %v2921_v42 = vsel %vm1082_vm5, %v2918_v32, %v2920_v61  ;;  %2736 = vst.msk [vmem:[#allocation3 + $0xf1] sm:$0xff] %vm305_vm2, %v2704_v55  ;;  %2737 = vst.msk [vmem:[#allocation3 + $0xf9] sm:$0xff] %vm305_vm2, %v2705_v44  ;;  %v2272_v60 = vsel %vm1082_vm5, %v2270_v51, %v2271_v21  ;;  %v2518_v22 = vrot.slane %v2402_v41, 2  ;;  %v2519_v31 = vrot.slane %v2403_v63, 2  ;;  %v11729_v32 = vld [vmem:[#allocation140_spill] sm:$0xff] }
 0x21a   : > { %v1954_v52 = vsel %vm1331_vm6, %v11722_v9, %v11721_v45  ;;  %v9209_v15 = vpack.c.bf16 %v2921_v42, %v2919_v12  ;;  %v2352_v2 = vadd.f32 %v2272_v60, %v2104_v39  ;;  %v11726_v47 = vrot.slane %v11725_v25, 2  ;;  %v11727_v45 = vld [vmem:[#allocation127_spill] sm:$0xff]  ;;  %v11731_v41 = vld [vmem:[#allocation120_spill] sm:$0xff]  ;;  %v11741_v12 = vld [vmem:[#allocation145_spill] sm:$0xff] }
 0x21b   : > { %v2033_v26 = vadd.f32 %v1954_v52, %v1785_v48  ;;  %v11728_v9 = vrot.slane %v11727_v45, 2  ;;  %v11730_v61 = vrot.slane %v11729_v32, 1  ;;  %v2520_v51 = vsel %vm1331_vm6, %v2518_v22, %v2519_v31  ;;  %v11738_v32 = vld [vmem:[#allocation144_spill] sm:$0xff] }
 0x21c   : > { %11724 = vst [vmem:[#allocation42_spill] sm:$0xff] %v9209_v15  ;;  %v11732_v63 = vrot.slane %v11731_v41, 2  ;;  %v11733_v44 = vmov %v11726_v47  ;;  %6180 = vmatmul.mubr.msk.bf16.gmra.mxu1 %vm305_vm2, %v9209_v15  ;;  %v2600_v60 = vadd.f32 %v2520_v51, %v2352_v2  ;;  %v11739_v25 = vld [vmem:[#allocation148_spill] sm:$0xff]  ;;  %v11742_v15 = vld [vmem:[#allocation147_spill] sm:$0xff]  ;;  %v11744_v2 = vld [vmem:[#allocation146_spill] sm:$0xff] }
 0x21d   : > { %v2105_v48 = vadd.f32 %v2073_v36, %v2033_v26  ;;  %v1389_v52 = vsel %vm1331_vm6, %v11728_v9, %v11726_v47  ;;  %v2274_v55 = vsel %vm1082_vm5, %v2271_v21, %v11730_v61  ;;  %v11734_v26 = vld [vmem:[#allocation136_spill] sm:$0xff]  ;;  %v11735_v47 = vld [vmem:[#allocation137_spill] sm:$0xff]  ;;  %v1955_v41 = vrot.slane %v11739_v25, 2 }
 0x21e   : > { %v1391_v39 = vsel %vm1331_vm6, %v11733_v44, %v11732_v63  ;;  %v1466_v36 = vadd.f32 %v1389_v52, %v11734_v26  ;;  %v11736_v21 = vld [vmem:[#allocation141_spill] sm:$0xff]  ;;  %v2638_v26 = vmul.f32 %v8794_v58, %v2600_v60 }
 0x21f   : > { %v2353_v42 = vadd.f32 %v2274_v55, %v2105_v48  ;;  %v1467_v45 = vadd.f32 %v1391_v39, %v11735_v47  ;;  %v11737_v9 = vrot.slane %v11736_v21, 2  ;;  %v11740_v63 = vld [vmem:[#allocation149_spill] sm:$0xff]  ;;  %v11743_v48 = vrot.slane %v11742_v15, 1  ;;  %v11746_v39 = vld [vmem:[#allocation138_spill] sm:$0xff] }
 0x220   : > { %v1538_v61 = vadd.f32 %v11738_v32, %v1466_v36  ;;  %v1956_v44 = vrot.slane %v11740_v63, 2  ;;  %v11745_v55 = vrot.slane %v11744_v2, 1  ;;  %v11747_v47 = vrot.slane %v11746_v39, 1  ;;  %v11751_v2 = vld [vmem:[#allocation139_spill] sm:$0xff] }
 0x221   : > { %v2522_v22 = vsel %vm1331_vm6, %v2519_v31, %v11737_v9  ;;  %v1539_v56 = vadd.f32 %v11741_v12, %v1467_v45  ;;  %v11748_v31 = vmov %v11743_v48  ;;  %v9253_v12 = vld [vmem:[#allocation3 + $0xf8] sm:$0xff]  ;;  %v9255_v45 = vld [vmem:[#allocation3 + $0x100] sm:$0x3]  ;;  %v2674_v25 = vadd.f32 %v8812_v20, %v2638_v26 }
 0x222   : > { %v2601_v52 = vadd.f32 %v2522_v22, %v2353_v42  ;;  %v1709_v51 = vsel %vm1082_vm5, %v11745_v55, %v11743_v48  ;;  %v1711_v36 = vsel %vm1082_vm5, %v11748_v31, %v11747_v47  ;;  %v1957_v9 = vsel %vm1331_vm6, %v1955_v41, %v1956_v44  ;;  %v6587_v42 = vld [vmem:[#allocation2 + $0x138] sm:$0xff]  ;;  %v9251_v22 = vld [vmem:[#allocation3 + $0xf0] sm:$0xff]  ;;  %11749 = vst [vmem:[#allocation41_spill] sm:$0xff] %v9255_v45 }
 0x223   : > { %v1786_v21 = vadd.f32 %v1709_v51, %v1538_v61  ;;  %v2074_v60 = vmul.f32 %v6587_v42, %v9033_v13  ;;  %v1787_v63 = vadd.f32 %v1711_v36, %v1539_v56  ;;  %v2157_v15 = vmul.f32 %v6587_v42, %v8788_v5  ;;  %v6588_v56 = vld [vmem:[#allocation2 + $0x140] sm:$0xff] }
 0x224   : > { %v2639_v32 = vmul.f32 %v8794_v58, %v2601_v52  ;;  %v9262_v61 = vpack.c.bf16 %v9253_v12, %v9251_v22  ;;  %v2922_v41 = vrot.slane %v9251_v22, 1  ;;  %v2923_v48 = vrot.slane %v9253_v12, 1 }
 0x225   : > { %v11752_v55 = vrot.slane %v11751_v2, 2  ;;  %v2925_v39 = vrot.slane %v9255_v45, 1  ;;  %v2706_v26 = vmax.f32 %v2674_v25, 0.0  ;;  %v2075_v47 = vmul.f32 %v6588_v56, %v9033_v13 }
 0x226   : > { %11750 = vst [vmem:[#allocation40_spill] sm:$0xff] %v9262_v61  ;;  %v2675_v52 = vadd.f32 %v8812_v20, %v2639_v32  ;;  %6219 = vmatprep.mubr.msk.bf16.mxu0 %vm305_vm2, %v9262_v61  ;;  %v2924_v31 = vsel %vm1082_vm5, %v2922_v41, %v2923_v48  ;;  %v2034_v36 = vadd.f32 %v1957_v9, %v1786_v21 }
 0x227   : > { %v1959_v51 = vsel %vm1331_vm6, %v1956_v44, %v11752_v55  ;;  %v2158_v37 = vmul.f32 %v6588_v56, %v8788_v5  ;;  %v2926_v2 = vsel %vm1082_vm5, %v2923_v48, %v2925_v39  ;;  %2738 = vst.msk [vmem:[#allocation3 + $0x109] sm:$0xff] %vm305_vm2, %v2706_v26  ;;  %v2275_v55 = vrot.slane %v2157_v15, 1 }
 0x228   : > { %v2035_v4 = vadd.f32 %v1959_v51, %v1787_v63  ;;  %v2707_v44 = vmax.f32 %v2675_v52, 0.0  ;;  %v2405_v32 = vmul.f32 %v6587_v42, %v8801_v10  ;;  %v9279_v25 = vpack.c.bf16 %v2926_v2, %v2924_v31  ;;  %v11754_v63 = vld [vmem:[#allocation143_spill] sm:$0xff]  ;;  %v11756_v51 = vld [vmem:[#allocation142_spill] sm:$0xff] }
 0x229   : > { %v2106_v30 = vadd.f32 %v2074_v60, %v2034_v36  ;;  %v2276_v8 = vrot.slane %v2158_v37, 1  ;;  %v2406_v21 = vmul.f32 %v6588_v56, %v8801_v10  ;;  %v11755_v41 = vrot.slane %v11754_v63, 2  ;;  %v11758_v52 = vld [vmem:[#allocation135_spill] sm:$0xff]  ;;  %v11764_v36 = vld [vmem:[#allocation156_spill] sm:$0xff] }
 0x22a   : > { %11753 = vst [vmem:[#allocation29_spill] sm:$0xff] %v9279_v25  ;;  %v2107_v29 = vadd.f32 %v2075_v47, %v2035_v4  ;;  %2739 = vst.msk [vmem:[#allocation3 + $0x111] sm:$0xff] %vm305_vm2, %v2707_v44  ;;  %v2523_v9 = vrot.slane %v2405_v32, 2  ;;  %v11757_v48 = vrot.slane %v11756_v51, 2  ;;  %v11759_v15 = vrot.slane %v11758_v52, 2  ;;  %6183 = vmatprep.mubr.msk.bf16.mxu1 %vm305_vm2, %v9279_v25  ;;  %v11761_v4 = vld [vmem:[#allocation153_spill] sm:$0xff] }
 0x22b   : > { %v11760_v42 = vmov %v11755_v41  ;;  %v2277_v37 = vsel %vm1082_vm5, %v2275_v55, %v2276_v8  ;;  %v11762_v60 = vrot.slane %v11761_v4, 1  ;;  %v11763_v47 = vld [vmem:[#allocation155_spill] sm:$0xff]  ;;  %v2524_v63 = vrot.slane %v2406_v21, 2  ;;  %v11765_v51 = vld [vmem:[#allocation161_spill] sm:$0xff]  ;;  %v11766_v52 = vld [vmem:[#allocation162_spill] sm:$0xff] }
 0x22c   : > { %v1394_v39 = vsel %vm1331_vm6, %v11757_v48, %v11755_v41  ;;  %v1396_v26 = vsel %vm1331_vm6, %v11760_v42, %v11759_v15  ;;  %v2354_v32 = vadd.f32 %v2277_v37, %v2106_v30  ;;  %v11767_v42 = vld [vmem:[#allocation160_spill] sm:$0xff]  ;;  %v11769_v55 = vld [vmem:[#allocation159_spill] sm:$0xff] }
 0x22d   : > { %v2279_v56 = vsel %vm1082_vm5, %v2276_v8, %v11762_v60  ;;  %v1468_v31 = vadd.f32 %v1394_v39, %v11763_v47  ;;  %v1469_v2 = vadd.f32 %v1396_v26, %v11764_v36  ;;  %v11768_v25 = vrot.slane %v11767_v42, 1  ;;  %v11771_v8 = vld [vmem:[#allocation151_spill] sm:$0xff] }
 0x22e   : > { %v2355_v41 = vadd.f32 %v2279_v56, %v2107_v29  ;;  %v11770_v61 = vrot.slane %v11769_v55, 1  ;;  %v11772_v60 = vrot.slane %v11771_v8, 1  ;;  %v2525_v30 = vsel %vm1331_vm6, %v2523_v9, %v2524_v63  ;;  %v11774_v29 = vld [vmem:[#allocation154_spill] sm:$0xff]  ;;  %v11776_v56 = vld [vmem:[#allocation164_spill] sm:$0xff] }
 0x22f   : > { %v1540_v48 = vadd.f32 %v11765_v51, %v1468_v31  ;;  %v1541_v15 = vadd.f32 %v11766_v52, %v1469_v2  ;;  %v11773_v39 = vmov %v11768_v25  ;;  %v11775_v21 = vrot.slane %v11774_v29, 2  ;;  %v11778_v31 = vld [vmem:[#allocation163_spill] sm:$0xff]  ;;  %v11780_v51 = vld [vmem:[#allocation152_spill] sm:$0xff]  ;;  %v9328_v42 = vld [vmem:[#allocation3 + $0x108] sm:$0xff] }
 0x230   : > { %v1714_v4 = vsel %vm1082_vm5, %v11770_v61, %v11768_v25  ;;  %v1716_v26 = vsel %vm1082_vm5, %v11773_v39, %v11772_v60  ;;  %v11777_v47 = vrot.slane %v11776_v56, 2  ;;  %v11779_v36 = vrot.slane %v11778_v31, 2  ;;  %v6589_v39 = vld [vmem:[#allocation2 + $0x150] sm:$0xff] }
 0x231   : > { %v2527_v37 = vsel %vm1331_vm6, %v2524_v63, %v11775_v21  ;;  %v11781_v61 = vrot.slane %v11780_v51, 2  ;;  %v2602_v55 = vadd.f32 %v2525_v30, %v2354_v32  ;;  %v1788_v8 = vadd.f32 %v1714_v4, %v1540_v48  ;;  %v6590_v21 = vld [vmem:[#allocation2 + $0x158] sm:$0xff]  ;;  %v9336_v56 = vld [vmem:[#allocation3 + $0x118] sm:$0x3] }
 0x232   : > { %v1962_v2 = vsel %vm1331_vm6, %v11779_v36, %v11777_v47  ;;  %v11782_v25 = vmov %v11777_v47  ;;  %v2603_v9 = vadd.f32 %v2527_v37, %v2355_v41  ;;  %v1789_v60 = vadd.f32 %v1716_v26, %v1541_v15  ;;  %v9334_v36 = vld [vmem:[#allocation3 + $0x110] sm:$0xff]  ;;  %11783 = vst [vmem:[#allocation43_spill] sm:$0xff] %v9336_v56 }
 0x233   : > { %v1964_v52 = vsel %vm1331_vm6, %v11782_v25, %v11781_v61  ;;  %v2927_v63 = vrot.slane %v9328_v42, 1  ;;  %v2076_v29 = vmul.f32 %v6589_v39, %v9033_v13  ;;  %v2077_v47 = vmul.f32 %v6590_v21, %v9033_v13 }
 0x234   : > { %v2160_v31 = vmul.f32 %v6589_v39, %v8788_v5  ;;  %v2640_v51 = vmul.f32 %v8794_v58, %v2602_v55  ;;  %v2641_v32 = vmul.f32 %v8794_v58, %v2603_v9  ;;  %v2036_v41 = vadd.f32 %v1962_v2, %v1788_v8 }
 0x235   : > { %v2037_v48 = vadd.f32 %v1964_v52, %v1789_v60  ;;  %v9343_v4 = vpack.c.bf16 %v9334_v36, %v9328_v42  ;;  %v2928_v26 = vrot.slane %v9334_v36, 1  ;;  %v2930_v30 = vrot.slane %v9336_v56, 1 }
 0x236   : > { %v2676_v37 = vadd.f32 %v8812_v20, %v2640_v51  ;;  %v2677_v61 = vadd.f32 %v8812_v20, %v2641_v32  ;;  %v2108_v25 = vadd.f32 %v2076_v29, %v2036_v41  ;;  %v2161_v9 = vmul.f32 %v6590_v21, %v8788_v5  ;;  %v11788_v41 = vld [vmem:[#allocation157_spill] sm:$0xff] }
 0x237   : > { %11784 = vst [vmem:[#allocation37_spill] sm:$0xff] %v9343_v4  ;;  %v2109_v55 = vadd.f32 %v2077_v47, %v2037_v48  ;;  %6220 = vmatmul.mubr.msk.bf16.gmra.mxu0 %vm305_vm2, %v9343_v4  ;;  %v2929_v2 = vsel %vm1082_vm5, %v2927_v63, %v2928_v26  ;;  %v2931_v52 = vsel %vm1082_vm5, %v2928_v26, %v2930_v30  ;;  %v2280_v8 = vrot.slane %v2160_v31, 1  ;;  %v11786_v47 = vld [vmem:[#allocation158_spill] sm:$0xff] }
 0x238   : > { %v9354_v60 = vpack.c.bf16 %v2931_v52, %v2929_v2  ;;  %v2708_v44 = vmax.f32 %v2676_v37, 0.0  ;;  %v2709_v15 = vmax.f32 %v2677_v61, 0.0  ;;  %v2408_v51 = vmul.f32 %v6589_v39, %v8801_v10  ;;  %v11790_v4 = vld [vmem:[#allocation150_spill] sm:$0xff]  ;;  %v11794_v61 = vld [vmem:[#allocation171_spill] sm:$0xff]  ;;  %v11795_v52 = vld [vmem:[#allocation180_spill] sm:$0xff] }
 0x239   : > { %v2281_v56 = vrot.slane %v2161_v9, 1  ;;  %v2409_v29 = vmul.f32 %v6590_v21, %v8801_v10  ;;  %v11787_v32 = vrot.slane %v11786_v47, 2  ;;  %v11789_v48 = vrot.slane %v11788_v41, 2  ;;  %v11793_v21 = vld [vmem:[#allocation167_spill] sm:$0xff] }
 0x23a   : > { %11785 = vst [vmem:[#allocation36_spill] sm:$0xff] %v9354_v60  ;;  %v11791_v26 = vrot.slane %v11790_v4, 2  ;;  %6184 = vmatmul.mubr.msk.bf16.gmra.mxu1 %vm305_vm2, %v9354_v60  ;;  %2740 = vst.msk [vmem:[#allocation3 + $0x121] sm:$0xff] %vm305_vm2, %v2708_v44  ;;  %v2528_v39 = vrot.slane %v2408_v51, 2  ;;  %v11796_v9 = vrot.slane %v11795_v52, 1  ;;  %v11801_v60 = vld [vmem:[#allocation173_spill] sm:$0xff] }
 0x23b   : > { %v1399_v63 = vsel %vm1331_vm6, %v11789_v48, %v11787_v32  ;;  %v11792_v30 = vmov %v11787_v32  ;;  %2741 = vst.msk [vmem:[#allocation3 + $0x129] sm:$0xff] %vm305_vm2, %v2709_v15  ;;  %v11797_v32 = vld [vmem:[#allocation179_spill] sm:$0xff]  ;;  %v2282_v41 = vsel %vm1082_vm5, %v2280_v8, %v2281_v56  ;;  %v2529_v44 = vrot.slane %v2409_v29, 2  ;;  %v11806_v8 = vld [vmem:[#allocation176_spill] sm:$0xff] }
 0x23c   : > { %v1401_v31 = vsel %vm1331_vm6, %v11792_v30, %v11791_v26  ;;  %v1470_v37 = vadd.f32 %v1399_v63, %v11793_v21  ;;  %v11798_v4 = vrot.slane %v11797_v32, 1  ;;  %v11799_v48 = vld [vmem:[#allocation175_spill] sm:$0xff]  ;;  %v11802_v15 = vrot.slane %v11801_v60, 1  ;;  %v11805_v32 = vld [vmem:[#allocation178_spill] sm:$0xff] }
 0x23d   : > { %v1471_v2 = vadd.f32 %v1401_v31, %v11794_v61  ;;  %v11800_v26 = vrot.slane %v11799_v48, 1  ;;  %v11803_v51 = vmov %v11796_v9  ;;  %v2356_v31 = vadd.f32 %v2282_v41, %v2108_v25  ;;  %v11804_v61 = vld [vmem:[#allocation177_spill] sm:$0xff]  ;;  %v6591_v41 = vld [vmem:[#allocation2 + $0x168] sm:$0xff] }
 0x23e   : > { %v1719_v47 = vsel %vm1082_vm5, %v11798_v4, %v11796_v9  ;;  %v1721_v63 = vsel %vm1082_vm5, %v11803_v51, %v11802_v15  ;;  %v1542_v45 = vadd.f32 %v11804_v61, %v1470_v37  ;;  %v2530_v9 = vsel %vm1331_vm6, %v2528_v39, %v2529_v44  ;;  %v11810_v37 = vld [vmem:[#allocation174_spill] sm:$0xff] }
 0x23f   : > { %v2284_v30 = vsel %vm1082_vm5, %v2281_v56, %v11800_v26  ;;  %v1543_v23 = vadd.f32 %v11805_v32, %v1471_v2  ;;  %v11807_v4 = vrot.slane %v11806_v8, 2  ;;  %v11808_v56 = vld [vmem:[#allocation181_spill] sm:$0xff]  ;;  %v11809_v26 = vld [vmem:[#allocation7_spill] sm:$0xff]  ;;  %v2604_v43 = vadd.f32 %v2530_v9, %v2356_v31 }
 0x240   : > { %v2357_v21 = vadd.f32 %v2284_v30, %v2109_v55  ;;  %v1965_v29 = vrot.slane %v11808_v56, 2  ;;  %v1966_v60 = vrot.slane %v11809_v26, 2  ;;  %v1790_v54 = vadd.f32 %v1719_v47, %v1542_v45  ;;  %v6592_v47 = vld [vmem:[#allocation2 + $0x170] sm:$0xff] }
 0x241   : > { %v2532_v48 = vsel %vm1331_vm6, %v2529_v44, %v11807_v4  ;;  %v1791_v15 = vadd.f32 %v1721_v63, %v1543_v23  ;;  %v11811_v2 = vrot.slane %v11810_v37, 2  ;;  %v2078_v30 = vmul.f32 %v6591_v41, %v9033_v13 }
 0x242   : > { %v2605_v52 = vadd.f32 %v2532_v48, %v2357_v21  ;;  %v1967_v55 = vsel %vm1331_vm6, %v1965_v29, %v1966_v60  ;;  %v2642_v44 = vmul.f32 %v8794_v58, %v2604_v43  ;;  %v9404_v21 = vld [vmem:[#allocation3 + $0x120] sm:$0xff]  ;;  %v9406_v23 = vld [vmem:[#allocation3 + $0x128] sm:$0xff]  ;;  %v9408_v45 = vld [vmem:[#allocation3 + $0x130] sm:$0x3]  ;;  %v2079_v63 = vmul.f32 %v6592_v47, %v9033_v13 }
 0x243   : > { %v1969_v39 = vsel %vm1331_vm6, %v1966_v60, %v11811_v2  ;;  %v2038_v61 = vadd.f32 %v1967_v55, %v1790_v54  ;;  %v2163_v32 = vmul.f32 %v6591_v41, %v8788_v5  ;;  %v2164_v9 = vmul.f32 %v6592_v47, %v8788_v5 }
 0x244   : > { %v2643_v51 = vmul.f32 %v8794_v58, %v2605_v52  ;;  %v2039_v31 = vadd.f32 %v1969_v39, %v1791_v15  ;;  %v2411_v8 = vmul.f32 %v6591_v41, %v8801_v10  ;;  %v9416_v43 = vpack.c.bf16 %v9406_v23, %v9404_v21 }
 0x245   : > { %v2932_v54 = vrot.slane %v9404_v21, 1  ;;  %v2933_v4 = vrot.slane %v9406_v23, 1  ;;  %v2412_v48 = vmul.f32 %v6592_v47, %v8801_v10  ;;  %v2935_v29 = vrot.slane %v9408_v45, 1 }
 0x246   : > { %v2678_v26 = vadd.f32 %v8812_v20, %v2642_v44  ;;  %v2679_v5 = vadd.f32 %v8812_v20, %v2643_v51  ;;  %6223 = vmatprep.mubr.msk.bf16.mxu0 %vm305_vm2, %v9416_v43  ;;  %v2110_v52 = vadd.f32 %v2078_v30, %v2038_v61  ;;  %v2111_v15 = vadd.f32 %v2079_v63, %v2039_v31  ;;  %v11814_v61 = vld [vmem:[#allocation8_spill] sm:$0xff] }
 0x247   : > { %v2934_v60 = vsel %vm1082_vm5, %v2932_v54, %v2933_v4  ;;  %v2285_v55 = vrot.slane %v2163_v32, 1  ;;  %v2936_v37 = vsel %vm1082_vm5, %v2933_v4, %v2935_v29  ;;  %v2286_v39 = vrot.slane %v2164_v9, 1 }
 0x248   : > { %v2710_v2 = vmax.f32 %v2678_v26, 0.0  ;;  %v2711_v10 = vmax.f32 %v2679_v5, 0.0  ;;  %v9429_v41 = vpack.c.bf16 %v2936_v37, %v2934_v60  ;;  %v2533_v47 = vrot.slane %v2411_v8, 2  ;;  %v11818_v5 = vld [vmem:[#allocation9_spill] sm:$0xff] }
 0x249   : > { %v2534_v25 = vrot.slane %v2412_v48, 2  ;;  %v11812_v44 = vrot.slane %v8689_v16, 1  ;;  %v11813_v51 = vrot.slane %v8685_v6, 1  ;;  %v3502_v54 = vrot.slane %v9328_v42, 2 }
 0x24a   : > { %2742 = vst.msk [vmem:[#allocation3 + $0x139] sm:$0xff] %vm305_vm2, %v2710_v2  ;;  %2743 = vst.msk [vmem:[#allocation3 + $0x141] sm:$0xff] %vm305_vm2, %v2711_v10  ;;  %v2287_v30 = vsel %vm1082_vm5, %v2285_v55, %v2286_v39  ;;  %v11815_v31 = vrot.slane %v11814_v61, 1  ;;  %v3503_v9 = vrot.slane %v9334_v36, 2  ;;  %6187 = vmatprep.mubr.msk.bf16.mxu1 %vm305_vm2, %v9429_v41  ;;  %v11816_v4 = vrot.slane %v8533_v59, 1  ;;  %v11828_v61 = vld [vmem:[#allocation168_spill] sm:$0xff] }
 0x24b   : > { %v2292_v56 = vsel %vm1082_vm5, %v11813_v51, %v11812_v44  ;;  %v2358_v6 = vadd.f32 %v2287_v30, %v2110_v52  ;;  %v11817_v48 = vmov %v11812_v44  ;;  %v2535_v26 = vsel %vm1331_vm6, %v2533_v47, %v2534_v25  ;;  %v11824_v44 = vld [vmem:[#allocation166_spill] sm:$0xff]  ;;  %v11826_v51 = vld [vmem:[#allocation165_spill] sm:$0xff] }
 0x24c   : > { %v2289_v63 = vsel %vm1082_vm5, %v2286_v39, %v11815_v31  ;;  %v2360_v32 = vadd.f32 %v2292_v56, %v8679_v18  ;;  %v2294_v29 = vsel %vm1082_vm5, %v11817_v48, %v11816_v4  ;;  %v11819_v60 = vrot.slane %v11818_v5, 2  ;;  %v6593_v5 = vld [vmem:[#allocation3 + $0x40] sm:$0x3] }
 0x24d   : > { %v2359_v8 = vadd.f32 %v2289_v63, %v2111_v15  ;;  %v2361_v18 = vadd.f32 %v2294_v29, %v8681_v38  ;;  %v11820_v56 = vrot.slane %v8703_v28, 2  ;;  %v11821_v37 = vrot.slane %v8699_v14, 2 }
 0x24e   : > { %v2537_v55 = vsel %vm1331_vm6, %v2534_v25, %v11819_v60  ;;  %v2606_v15 = vadd.f32 %v2535_v26, %v2358_v6  ;;  %v11822_v16 = vrot.slane %v8562_v50, 2  ;;  %v3507_v47 = vrot.slane %v9404_v21, 2  ;;  %v937_v21 = vld [vmem:[#allocation2 + $0x1a0] sm:$0xff] }
 0x24f   : > { %v2540_v52 = vsel %vm1331_vm6, %v11821_v37, %v11820_v56  ;;  %v2607_v59 = vadd.f32 %v2537_v55, %v2359_v8  ;;  %v11823_v2 = vmov %v11820_v56  ;;  %v11825_v38 = vrot.slane %v11824_v44, 2 }
 0x250   : > { %v2542_v10 = vsel %vm1331_vm6, %v11823_v2, %v11822_v16  ;;  %v2608_v39 = vadd.f32 %v2540_v52, %v2360_v32  ;;  %v11827_v30 = vrot.slane %v11826_v51, 2  ;;  %v11829_v31 = vrot.slane %v11828_v61, 2  ;;  %v6594_v16 = vld [vmem:[#allocation3 + $0x58] sm:$0x3] }
 0x251   : > { %v2609_v25 = vadd.f32 %v2542_v10, %v2361_v18  ;;  %v11830_v63 = vmov %v11825_v38  ;;  %v2644_v28 = vmul.f32 %v8794_v58, %v2606_v15  ;;  %v2645_v6 = vmul.f32 %v8794_v58, %v2607_v59  ;;  %v9494_v37 = vld [vmem:[#allocation3 + $0x138] sm:$0xff]  ;;  %v9496_v52 = vld [vmem:[#allocation3 + $0x140] sm:$0xff]  ;;  %v9498_v15 = vld [vmem:[#allocation3 + $0x148] sm:$0x3] }
 0x252   : > { %v3454_v14 = vsel %vm1331_vm6, %v11827_v30, %v11825_v38  ;;  %v3456_v50 = vsel %vm1331_vm6, %v11830_v63, %v11829_v31  ;;  %v2646_v32 = vmul.f32 %v8794_v58, %v2608_v39  ;;  %v11831_v48 = vrot.slane %v8444_v19, 2  ;;  %v11835_v30 = vld [vmem:[#allocation90_spill] sm:$0xff]  ;;  %v11837_v61 = vld [vmem:[#allocation88_spill] sm:$0xff] }
 0x253   : > { %v9481_v8 = vpack.c.bf16 %v3456_v50, %v3454_v14  ;;  %v2647_v4 = vmul.f32 %v8794_v58, %v2609_v25  ;;  %v11832_v29 = vrot.slane %v8442_v33, 2  ;;  %v3460_v60 = vrot.slane %v6593_v5, 2  ;;  %v9524_v50 = vld [vmem:[%s11050_s7 + $0x1] ss:$0 sm:$0xff] }
 0x254   : > { %v11833_v55 = vrot.slane %v8530_v7, 2  ;;  %v11834_v18 = vrot.slane %v8528_v49, 2  ;;  %v2680_v58 = vadd.f32 %v8812_v20, %v2644_v28  ;;  %v2681_v33 = vadd.f32 %v8812_v20, %v2645_v6 }
 0x255   : > { %v3459_v26 = vsel %vm1331_vm6, %v11832_v29, %v11831_v48  ;;  %v2682_v59 = vadd.f32 %v8812_v20, %v2646_v32  ;;  %v3465_v2 = vrot.slane %v6594_v16, 2  ;;  %v3508_v10 = vrot.slane %v9406_v23, 2  ;;  %v6596_v16 = vld [vmem:[#allocation3 + $0x70] sm:$0x3] }
 0x256   : > { %v3464_v56 = vsel %vm1331_vm6, %v11834_v18, %v11833_v55  ;;  %v9506_v49 = vpack.c.bf16 %v9496_v52, %v9494_v37  ;;  %v2937_v39 = vrot.slane %v9494_v37, 1  ;;  %v2938_v25 = vrot.slane %v9496_v52, 1 }
 0x257   : > { %v2940_v44 = vrot.slane %v9498_v15, 1  ;;  %v2712_v38 = vmax.f32 %v2680_v58, 0.0  ;;  %v2713_v51 = vmax.f32 %v2681_v33, 0.0  ;;  %v11836_v14 = vrot.slane %v11835_v30, 2 }
 0x258   : > { %v11838_v20 = vrot.slane %v11837_v61, 2  ;;  %6224 = vmatmul.mubr.msk.bf16.gmra.mxu0 %vm305_vm2, %v9506_v49  ;;  %v2939_v63 = vsel %vm1082_vm5, %v2937_v39, %v2938_v25  ;;  %v2683_v28 = vadd.f32 %v9524_v50, %v2647_v4  ;;  %v2714_v6 = vmax.f32 %v2682_v59, 0.0 }
 0x259   : > { %v11839_v32 = vmov %v11831_v48  ;;  %v2941_v29 = vsel %vm1082_vm5, %v2938_v25, %v2940_v44  ;;  %2744 = vst.msk [vmem:[#allocation3 + $0x151] sm:$0xff] %vm305_vm2, %v2712_v38  ;;  %2745 = vst.msk [vmem:[#allocation3 + $0x159] sm:$0xff] %vm305_vm2, %v2713_v51  ;;  %v3466_v18 = vsel %vm1331_vm6, %v11833_v55, %v3465_v2  ;;  %v11840_v58 = vrot.slane %v8651_v11, 2 }
 0x25a   : > { %v9516_v31 = vsel %vm1331_vm6, %v11838_v20, %v11836_v14  ;;  %v3461_v48 = vsel %vm1331_vm6, %v11839_v32, %v3460_v60  ;;  %v11841_v4 = vrot.slane %v8649_v34, 2  ;;  %v9543_v33 = vpack.c.bf16 %v2941_v29, %v2939_v63  ;;  %2746 = vst.msk [vmem:[#allocation3 + $0x169] sm:$0xff] %vm305_vm2, %v2714_v6 }
 0x25b   : > { %v9533_v5 = vpack.c.bf16 %v3461_v48, %v3459_v26  ;;  %v2715_v60 = vmax.f32 %v2683_v28, 0.0  ;;  %v9546_v59 = vpack.c.bf16 %v3466_v18, %v3464_v56  ;;  %v3470_v26 = vrot.slane %v6596_v16, 2  ;;  %v11854_v18 = vld [vmem:[#allocation31_spill] sm:$0xff] }
 0x25c   : > { %v3469_v19 = vsel %vm1331_vm6, %v11841_v4, %v11840_v58  ;;  %v11842_v39 = vrot.slane %v8885_v40, 2  ;;  %v11843_v7 = vrot.slane %v8878_v46, 2  ;;  %v3475_v25 = vrot.slane %v8888_v3, 2  ;;  %6188 = vmatmul.mubr.msk.bf16.gmra.mxu1 %vm305_vm2, %v9543_v33  ;;  %v11856_v4 = vld [vmem:[#allocation30_spill] sm:$0xff]  ;;  %v11860_v16 = vld [vmem:[#allocation39_spill] sm:$0xff] }
 0x25d   : > { %v11844_v34 = vrot.slane %v8942_v27, 2  ;;  %v11845_v44 = vrot.slane %v8940_v53, 2  ;;  %v3480_v51 = vrot.slane %v8944_v24, 2  ;;  %2747 = vst.msk [vmem:[#allocation3 + $0x171] sm:$0xff] %vm305_vm2, %v2715_v60  ;;  %v11846_v56 = vmov %v11840_v58 }
 0x25e   : > { %v3474_v2 = vsel %vm1331_vm6, %v11843_v7, %v11842_v39  ;;  %v3471_v46 = vsel %vm1331_vm6, %v11846_v56, %v3470_v26  ;;  %v11847_v14 = vrot.slane %v9005_v1, 2  ;;  %v11848_v3 = vrot.slane %v9003_v62, 2  ;;  %v11865_v56 = vld [vmem:[#allocation43_spill] sm:$0xff] }
 0x25f   : > { %v3479_v38 = vsel %vm1331_vm6, %v11845_v44, %v11844_v34  ;;  %v3485_v53 = vrot.slane %v9007_v35, 2  ;;  %v11849_v20 = vrot.slane %v9101_v17, 2  ;;  %v11850_v24 = vrot.slane %v9099_v57, 2 }
 0x260   : > { %v3484_v61 = vsel %vm1331_vm6, %v11848_v3, %v11847_v14  ;;  %v9577_v28 = vpack.c.bf16 %v3471_v46, %v3469_v19  ;;  %v11851_v11 = vmov %v11842_v39  ;;  %v11852_v32 = vmov %v11844_v34  ;;  %v9613_v34 = vld [vmem:[#allocation3 + $0x160] sm:$0x3] }
 0x261   : > { %v3489_v63 = vsel %vm1331_vm6, %v11850_v24, %v11849_v20  ;;  %v3476_v6 = vsel %vm1331_vm6, %v11851_v11, %v3475_v25  ;;  %v3481_v62 = vsel %vm1331_vm6, %v11852_v32, %v3480_v51  ;;  %v3490_v48 = vrot.slane %v9103_v0, 2  ;;  %v9611_v25 = vld [vmem:[#allocation3 + $0x158] sm:$0xff] }
 0x262   : > { %v9586_v29 = vpack.c.bf16 %v3476_v6, %v3474_v2  ;;  %v9588_v35 = vpack.c.bf16 %v3481_v62, %v3479_v38  ;;  %v11853_v57 = vmov %v11847_v14  ;;  %v11855_v58 = vrot.slane %v11854_v18, 2  ;;  %v9609_v2 = vld [vmem:[#allocation3 + $0x150] sm:$0xff]  ;;  %v11864_v38 = vld [vmem:[#allocation41_spill] sm:$0xff] }
 0x263   : > { %v3486_v55 = vsel %vm1331_vm6, %v11853_v57, %v3485_v53  ;;  %v11857_v40 = vrot.slane %v11856_v4, 2  ;;  %v11859_v27 = vmov %v11849_v20  ;;  %v3495_v26 = vrot.slane %v11860_v16, 2  ;;  %v11866_v53 = vld [vmem:[#allocation87_spill] sm:$0xff] }
 0x264   : > { %v9598_v60 = vpack.c.bf16 %v3486_v55, %v3484_v61  ;;  %v3491_v0 = vsel %vm1331_vm6, %v11859_v27, %v3490_v48  ;;  %v11861_v39 = vrot.slane %v9253_v12, 2  ;;  %v11862_v1 = vrot.slane %v9251_v22, 2  ;;  %v9630_v61 = vld [vmem:[#allocation3 + $0x168] sm:$0xff]  ;;  %v9644_v62 = vld [vmem:[#allocation3 + $0x170] sm:$0xff]  ;;  %v9646_v48 = vld [vmem:[#allocation3 + $0x178] sm:$0x3] }
 0x265   : > { %v3494_v19 = vsel %vm1331_vm6, %v11857_v40, %v11855_v58  ;;  %v9615_v44 = vpack.c.bf16 %v3491_v0, %v3489_v63  ;;  %v3500_v17 = vrot.slane %v11864_v38, 2  ;;  %v3504_v51 = vsel %vm1331_vm6, %v3502_v54, %v3503_v9 }
 0x266   : > { %11858 = vst [vmem:[#allocation27_spill] sm:$0xff] %v9598_v60  ;;  %v3499_v7 = vsel %vm1331_vm6, %v11862_v1, %v11861_v39  ;;  %v3505_v22 = vrot.slane %v11865_v56, 2  ;;  %v9626_v46 = vpack.c.bf16 %v9611_v25, %v9609_v2  ;;  %v2942_v14 = vrot.slane %v9609_v2, 1  ;;  %v11873_v1 = vld [vmem:[#allocation170_spill] sm:$0xff]  ;;  %v938_v56 = vld [vmem:[#allocation2 + $0x1a8] sm:$0x3] }
 0x267   : > { %11863 = vst [vmem:[#allocation47_spill] sm:$0xff] %v9615_v44  ;;  %v2943_v3 = vrot.slane %v9611_v25, 1  ;;  %v11867_v20 = vrot.slane %v11866_v53, 2  ;;  %v11868_v24 = vrot.slane %v11835_v30, 2  ;;  %v3512_v54 = vrot.slane %v9494_v37, 2 }
 0x268   : > { %v3513_v63 = vrot.slane %v9496_v52, 2  ;;  %v2945_v11 = vrot.slane %v9613_v34, 1  ;;  %v2947_v6 = vrot.slane %v9630_v61, 1  ;;  %6227 = vmatprep.mubr.msk.bf16.mxu0 %vm305_vm2, %v9626_v46  ;;  %v11869_v30 = vmov %v11855_v58 }
 0x269   : > { %v3451_v42 = vsel %vm1331_vm6, %v11868_v24, %v11867_v20  ;;  %v2944_v32 = vsel %vm1082_vm5, %v2942_v14, %v2943_v3  ;;  %v3496_v57 = vsel %vm1331_vm6, %v11869_v30, %v3495_v26  ;;  %v11870_v37 = vmov %v11861_v39  ;;  %v936_v39 = vld [vmem:[#allocation2 + $0x198] sm:$0xff]  ;;  %v11875_v14 = vld [vmem:[#allocation24_spill] sm:$0xff]  ;;  %v11878_v24 = vld [vmem:[#allocation23_spill] sm:$0xff] }
 0x26a   : > { %v3501_v52 = vsel %vm1331_vm6, %v11870_v37, %v3500_v17  ;;  %v3506_v55 = vsel %vm1331_vm6, %v3503_v9, %v3505_v22  ;;  %v2946_v58 = vsel %vm1082_vm5, %v2943_v3, %v2945_v11  ;;  %v9660_v4 = vpack.c.bf16 %v9644_v62, %v9630_v61  ;;  %v11874_v22 = vld [vmem:[#allocation15_spill] sm:$0xff]  ;;  %v11877_v20 = vld [vmem:[#allocation26_spill] sm:$0xff]  ;;  %v6598_v37 = vld [vmem:[%s11045_s2 + $0x8] ss:$0 sm:$0xff] }
 0x26b   : > { %v2948_v40 = vrot.slane %v9644_v62, 1  ;;  %v3559_v18 = vpack.c.bf16 %v3451_v42, %v9516_v31  ;;  %v9664_v27 = vpack.c.bf16 %v2946_v58, %v2944_v32  ;;  %v2950_v12 = vrot.slane %v9646_v48, 1 }
 0x26c   : > { %v9667_v0 = vpack.c.bf16 %v3496_v57, %v3494_v19  ;;  %v9669_v16 = vpack.c.bf16 %v3501_v52, %v3499_v7  ;;  %6228 = vmatmul.mubr.msk.bf16.gmra.mxu0 %vm305_vm2, %v9660_v4  ;;  %v9674_v9 = vpack.c.bf16 %v3506_v55, %v3504_v51  ;;  %v3509_v31 = vsel %vm1331_vm6, %v3507_v47, %v3508_v10 }
 0x26d   : > { %v2949_v36 = vsel %vm1082_vm5, %v2947_v6, %v2948_v40  ;;  %v3510_v26 = vrot.slane %v9408_v45, 2  ;;  %6191 = vmatprep.mubr.msk.bf16.mxu1 %vm305_vm2, %v9664_v27  ;;  %v3522_v19 = vrot.slane %v9630_v61, 2  ;;  %6271 = vmatprep.mubr.msk.bf16.mxu0 %vm305_vm2, %v11873_v1  ;;  %v2951_v7 = vsel %vm1082_vm5, %v2948_v40, %v2950_v12 }
 0x26e   : > { %11871 = vst [vmem:[#allocation48_spill] sm:$0xff] %v9667_v0  ;;  %11872 = vst [vmem:[#allocation54_spill] sm:$0xff] %v9674_v9  ;;  %v3514_v38 = vsel %vm1331_vm6, %v3512_v54, %v3513_v63  ;;  %v3515_v17 = vrot.slane %v9498_v15, 2  ;;  %v3523_v47 = vrot.slane %v9644_v62, 2  ;;  %v9691_v51 = vpack.c.bf16 %v2951_v7, %v2949_v36  ;;  %v6201_v62 = vpop.f32.mrf.mxu0  ;;  %v11880_v36 = vld [vmem:[#allocation12_spill] sm:$0xff]  ;;  %v6165_v7 = vpop.f32.mrf.mxu1 }
 0x26f   : > { %v3511_v45 = vsel %vm1331_vm6, %v3508_v10, %v3510_v26  ;;  %v2042_v3 = vadd.f32 %v11875_v14, %v11874_v22  ;;  %v2043_v15 = vadd.f32 %v11878_v24, %v11877_v20  ;;  %v2082_v42 = vmul.f32 %v9033_v13, %v936_v39  ;;  %v6597_v10 = vld [vmem:[%s11045_s2 + $0x7] ss:$0 sm:$0xff] }
 0x270   : > { %v9698_v61 = vpack.c.bf16 %v3511_v45, %v3509_v31  ;;  %v3516_v53 = vsel %vm1331_vm6, %v3513_v63, %v3515_v17  ;;  %6192 = vmatmul.mubr.msk.bf16.gmra.mxu1 %vm305_vm2, %v9691_v51  ;;  %v2083_v23 = vmul.f32 %v9033_v13, %v937_v21  ;;  %v2169_v11 = vmul.f32 %v6597_v10, %v936_v39  ;;  %v6537_v13 = vld [vmem:[%s11046_s3 + $0x50] sm:$0xff]   ;;  %v11882_v45 = vld [vmem:[#allocation28_spill] sm:$0xff]  ;;  %v6535_v22 = vld [vmem:[%s11046_s3 + $0x40] sm:$0xff]   ;;  %v3099_v20 = vpop.f32.mrf.mxu1 }
 0x271   : > { %v9706_v54 = vpack.c.bf16 %v3516_v53, %v3514_v38  ;;  %6235 = vmatprep.mubr.msk.bf16.mxu1 %vm305_vm2, %v3559_v18  ;;  %v2114_v63 = vadd.f32 %v2082_v42, %v2042_v3  ;;  %v2170_v6 = vmul.f32 %v6597_v10, %v937_v21  ;;  %v2171_v32 = vmul.f32 %v6597_v10, %v938_v56  ;;  %v11881_v38 = vld [vmem:[#allocation19_spill] sm:$0xff]  ;;  %v9741_v42 = vld [vmem:[%s11046_s3 + $0x78] sm:$0xff]  }
 0x272   : > { %11876 = vst [vmem:[#allocation53_spill] sm:$0xff] %v9698_v61  ;;  %v2115_v30 = vadd.f32 %v2083_v23, %v2043_v15  ;;  %v2295_v57 = vrot.slane %v2169_v11, 1  ;;  %v2417_v52 = vmul.f32 %v6598_v37, %v936_v39  ;;  %v2418_v55 = vmul.f32 %v6598_v37, %v937_v21 }
 0x273   : > { %11879 = vst [vmem:[#allocation49_spill] sm:$0xff] %v9706_v54  ;;  %v2296_v58 = vrot.slane %v2170_v6, 1  ;;  %v2298_v40 = vrot.slane %v2171_v32, 1  ;;  %v2419_v12 = vmul.f32 %v6598_v37, %v938_v56  ;;  %v3524_v18 = vsel %vm1331_vm6, %v3522_v19, %v3523_v47  ;;  %v3320_v56 = vpop.f32.mrf.mxu0  ;;  %v6166_v6 = vpop.f32.mrf.mxu1  ;;  %v6600_v32 = vld [vmem:[%s11050_s7] ss:$0 sm:$0xff] }
 0x274   : > { %6272 = vmatmul.mubr.msk.bf16.vlgmr.msra.gmra.mxu0 %vm305_vm2, %v11880_v36  ;;  %v2543_v31 = vrot.slane %v2417_v52, 2  ;;  %v2544_v26 = vrot.slane %v2418_v55, 2  ;;  %v3525_v1 = vrot.slane %v9646_v48, 2  ;;  %v9728_v19 = vadd.f32 %v6201_v62, %v6165_v7  ;;  %v11884_v52 = vld [vmem:[#allocation25_spill] sm:$0xff] }
 0x275   : > { %6275 = vmatprep.mubr.msk.bf16.mxu0 %vm305_vm2, %v11881_v38  ;;  %v2297_v39 = vsel %vm1082_vm5, %v2295_v57, %v2296_v58  ;;  %v2299_v17 = vsel %vm1082_vm5, %v2296_v58, %v2298_v40  ;;  %v2546_v21 = vrot.slane %v2419_v12, 2  ;;  %6340 = vmatpush3.bf16.msra.mxu0 %v11882_v45  ;;  %v9743_v23 = vadd.f32 %v3320_v56, %v3099_v20  ;;  %v9758_v57 = vld [vmem:[%s11046_s3 + $0x68] sm:$0xff]  }
 0x276   : > { %v2362_v14 = vadd.f32 %v2297_v39, %v2114_v63  ;;  %v2363_v48 = vadd.f32 %v2299_v17, %v2115_v30  ;;  %v2545_v3 = vsel %vm1331_vm6, %v2543_v31, %v2544_v26  ;;  %v3526_v53 = vsel %vm1331_vm6, %v3523_v47, %v3525_v1  ;;  %6341 = vmatprep.subr.bf16.mxu0 %v6537_v13  ;;  %v6599_v47 = vld [vmem:[%s11046_s3 + $0x48] sm:$0xff]   ;;  %v6202_v63 = vpop.f32.mrf.mxu0 }
 0x277   : > { %v2547_v24 = vsel %vm1331_vm6, %v2544_v26, %v2546_v21  ;;  %v9736_v15 = vpack.c.bf16 %v3526_v53, %v3524_v18  ;;  %v9760_v37 = vadd.f32 %v6202_v63, %v6166_v6  ;;  %v11885_v40 = vld [vmem:[#allocation32_spill] sm:$0xff]  ;;  %v11886_v18 = vld [vmem:[#allocation18_spill] sm:$0xff] }
 0x278   : > { %6236 = vmatmul.mubr.msk.bf16.vlgmr.msra.gmra.mxu1 %vm305_vm2, %v9481_v8  ;;  %v2610_v10 = vadd.f32 %v2545_v3, %v2362_v14  ;;  %v2611_v11 = vadd.f32 %v2547_v24, %v2363_v48  ;;  %v9790_v17 = vpop.f32.mrf.mxu0  ;;  %v11888_v14 = vld [vmem:[#allocation21_spill] sm:$0xff]  ;;  %v9801_v3 = vpop.f32.mrf.mxu1  ;;  %v11889_v53 = vld [vmem:[#allocation38_spill] sm:$0xff] }
 0x279   : > { %11883 = vst [vmem:[#allocation50_spill] sm:$0xff] %v9736_v15  ;;  %6304 = vmatpush3.bf16.msra.mxu1 %v6599_v47  ;;  %6239 = vmatprep.mubr.msk.bf16.mxu1 %vm305_vm2, %v9533_v5 }
 0x27a   : > { %6305 = vmatprep.subr.bf16.mxu1 %v6535_v22  ;;  %v2648_v62 = vmul.f32 %v6600_v32, %v2610_v10  ;;  %v2649_v30 = vmul.f32 %v6600_v32, %v2611_v11  ;;  %6342 = vmatpush3.bf16.msra.mxu0 %v6537_v13  ;;  %v6205_v56 = vpop.f32.mrf.mxu0  ;;  %v6169_v24 = vpop.f32.mrf.mxu1 }
 0x27b   : > { %6411 = vmatprep.subr.bf16.mxu0 %v9741_v42  ;;  %v9805_v10 = vadd.f32 %v6205_v56, %v6169_v24 }
 0x27c   : > { %6276 = vmatmul.mubr.msk.bf16.gmra.mxu0 %vm305_vm2, %v11884_v52  ;;  %v2684_v55 = vadd.f32 %v9524_v50, %v2648_v62  ;;  %v2685_v58 = vadd.f32 %v9524_v50, %v2649_v30  ;;  %v11887_v50 = vld [vmem:[#allocation35_spill] sm:$0xff]  ;;  %v3336_v20 = vpop.f32.mrf.mxu0  ;;  %v3115_v11 = vpop.f32.mrf.mxu1  ;;  %v11890_v62 = vld [vmem:[#allocation40_spill] sm:$0xff]  ;;  %v11891_v30 = vld [vmem:[#allocation37_spill] sm:$0xff] }
 0x27d   : > { %6279 = vmatprep.mubr.msk.bf16.mxu0 %vm305_vm2, %v11885_v40  ;;  %6306 = vmatpush3.bf16.msra.mxu1 %v6535_v22  ;;  %v9811_v47 = vadd.f32 %v3336_v20, %v3115_v11  ;;  %v11896_v20 = vld [vmem:[#allocation17_spill] sm:$0xff] }
 0x27e   : > { %v2716_v13 = vmax.f32 %v2684_v55, 0.0  ;;  %v2717_v12 = vmax.f32 %v2685_v58, 0.0  ;;  %6375 = vmatprep.subr.bf16.mxu1 %v9758_v57  ;;  %v6206_v63 = vpop.f32.mrf.mxu0  ;;  %v6170_v6 = vpop.f32.mrf.mxu1  ;;  %v3517_v55 = vrot.slane %v9609_v2, 2  ;;  %v3518_v58 = vrot.slane %v9611_v25, 2 }
 0x27f   : > { %v9813_v32 = vadd.f32 %v6206_v63, %v6170_v6  ;;  %v11897_v63 = vld [vmem:[#allocation33_spill] sm:$0xff] }
 0x280   : > { %6240 = vmatmul.mubr.msk.bf16.gmra.mxu1 %vm305_vm2, %v9546_v59  ;;  %2748 = vst.msk [vmem:[#allocation3 + $0x181] sm:$0xff] %vm305_vm2, %v2716_v13  ;;  %2749 = vst.msk [vmem:[#allocation3 + $0x189] sm:$0xff] %vm305_vm2, %v2717_v12  ;;  %v3520_v13 = vrot.slane %v9613_v34, 2  ;;  %v3519_v12 = vsel %vm1331_vm6, %v3517_v55, %v3518_v58  ;;  %v11893_v34 = vld [vmem:[#allocation172_spill] sm:$0xff]  ;;  %v9874_v56 = vpop.f32.mrf.mxu0 }
 0x281   : > { %6243 = vmatprep.mubr.msk.bf16.mxu1 %vm305_vm2, %v9577_v28 }
 0x284   : > { %6280 = vmatmul.mubr.msk.bf16.gmra.mxu0 %vm305_vm2, %v11886_v18 }
 0x285   : > { %6283 = vmatprep.mubr.msk.bf16.mxu0 %vm305_vm2, %v11887_v50 }
 0x287   : > { %v9780_v31 = vld [vmem:[#allocation3 + $0x180] sm:$0xff]  ;;  %v9782_v26 = vld [vmem:[#allocation3 + $0x188] sm:$0xff]  ;;  %v9784_v1 = vld [vmem:[#allocation3 + $0x190] sm:$0x3] }
 0x288   : > { %6244 = vmatmul.mubr.msk.bf16.gmra.mxu1 %vm305_vm2, %v9586_v29  ;;  %v4050_v7 = vrot.slane %v9780_v31, 1  ;;  %v4051_v39 = vrot.slane %v9782_v26, 1  ;;  %v4053_v21 = vrot.slane %v9784_v1, 1  ;;  %v9848_v25 = vpack.c.bf16 %v9782_v26, %v9780_v31 }
 0x289   : > { %6247 = vmatprep.mubr.msk.bf16.mxu1 %vm305_vm2, %v9588_v35 }
 0x28a   : > { %v4052_v45 = vsel %vm1082_vm5, %v4050_v7, %v4051_v39  ;;  %v4054_v22 = vsel %vm1082_vm5, %v4051_v39, %v4053_v21  ;;  %v3521_v7 = vsel %vm1331_vm6, %v3518_v58, %v3520_v13  ;;  %v6541_v39 = vld [vmem:[%s11046_s3 + $0x70] sm:$0xff]   ;;  %v11894_v21 = vld [vmem:[#allocation11_spill] sm:$0xff] }
 0x28b   : > { %v9799_v48 = vpack.c.bf16 %v4054_v22, %v4052_v45  ;;  %v9840_v2 = vpack.c.bf16 %v3521_v7, %v3519_v12  ;;  %v11895_v45 = vld [vmem:[#allocation14_spill] sm:$0xff]  ;;  %v9883_v22 = vpop.f32.mrf.mxu1 }
 0x28c   : > { %6284 = vmatmul.mubr.msk.bf16.gmra.mxu0 %vm305_vm2, %v11888_v14 }
 0x28d   : > { %6287 = vmatprep.mubr.msk.bf16.mxu0 %vm305_vm2, %v11889_v53  ;;  %11892 = vst [vmem:[#allocation55_spill] sm:$0xff] %v9840_v2 }
 0x290   : > { %6248 = vmatmul.mubr.msk.bf16.gmra.mxu1 %vm305_vm2, %v9598_v60 }
 0x291   : > { %6251 = vmatprep.mubr.msk.bf16.mxu1 %vm305_vm2, %v9615_v44 }
 0x294   : > { %6288 = vmatmul.mubr.msk.bf16.gmra.mxu0 %vm305_vm2, %v11890_v62 }
 0x295   : > { %6291 = vmatprep.mubr.msk.bf16.mxu0 %vm305_vm2, %v11891_v30 }
 0x298   : > { %6252 = vmatmul.mubr.msk.bf16.gmra.mxu1 %vm305_vm2, %v9667_v0 }
 0x299   : > { %6255 = vmatprep.mubr.msk.bf16.mxu1 %vm305_vm2, %v9669_v16 }
 0x29c   : > { %6292 = vmatmul.mubr.msk.bf16.gmra.mxu0 %vm305_vm2, %v9416_v43 }
 0x29d   : > { %6295 = vmatprep.mubr.msk.bf16.mxu0 %vm305_vm2, %v9506_v49 }
 0x2a0   : > { %6256 = vmatmul.mubr.msk.bf16.gmra.mxu1 %vm305_vm2, %v9674_v9 }
 0x2a1   : > { %6259 = vmatprep.mubr.msk.bf16.mxu1 %vm305_vm2, %v9698_v61 }
 0x2a2   : > { %v6173_v11 = vpop.f32.mrf.mxu1 }
 0x2a4   : > { %6296 = vmatmul.mubr.msk.bf16.gmra.mxu0 %vm305_vm2, %v9626_v46  ;;  %v3131_v55 = vpop.f32.mrf.mxu1 }
 0x2a5   : > { %6299 = vmatprep.mubr.msk.bf16.mxu0 %vm305_vm2, %v9660_v4 }
 0x2a6   : > { %v6174_v12 = vpop.f32.mrf.mxu1 }
 0x2a8   : > { %6260 = vmatmul.mubr.msk.bf16.gmra.mxu1 %vm305_vm2, %v9706_v54 }
 0x2a9   : > { %6263 = vmatprep.mubr.msk.bf16.mxu1 %vm305_vm2, %v9840_v2 }
 0x2ac   : > { %6300 = vmatmul.mubr.msk.bf16.gmra.mxu0 %vm305_vm2, %v9848_v25 }
 0x2ad   : > { %6343 = vmatprep.mubr.msk.bf16.mxu0 %vm305_vm2, %v9481_v8  ;;  %v6539_v8 = vld [vmem:[%s11046_s3 + $0x60] sm:$0xff]  }
 0x2b0   : > { %6264 = vmatmul.mubr.msk.bf16.gmra.mxu1 %vm305_vm2, %v9736_v15 }
 0x2b1   : > { %6307 = vmatprep.mubr.msk.bf16.mxu1 %vm305_vm2, %v11893_v34  ;;  %v11901_v34 = vld [vmem:[#allocation34_spill] sm:$0xff] }
 0x2b4   : > { %6344 = vmatmul.mubr.msk.bf16.vlgmr.msra.gmra.mxu0 %vm305_vm2, %v9533_v5 }
 0x2b5   : > { %6347 = vmatprep.mubr.msk.bf16.mxu0 %vm305_vm2, %v9546_v59  ;;  %6412 = vmatpush3.bf16.msra.mxu0 %v9741_v42  ;;  %v9879_v42 = vld [vmem:[%s11046_s3 + $0x88] sm:$0xff]  }
 0x2b6   : > { %6413 = vmatprep.subr.bf16.mxu0 %v6541_v39 }
 0x2b8   : > { %6308 = vmatmul.mubr.msk.bf16.vlgmr.msra.gmra.mxu1 %vm305_vm2, %v11894_v21 }
 0x2b9   : > { %6376 = vmatpush3.bf16.msra.mxu1 %v9758_v57  ;;  %6311 = vmatprep.mubr.msk.bf16.mxu1 %vm305_vm2, %v11895_v45  ;;  %v6209_v57 = vpop.f32.mrf.mxu0 }
 0x2ba   : > { %6377 = vmatprep.subr.bf16.mxu1 %v6539_v8  ;;  %6414 = vmatpush3.bf16.msra.mxu0 %v6541_v39  ;;  %v9892_v6 = vadd.f32 %v6209_v57, %v6173_v11  ;;  %v11902_v39 = vld [vmem:[#allocation22_spill] sm:$0xff]  ;;  %v11904_v57 = vld [vmem:[#allocation16_spill] sm:$0xff]  ;;  %v9914_v11 = vpop.f32.mrf.mxu1 }
 0x2bb   : > { %v3352_v24 = vpop.f32.mrf.mxu0  ;;  %11905 = vst [vmem:[#allocation46_spill] sm:$0xff] %v9914_v11 }
 0x2bc   : > { %6348 = vmatmul.mubr.msk.bf16.gmra.mxu0 %vm305_vm2, %v9577_v28  ;;  %11898 = vst [vmem:[#allocation56_spill] sm:$0xff] %v9892_v6  ;;  %v9894_v58 = vadd.f32 %v3352_v24, %v3131_v55  ;;  %v11906_v55 = vld [vmem:[#allocation42_spill] sm:$0xff]  ;;  %v11908_v6 = vld [vmem:[#allocation36_spill] sm:$0xff] }
 0x2bd   : > { %6351 = vmatprep.mubr.msk.bf16.mxu0 %vm305_vm2, %v9586_v29  ;;  %6378 = vmatpush3.bf16.msra.mxu1 %v6539_v8  ;;  %v6210_v13 = vpop.f32.mrf.mxu0 }
 0x2be   : > { %6447 = vmatprep.subr.bf16.mxu1 %v9879_v42  ;;  %11899 = vst [vmem:[#allocation45_spill] sm:$0xff] %v9894_v58  ;;  %v9900_v7 = vadd.f32 %v6210_v13, %v6174_v12  ;;  %v6177_v12 = vpop.f32.mrf.mxu1  ;;  %v11907_v58 = vld [vmem:[#allocation29_spill] sm:$0xff] }
 0x2bf   : > { %v9908_v8 = vpop.f32.mrf.mxu0 }
 0x2c0   : > { %6312 = vmatmul.mubr.msk.bf16.gmra.mxu1 %vm305_vm2, %v11896_v20  ;;  %11900 = vst [vmem:[#allocation57_spill] sm:$0xff] %v9900_v7  ;;  %11903 = vst [vmem:[#allocation58_spill] sm:$0xff] %v9908_v8 }
 0x2c1   : > { %6315 = vmatprep.mubr.msk.bf16.mxu1 %vm305_vm2, %v11897_v63  ;;  %v6213_v24 = vpop.f32.mrf.mxu0 }
 0x2c2   : > { %v9922_v7 = vadd.f32 %v6213_v24, %v6177_v12  ;;  %v4272_v24 = vrot.slane %v9782_v26, 2 }
 0x2c3   : > { %v3368_v13 = vpop.f32.mrf.mxu0 }
 0x2c4   : > { %6352 = vmatmul.mubr.msk.bf16.gmra.mxu0 %vm305_vm2, %v9588_v35 }
 0x2c5   : > { %6355 = vmatprep.mubr.msk.bf16.mxu0 %vm305_vm2, %v9598_v60  ;;  %v6214_v11 = vpop.f32.mrf.mxu0 }
 0x2c7   : > { %v9951_v12 = vpop.f32.mrf.mxu0 }
 0x2c8   : > { %6316 = vmatmul.mubr.msk.bf16.gmra.mxu1 %vm305_vm2, %v11901_v34  ;;  %11910 = vst [vmem:[#allocation51_spill] sm:$0xff] %v9951_v12 }
 0x2c9   : > { %6319 = vmatprep.mubr.msk.bf16.mxu1 %vm305_vm2, %v11902_v39 }
 0x2cc   : > { %6356 = vmatmul.mubr.msk.bf16.gmra.mxu0 %vm305_vm2, %v9615_v44 }
 0x2cd   : > { %6359 = vmatprep.mubr.msk.bf16.mxu0 %vm305_vm2, %v9667_v0  ;;  %v3147_v0 = vpop.f32.mrf.mxu1 }
 0x2ce   : > { %v9924_v8 = vadd.f32 %v3368_v13, %v3147_v0  ;;  %v4271_v0 = vrot.slane %v9780_v31, 2  ;;  %v4274_v13 = vrot.slane %v9784_v1, 2 }
 0x2cf   : > { %v6178_v44 = vpop.f32.mrf.mxu1 }
 0x2d0   : > { %6320 = vmatmul.mubr.msk.bf16.gmra.mxu1 %vm305_vm2, %v11904_v57  ;;  %v9930_v60 = vadd.f32 %v6214_v11, %v6178_v44  ;;  %v4273_v44 = vsel %vm1331_vm6, %v4271_v0, %v4272_v24  ;;  %v4275_v11 = vsel %vm1331_vm6, %v4272_v24, %v4274_v13  ;;  %v9963_v0 = vld [vmem:[#allocation3 + $0x1a0] sm:$0xff] }
 0x2d1   : > { %6323 = vmatprep.mubr.msk.bf16.mxu1 %vm305_vm2, %v11906_v55  ;;  %v9955_v31 = vpack.c.bf16 %v4275_v11, %v4273_v44  ;;  %v9959_v1 = vpop.f32.mrf.mxu1  ;;  %v4931_v13 = vrot.slane %v9963_v0, 2 }
 0x2d2   : > { %11909 = vst [vmem:[#allocation52_spill] sm:$0xff] %v9930_v60  ;;  %11912 = vst [vmem:[#allocation64_spill] sm:$0xff] %v9959_v1 }
 0x2d3   : > { %11911 = vst [vmem:[#allocation44_spill] sm:$0xff] %v9955_v31 }
 0x2d4   : > { %6360 = vmatmul.mubr.msk.bf16.gmra.mxu0 %vm305_vm2, %v9669_v16 }
 0x2d5   : > { %6363 = vmatprep.mubr.msk.bf16.mxu0 %vm305_vm2, %v9674_v9 }
 0x2d8   : > { %6324 = vmatmul.mubr.msk.bf16.gmra.mxu1 %vm305_vm2, %v11907_v58  ;;  %v6217_v26 = vpop.f32.mrf.mxu0 }
 0x2d9   : > { %6327 = vmatprep.mubr.msk.bf16.mxu1 %vm305_vm2, %v11908_v6 }
 0x2da   : > { %v3384_v44 = vpop.f32.mrf.mxu0 }
 0x2dc   : > { %6364 = vmatmul.mubr.msk.bf16.gmra.mxu0 %vm305_vm2, %v9698_v61  ;;  %v6181_v11 = vpop.f32.mrf.mxu1  ;;  %v6218_v12 = vpop.f32.mrf.mxu0 }
 0x2dd   : > { %6367 = vmatprep.mubr.msk.bf16.mxu0 %vm305_vm2, %v9706_v54 }
 0x2de   : > { %v3163_v61 = vpop.f32.mrf.mxu1 }
 0x2df   : > { %v9981_v9 = vadd.f32 %v3384_v44, %v3163_v61  ;;  %v6543_v61 = vld [vmem:[%s11046_s3 + $0x80] sm:$0xff]  }
 0x2e0   : > { %6328 = vmatmul.mubr.msk.bf16.gmra.mxu1 %vm305_vm2, %v9429_v41  ;;  %v6182_v1 = vpop.f32.mrf.mxu1 }
 0x2e1   : > { %6331 = vmatprep.mubr.msk.bf16.mxu1 %vm305_vm2, %v9543_v33 }
 0x2e4   : > { %6368 = vmatmul.mubr.msk.bf16.gmra.mxu0 %vm305_vm2, %v9840_v2  ;;  %v9975_v2 = vadd.f32 %v6217_v26, %v6181_v11  ;;  %v9992_v26 = vadd.f32 %v6218_v12, %v6182_v1 }
 0x2e5   : > { %6371 = vmatprep.mubr.msk.bf16.mxu0 %vm305_vm2, %v9736_v15  ;;  %v9961_v15 = vld [vmem:[#allocation3 + $0x198] sm:$0xff] }
 0x2e6   : > { %v4930_v24 = vrot.slane %v9961_v15, 2  ;;  %v4492_v11 = vpack.c.bf16 %v9963_v0, %v9961_v15 }
 0x2e8   : > { %6332 = vmatmul.mubr.msk.bf16.gmra.mxu1 %vm305_vm2, %v9664_v27  ;;  %v9978_v54 = vsel %vm1331_vm6, %v4930_v24, %v4931_v13 }
 0x2e9   : > { %6335 = vmatprep.mubr.msk.bf16.mxu1 %vm305_vm2, %v9691_v51 }
 0x2ec   : > { %6372 = vmatmul.mubr.msk.bf16.gmra.mxu0 %vm305_vm2, %v9955_v31  ;;  %v9971_v31 = vld [vmem:[#allocation3 + $0x1a8] sm:$0x3] }
 0x2ed   : > { %6415 = vmatprep.mubr.msk.bf16.mxu0 %vm305_vm2, %v11894_v21  ;;  %v4933_v21 = vrot.slane %v9971_v31, 2 }
 0x2ef   : > { %v9984_v60 = vsel %vm1331_vm6, %v4931_v13, %v4933_v21 }
 0x2f0   : > { %6336 = vmatmul.mubr.msk.bf16.gmra.mxu1 %vm305_vm2, %v9799_v48 }
 0x2f1   : > { %6379 = vmatprep.mubr.msk.bf16.mxu1 %vm305_vm2, %v11880_v36  ;;  %v4937_v36 = vpack.c.bf16 %v9984_v60, %v9978_v54 }
 0x2f4   : > { %6416 = vmatmul.mubr.msk.bf16.vlgmr.msra.gmra.mxu0 %vm305_vm2, %v11895_v45  ;;  %v10008_v45 = vpop.f32.mrf.mxu0 }
 0x2f5   : > { %6419 = vmatprep.mubr.msk.bf16.mxu0 %vm305_vm2, %v11896_v20 }
 0x2f8   : > { %6380 = vmatmul.mubr.msk.bf16.vlgmr.msra.gmra.mxu1 %vm305_vm2, %v11881_v38  ;;  %v10012_v38 = vpop.f32.mrf.mxu1 }
 0x2f9   : > { %6448 = vmatpush3.bf16.msra.mxu1 %v9879_v42  ;;  %6383 = vmatprep.mubr.msk.bf16.mxu1 %vm305_vm2, %v11884_v52  ;;  %v6221_v52 = vpop.f32.mrf.mxu0 }
 0x2fa   : > { %6449 = vmatprep.subr.bf16.mxu1 %v6543_v61  ;;  %v6185_v20 = vpop.f32.mrf.mxu1 }
 0x2fb   : > { %v3400_v42 = vpop.f32.mrf.mxu0 }
 0x2fc   : > { %6420 = vmatmul.mubr.msk.bf16.gmra.mxu0 %vm305_vm2, %v11897_v63  ;;  %v3179_v63 = vpop.f32.mrf.mxu1 }
 0x2fd   : > { %6423 = vmatprep.mubr.msk.bf16.mxu0 %vm305_vm2, %v11901_v34  ;;  %6450 = vmatpush3.bf16.msra.mxu1 %v6543_v61  ;;  %v10024_v34 = vadd.f32 %v3400_v42, %v3179_v63 }
 0x2fe   : > { %v6186_v12 = vpop.f32.mrf.mxu1 }
 0x300   : > { %6384 = vmatmul.mubr.msk.bf16.gmra.mxu1 %vm305_vm2, %v11885_v40  ;;  %v10020_v40 = vadd.f32 %v6221_v52, %v6185_v20 }
 0x301   : > { %6387 = vmatprep.mubr.msk.bf16.mxu1 %vm305_vm2, %v11886_v18  ;;  %v6222_v18 = vpop.f32.mrf.mxu0 }
 0x304   : > { %6424 = vmatmul.mubr.msk.bf16.gmra.mxu0 %vm305_vm2, %v11902_v39  ;;  %v10028_v39 = vadd.f32 %v6222_v18, %v6186_v12 }
 0x305   : > { %6427 = vmatprep.mubr.msk.bf16.mxu0 %vm305_vm2, %v11904_v57  ;;  %v3403_v57 = vpop.f32.mrf.mxu0 }
 0x308   : > { %6388 = vmatmul.mubr.msk.bf16.gmra.mxu1 %vm305_vm2, %v11887_v50  ;;  %v3182_v50 = vpop.f32.mrf.mxu1 }
 0x309   : > { %6391 = vmatprep.mubr.msk.bf16.mxu1 %vm305_vm2, %v11888_v14  ;;  %v10032_v1 = vadd.f32 %v3403_v57, %v3182_v50 }
 0x30c   : > { %6428 = vmatmul.mubr.msk.bf16.gmra.mxu0 %vm305_vm2, %v11906_v55 }
 0x30d   : > { %6431 = vmatprep.mubr.msk.bf16.mxu0 %vm305_vm2, %v11907_v58 }
 0x310   : > { %6392 = vmatmul.mubr.msk.bf16.gmra.mxu1 %vm305_vm2, %v11889_v53 }
 0x311   : > { %6395 = vmatprep.mubr.msk.bf16.mxu1 %vm305_vm2, %v11890_v62  ;;  %v4710_v62 = vrot.slane %v9963_v0, 1 }
 0x314   : > { %6432 = vmatmul.mubr.msk.bf16.gmra.mxu0 %vm305_vm2, %v11908_v6 }
 0x315   : > { %6435 = vmatprep.mubr.msk.bf16.mxu0 %vm305_vm2, %v9429_v41  ;;  %v4709_v41 = vrot.slane %v9961_v15, 1 }
 0x318   : > { %6396 = vmatmul.mubr.msk.bf16.gmra.mxu1 %vm305_vm2, %v11891_v30  ;;  %v6225_v14 = vpop.f32.mrf.mxu0 }
 0x319   : > { %6399 = vmatprep.mubr.msk.bf16.mxu1 %vm305_vm2, %v9416_v43  ;;  %v4712_v43 = vrot.slane %v9971_v31, 1 }
 0x31a   : > { %v3416_v53 = vpop.f32.mrf.mxu0 }
 0x31b   : > { %v4713_v58 = vsel %vm1082_vm5, %v4710_v62, %v4712_v43 }
 0x31c   : > { %6436 = vmatmul.mubr.msk.bf16.gmra.mxu0 %vm305_vm2, %v9543_v33  ;;  %v6189_v30 = vpop.f32.mrf.mxu1  ;;  %v6226_v33 = vpop.f32.mrf.mxu0 }
 0x31d   : > { %6439 = vmatprep.mubr.msk.bf16.mxu0 %vm305_vm2, %v9664_v27  ;;  %v10057_v6 = vadd.f32 %v6225_v14, %v6189_v30 }
 0x31e   : > { %v3195_v27 = vpop.f32.mrf.mxu1  ;;  %v3419_v31 = vpop.f32.mrf.mxu0 }
 0x320   : > { %6400 = vmatmul.mubr.msk.bf16.gmra.mxu1 %vm305_vm2, %v9506_v49  ;;  %v10063_v49 = vadd.f32 %v3416_v53, %v3195_v27  ;;  %v6190_v55 = vpop.f32.mrf.mxu1  ;;  %v3324_v27 = vadd.f32 %v9790_v17, %v9801_v3 }
 0x321   : > { %6403 = vmatprep.mubr.msk.bf16.mxu1 %vm305_vm2, %v9626_v46  ;;  %v4711_v46 = vsel %vm1082_vm5, %v4709_v41, %v4710_v62  ;;  %v10067_v24 = vadd.f32 %v6226_v33, %v6190_v55 }
 0x322   : > { %v3198_v13 = vpop.f32.mrf.mxu1 }
 0x323   : > { %v10073_v44 = vadd.f32 %v3419_v31, %v3198_v13 }
 0x324   : > { %6440 = vmatmul.mubr.msk.bf16.gmra.mxu0 %vm305_vm2, %v9691_v51  ;;  %v4716_v51 = vpack.c.bf16 %v4713_v58, %v4711_v46 }
 0x325   : > { %6443 = vmatprep.mubr.msk.bf16.mxu0 %vm305_vm2, %v9799_v48 }
 0x328   : > { %6404 = vmatmul.mubr.msk.bf16.gmra.mxu1 %vm305_vm2, %v9660_v4 }
 0x329   : > { %6407 = vmatprep.mubr.msk.bf16.mxu1 %vm305_vm2, %v9848_v25 }
 0x32c   : > { %v6229_v48 = vpop.f32.mrf.mxu0  ;;  %6444 = vmatmul.mubr.msk.bf16.gmra.mxu0 %vm305_vm2, %v4716_v51 }
 0x32e   : > { %v3432_v21 = vpop.f32.mrf.mxu0 }
 0x330   : > { %v6193_v61 = vpop.f32.mrf.mxu1  ;;  %6408 = vmatmul.mubr.msk.bf16.gmra.mxu1 %vm305_vm2, %v4492_v11  ;;  %v6230_v52 = vpop.f32.mrf.mxu0 }
 0x331   : > { %v10079_v4 = vadd.f32 %v6229_v48, %v6193_v61  ;;  %6451 = vmatprep.mubr.msk.bf16.mxu1 %vm305_vm2, %v9533_v5  ;;  %v3340_v61 = vadd.f32 %v9874_v56, %v9883_v22 }
 0x332   : > { %v3211_v42 = vpop.f32.mrf.mxu1  ;;  %v3435_v25 = vpop.f32.mrf.mxu0 }
 0x333   : > { %v10083_v20 = vadd.f32 %v3432_v21, %v3211_v42 }
 0x334   : > { %v6194_v18 = vpop.f32.mrf.mxu1  ;;  %v6273_v63 = vpop.f32.mrf.mxu0 }
 0x335   : > { %v10085_v12 = vadd.f32 %v6230_v52, %v6194_v18 }
 0x336   : > { %v3214_v15 = vpop.f32.mrf.mxu1  ;;  %v3888_v0 = vpop.f32.mrf.mxu0 }
 0x337   : > { %v10087_v57 = vadd.f32 %v3435_v25, %v3214_v15  ;;  %v11914_v15 = vld [vmem:[#allocation56_spill] sm:$0xff] }
 0x338   : > { %v6237_v50 = vpop.f32.mrf.mxu1  ;;  %6452 = vmatmul.mubr.msk.bf16.vlgmr.msra.gmra.mxu1 %vm305_vm2, %v9546_v59  ;;  %v6274_v14 = vpop.f32.mrf.mxu0 }
 0x339   : > { %v3803_v53 = vadd.f32 %v6237_v50, %v9728_v19  ;;  %6455 = vmatprep.mubr.msk.bf16.mxu1 %vm305_vm2, %v9577_v28  ;;  %v11915_v50 = vld [vmem:[#allocation47_spill] sm:$0xff] }
 0x33a   : > { %v3674_v5 = vpop.f32.mrf.mxu1  ;;  %v3891_v41 = vpop.f32.mrf.mxu0 }
 0x33b   : > { %v3801_v62 = vadd.f32 %v3674_v5, %v9743_v23  ;;  %v10095_v43 = vadd.f32 %v6273_v63, %v3803_v53  ;;  %v11913_v63 = vld [vmem:[#allocation27_spill] sm:$0xff] }
 0x33c   : > { %v6238_v30 = vpop.f32.mrf.mxu1  ;;  %v6277_v33 = vpop.f32.mrf.mxu0 }
 0x33d   : > { %v3804_v46 = vadd.f32 %v6238_v30, %v9760_v37  ;;  %v10100_v59 = vadd.f32 %v3888_v0, %v3801_v62  ;;  %v11917_v30 = vld [vmem:[#allocation46_spill] sm:$0xff] }
 0x33e   : > { %v3677_v58 = vpop.f32.mrf.mxu1  ;;  %v3904_v19 = vpop.f32.mrf.mxu0 }
 0x33f   : > { %v3802_v55 = vadd.f32 %v3677_v58, %v3324_v27  ;;  %v10102_v31 = vadd.f32 %v6274_v14, %v3804_v46  ;;  %v11916_v14 = vld [vmem:[#allocation45_spill] sm:$0xff] }
 0x340   : > { %v6241_v28 = vpop.f32.mrf.mxu1  ;;  %6456 = vmatmul.mubr.msk.bf16.gmra.mxu1 %vm305_vm2, %v9586_v29  ;;  %v6278_v23 = vpop.f32.mrf.mxu0  ;;  %v11919_v46 = vld [vmem:[#allocation57_spill] sm:$0xff] }
 0x341   : > { %v3807_v13 = vadd.f32 %v6241_v28, %v9805_v10  ;;  %6459 = vmatprep.mubr.msk.bf16.mxu1 %vm305_vm2, %v9588_v35  ;;  %v10109_v17 = vadd.f32 %v3891_v41, %v3802_v55 }
 0x342   : > { %v3690_v37 = vpop.f32.mrf.mxu1  ;;  %v3907_v3 = vpop.f32.mrf.mxu0 }
 0x343   : > { %v3805_v51 = vadd.f32 %v3690_v37, %v9811_v47  ;;  %v10112_v48 = vadd.f32 %v6277_v33, %v3807_v13  ;;  %v11918_v33 = vld [vmem:[#allocation58_spill] sm:$0xff] }
 0x344   : > { %v6242_v11 = vpop.f32.mrf.mxu1  ;;  %v6281_v21 = vpop.f32.mrf.mxu0  ;;  %v3356_v27 = vadd.f32 %v11918_v33, %v11917_v30  ;;  %v11925_v30 = vld [vmem:[#allocation53_spill] sm:$0xff] }
 0x345   : > { %v3808_v29 = vadd.f32 %v6242_v11, %v9813_v32  ;;  %v10117_v52 = vadd.f32 %v3904_v19, %v3805_v51 }
 0x346   : > { %v3693_v10 = vpop.f32.mrf.mxu1  ;;  %v3920_v42 = vpop.f32.mrf.mxu0 }
 0x347   : > { %v3806_v35 = vadd.f32 %v3693_v10, %v3340_v61  ;;  %v10119_v25 = vadd.f32 %v6278_v23, %v3808_v29 }
 0x348   : > { %v6245_v18 = vpop.f32.mrf.mxu1  ;;  %6460 = vmatmul.mubr.msk.bf16.gmra.mxu1 %vm305_vm2, %v11913_v63  ;;  %v6282_v47 = vpop.f32.mrf.mxu0  ;;  %v11921_v63 = vld [vmem:[#allocation64_spill] sm:$0xff] }
 0x349   : > { %v3811_v0 = vadd.f32 %v6245_v18, %v11914_v15  ;;  %6463 = vmatprep.mubr.msk.bf16.mxu1 %vm305_vm2, %v11915_v50  ;;  %v10126_v56 = vadd.f32 %v3907_v3, %v3806_v35  ;;  %v11920_v3 = vld [vmem:[#allocation48_spill] sm:$0xff] }
 0x34a   : > { %v3706_v32 = vpop.f32.mrf.mxu1  ;;  %v3923_v22 = vpop.f32.mrf.mxu0 }
 0x34b   : > { %v3809_v53 = vadd.f32 %v3706_v32, %v11916_v14  ;;  %v10129_v5 = vadd.f32 %v6281_v21, %v3811_v0  ;;  %v11923_v0 = vld [vmem:[#allocation52_spill] sm:$0xff] }
 0x34c   : > { %v6246_v41 = vpop.f32.mrf.mxu1  ;;  %v6285_v62 = vpop.f32.mrf.mxu0 }
 0x34d   : > { %v3812_v58 = vadd.f32 %v6246_v41, %v11919_v46  ;;  %v10134_v19 = vadd.f32 %v3920_v42, %v3809_v53  ;;  %v11924_v41 = vld [vmem:[#allocation54_spill] sm:$0xff] }
 0x34e   : > { %v3709_v55 = vpop.f32.mrf.mxu1  ;;  %v3936_v28 = vpop.f32.mrf.mxu0 }
 0x34f   : > { %v3810_v23 = vadd.f32 %v3709_v55, %v3356_v27  ;;  %v10136_v13 = vadd.f32 %v6282_v47, %v3812_v58  ;;  %v11922_v47 = vld [vmem:[#allocation51_spill] sm:$0xff] }
 0x350   : > { %v6249_v37 = vpop.f32.mrf.mxu1  ;;  %6464 = vmatmul.mubr.msk.bf16.gmra.mxu1 %vm305_vm2, %v11920_v3  ;;  %v6286_v51 = vpop.f32.mrf.mxu0  ;;  %v3372_v15 = vadd.f32 %v11922_v47, %v11921_v63  ;;  %v11927_v63 = vld [vmem:[#allocation55_spill] sm:$0xff] }
 0x351   : > { %v3815_v11 = vadd.f32 %v6249_v37, %v9922_v7  ;;  %6467 = vmatprep.mubr.msk.bf16.mxu1 %vm305_vm2, %v9669_v16  ;;  %v10143_v21 = vadd.f32 %v3923_v22, %v3810_v23  ;;  %v3388_v37 = vadd.f32 %v10008_v45, %v10012_v38 }
 0x352   : > { %v3722_v61 = vpop.f32.mrf.mxu1  ;;  %v3939_v29 = vpop.f32.mrf.mxu0 }
 0x353   : > { %v3813_v10 = vadd.f32 %v3722_v61, %v9924_v8  ;;  %v10146_v42 = vadd.f32 %v6285_v62, %v3815_v11 }
 0x354   : > { %v6250_v35 = vpop.f32.mrf.mxu1  ;;  %v6289_v18 = vpop.f32.mrf.mxu0 }
 0x355   : > { %v3816_v50 = vadd.f32 %v6250_v35, %v11923_v0  ;;  %v10151_v32 = vadd.f32 %v3936_v28, %v3813_v10  ;;  %v11926_v35 = vld [vmem:[#allocation49_spill] sm:$0xff] }
 0x356   : > { %v3725_v7 = vpop.f32.mrf.mxu1  ;;  %v3952_v14 = vpop.f32.mrf.mxu0 }
 0x357   : > { %v3814_v16 = vadd.f32 %v3725_v7, %v3372_v15  ;;  %v10153_v22 = vadd.f32 %v6286_v51, %v3816_v50 }
 0x358   : > { %v6253_v53 = vpop.f32.mrf.mxu1  ;;  %6468 = vmatmul.mubr.msk.bf16.gmra.mxu1 %vm305_vm2, %v11924_v41  ;;  %v6290_v8 = vpop.f32.mrf.mxu0 }
 0x359   : > { %v3819_v62 = vadd.f32 %v6253_v53, %v9975_v2  ;;  %6471 = vmatprep.mubr.msk.bf16.mxu1 %vm305_vm2, %v11925_v30  ;;  %v10160_v33 = vadd.f32 %v3939_v29, %v3814_v16 }
 0x35a   : > { %v3738_v27 = vpop.f32.mrf.mxu1  ;;  %v3955_v46 = vpop.f32.mrf.mxu0 }
 0x35b   : > { %v3817_v58 = vadd.f32 %v3738_v27, %v9981_v9  ;;  %v10163_v55 = vadd.f32 %v6289_v18, %v3819_v62  ;;  %v11928_v62 = vld [vmem:[#allocation50_spill] sm:$0xff]  ;;  %v11929_v27 = vld [vmem:[#allocation44_spill] sm:$0xff] }
 0x35c   : > { %v6254_v28 = vpop.f32.mrf.mxu1  ;;  %v6293_v23 = vpop.f32.mrf.mxu0 }
 0x35d   : > { %v3820_v3 = vadd.f32 %v6254_v28, %v9992_v26  ;;  %v10168_v51 = vadd.f32 %v3952_v14, %v3817_v58 }
 0x35e   : > { %v3741_v2 = vpop.f32.mrf.mxu1  ;;  %v3968_v11 = vpop.f32.mrf.mxu0 }
 0x35f   : > { %v3818_v61 = vadd.f32 %v3741_v2, %v3388_v37  ;;  %v10170_v29 = vadd.f32 %v6290_v8, %v3820_v3 }
 0x360   : > { %v6257_v10 = vpop.f32.mrf.mxu1  ;;  %6472 = vmatmul.mubr.msk.bf16.gmra.mxu1 %vm305_vm2, %v11926_v35  ;;  %v6294_v9 = vpop.f32.mrf.mxu0 }
 0x361   : > { %v3823_v18 = vadd.f32 %v6257_v10, %v10020_v40  ;;  %6475 = vmatprep.mubr.msk.bf16.mxu1 %vm305_vm2, %v11927_v63  ;;  %v10177_v45 = vadd.f32 %v3955_v46, %v3818_v61 }
 0x362   : > { %v3754_v26 = vpop.f32.mrf.mxu1  ;;  %v3971_v38 = vpop.f32.mrf.mxu0 }
 0x363   : > { %v3821_v47 = vadd.f32 %v3754_v26, %v10024_v34  ;;  %v10180_v15 = vadd.f32 %v6293_v23, %v3823_v18 }
 0x364   : > { %v6258_v0 = vpop.f32.mrf.mxu1  ;;  %v6297_v50 = vpop.f32.mrf.mxu0 }
 0x365   : > { %v3824_v7 = vadd.f32 %v6258_v0, %v10028_v39  ;;  %v10183_v14 = vadd.f32 %v3968_v11, %v3821_v47 }
 0x366   : > { %v3757_v16 = vpop.f32.mrf.mxu1  ;;  %v3984_v53 = vpop.f32.mrf.mxu0 }
 0x367   : > { %v3822_v40 = vadd.f32 %v3757_v16, %v10032_v1  ;;  %v10186_v41 = vadd.f32 %v6294_v9, %v3824_v7 }
 0x368   : > { %v6261_v8 = vpop.f32.mrf.mxu1  ;;  %6476 = vmatmul.mubr.msk.bf16.gmra.mxu1 %vm305_vm2, %v11928_v62  ;;  %v6298_v30 = vpop.f32.mrf.mxu0 }
 0x369   : > { %v3827_v34 = vadd.f32 %v6261_v8, %v10057_v6  ;;  %6479 = vmatprep.mubr.msk.bf16.mxu1 %vm305_vm2, %v11929_v27  ;;  %v10193_v46 = vadd.f32 %v3971_v38, %v3822_v40 }
 0x36a   : > { %v3770_v39 = vpop.f32.mrf.mxu1  ;;  %v3987_v58 = vpop.f32.mrf.mxu0 }
 0x36b   : > { %v3825_v28 = vadd.f32 %v3770_v39, %v10063_v49  ;;  %v10196_v23 = vadd.f32 %v6297_v50, %v3827_v34 }
 0x36c   : > { %v6262_v1 = vpop.f32.mrf.mxu1  ;;  %v6301_v37 = vpop.f32.mrf.mxu0 }
 0x36d   : > { %v3828_v3 = vadd.f32 %v6262_v1, %v10067_v24  ;;  %v10199_v2 = vadd.f32 %v3984_v53, %v3825_v28 }
 0x36e   : > { %v3773_v11 = vpop.f32.mrf.mxu1  ;;  %v4000_v61 = vpop.f32.mrf.mxu0 }
 0x36f   : > { %v3826_v6 = vadd.f32 %v3773_v11, %v10073_v44  ;;  %v10202_v10 = vadd.f32 %v6298_v30, %v3828_v3 }
 0x370   : > { %v6265_v35 = vpop.f32.mrf.mxu1  ;;  %6480 = vmatmul.mubr.msk.bf16.gmra.mxu1 %vm305_vm2, %v4937_v36  ;;  %v6302_v49 = vpop.f32.mrf.mxu0 }
 0x371   : > { %v3831_v9 = vadd.f32 %v6265_v35, %v10079_v4  ;;  %v10209_v18 = vadd.f32 %v3987_v58, %v3826_v6 }
 0x372   : > { %v3786_v24 = vpop.f32.mrf.mxu1  ;;  %v4003_v63 = vpop.f32.mrf.mxu0 }
 0x373   : > { %v3829_v26 = vadd.f32 %v3786_v24, %v10083_v20  ;;  %v10212_v38 = vadd.f32 %v6301_v37, %v3831_v9 }
 0x374   : > { %v6266_v44 = vpop.f32.mrf.mxu1  ;;  %v6345_v47 = vpop.f32.mrf.mxu0 }
 0x375   : > { %v3832_v0 = vadd.f32 %v6266_v44, %v10085_v12  ;;  %v10215_v50 = vadd.f32 %v4000_v61, %v3829_v26 }
 0x376   : > { %v3789_v60 = vpop.f32.mrf.mxu1  ;;  %v4333_v54 = vpop.f32.mrf.mxu0 }
 0x377   : > { %v3830_v36 = vadd.f32 %v3789_v60, %v10087_v57  ;;  %v10218_v7 = vadd.f32 %v6302_v49, %v3832_v0 }
 0x378   : > { %v6309_v4 = vpop.f32.mrf.mxu1  ;;  %v6346_v16 = vpop.f32.mrf.mxu0 }
 0x379   : > { %v4241_v53 = vadd.f32 %v6309_v4, %v10095_v43  ;;  %v10221_v40 = vadd.f32 %v4003_v63, %v3830_v36 }
 0x37a   : > { %v4112_v20 = vpop.f32.mrf.mxu1  ;;  %v10223_v8 = vpop.f32.mrf.mxu0 }
 0x37b   : > { %v4239_v62 = vadd.f32 %v4112_v20, %v10100_v59  ;;  %v10226_v12 = vadd.f32 %v6345_v47, %v4241_v53 }
 0x37c   : > { %v6310_v30 = vpop.f32.mrf.mxu1  ;;  %v6349_v34 = vpop.f32.mrf.mxu0 }
 0x37d   : > { %v4242_v27 = vadd.f32 %v6310_v30, %v10102_v31  ;;  %v10229_v57 = vadd.f32 %v4333_v54, %v4239_v62 }
 0x37e   : > { %v4115_v39 = vpop.f32.mrf.mxu1  ;;  %v10231_v58 = vpop.f32.mrf.mxu0 }
 0x37f   : > { %v10234_v43 = vadd.f32 %v4115_v39, %v10109_v17  ;;  %v10236_v28 = vadd.f32 %v6346_v16, %v4242_v27 }
 0x380   : > { %v6313_v1 = vpop.f32.mrf.mxu1  ;;  %v6350_v37 = vpop.f32.mrf.mxu0 }
 0x381   : > { %v4245_v59 = vadd.f32 %v6313_v1, %v10112_v48 }
 0x382   : > { %v4128_v3 = vpop.f32.mrf.mxu1  ;;  %v10239_v11 = vpop.f32.mrf.mxu0 }
 0x383   : > { %v10242_v61 = vadd.f32 %v4128_v3, %v10117_v52  ;;  %v10244_v31 = vadd.f32 %v6349_v34, %v4245_v59 }
 0x384   : > { %v6314_v6 = vpop.f32.mrf.mxu1  ;;  %v6353_v35 = vpop.f32.mrf.mxu0 }
 0x385   : > { %v4246_v49 = vadd.f32 %v6314_v6, %v10119_v25 }
 0x386   : > { %v4131_v17 = vpop.f32.mrf.mxu1  ;;  %v10247_v9 = vpop.f32.mrf.mxu0 }
 0x387   : > { %v10250_v24 = vadd.f32 %v4131_v17, %v10126_v56  ;;  %v10252_v63 = vadd.f32 %v6350_v37, %v4246_v49 }
 0x388   : > { %v6317_v48 = vpop.f32.mrf.mxu1  ;;  %v6354_v26 = vpop.f32.mrf.mxu0 }
 0x389   : > { %v4249_v44 = vadd.f32 %v6317_v48, %v10129_v5 }
 0x38a   : > { %v4144_v52 = vpop.f32.mrf.mxu1  ;;  %v10255_v47 = vpop.f32.mrf.mxu0 }
 0x38b   : > { %v10258_v0 = vadd.f32 %v4144_v52, %v10134_v19  ;;  %v10260_v60 = vadd.f32 %v6353_v35, %v4249_v44 }
 0x38c   : > { %v6318_v25 = vpop.f32.mrf.mxu1  ;;  %v6357_v54 = vpop.f32.mrf.mxu0 }
 0x38d   : > { %v4250_v36 = vadd.f32 %v6318_v25, %v10136_v13 }
 0x38e   : > { %v4147_v56 = vpop.f32.mrf.mxu1  ;;  %v10263_v4 = vpop.f32.mrf.mxu0 }
 0x38f   : > { %v10266_v16 = vadd.f32 %v4147_v56, %v10143_v21  ;;  %v10268_v53 = vadd.f32 %v6354_v26, %v4250_v36 }
 0x390   : > { %v6321_v5 = vpop.f32.mrf.mxu1  ;;  %v6358_v20 = vpop.f32.mrf.mxu0 }
 0x391   : > { %v4253_v62 = vadd.f32 %v6321_v5, %v10146_v42 }
 0x392   : > { %v4160_v19 = vpop.f32.mrf.mxu1  ;;  %v10271_v30 = vpop.f32.mrf.mxu0 }
 0x393   : > { %v10274_v34 = vadd.f32 %v4160_v19, %v10151_v32  ;;  %v10276_v27 = vadd.f32 %v6357_v54, %v4253_v62 }
 0x394   : > { %v6322_v13 = vpop.f32.mrf.mxu1  ;;  %v6361_v39 = vpop.f32.mrf.mxu0 }
 0x395   : > { %v4254_v1 = vadd.f32 %v6322_v13, %v10153_v22 }
 0x396   : > { %v4163_v21 = vpop.f32.mrf.mxu1  ;;  %v10279_v37 = vpop.f32.mrf.mxu0 }
 0x397   : > { %v10282_v59 = vadd.f32 %v4163_v21, %v10160_v33  ;;  %v10284_v3 = vadd.f32 %v6358_v20, %v4254_v1 }
 0x398   : > { %v6325_v42 = vpop.f32.mrf.mxu1  ;;  %v6362_v6 = vpop.f32.mrf.mxu0 }
 0x399   : > { %v4257_v35 = vadd.f32 %v6325_v42, %v10163_v55 }
 0x39a   : > { %v4176_v32 = vpop.f32.mrf.mxu1  ;;  %v10287_v49 = vpop.f32.mrf.mxu0 }
 0x39b   : > { %v10290_v17 = vadd.f32 %v4176_v32, %v10168_v51  ;;  %v10292_v48 = vadd.f32 %v6361_v39, %v4257_v35 }
 0x39c   : > { %v6326_v22 = vpop.f32.mrf.mxu1  ;;  %v6365_v26 = vpop.f32.mrf.mxu0 }
 0x39d   : > { %v4258_v44 = vadd.f32 %v6326_v22, %v10170_v29 }
 0x39e   : > { %v4179_v33 = vpop.f32.mrf.mxu1  ;;  %v10295_v52 = vpop.f32.mrf.mxu0 }
 0x39f   : > { %11930 = vst [vmem:[#allocation65_spill] sm:$0xff] %v10295_v52  ;;  %v10298_v25 = vadd.f32 %v4179_v33, %v10177_v45  ;;  %v10300_v54 = vadd.f32 %v6362_v6, %v4258_v44 }
 0x3a0   : > { %v6329_v55 = vpop.f32.mrf.mxu1  ;;  %v6366_v36 = vpop.f32.mrf.mxu0 }
 0x3a1   : > { %v4261_v56 = vadd.f32 %v6329_v55, %v10180_v15 }
 0x3a2   : > { %v4192_v51 = vpop.f32.mrf.mxu1  ;;  %v10303_v5 = vpop.f32.mrf.mxu0 }
 0x3a3   : > { %11931 = vst [vmem:[#allocation62_spill] sm:$0xff] %v10303_v5  ;;  %v10306_v20 = vadd.f32 %v4192_v51, %v10183_v14  ;;  %v10308_v62 = vadd.f32 %v6365_v26, %v4261_v56 }
 0x3a4   : > { %v6330_v29 = vpop.f32.mrf.mxu1  ;;  %v6369_v19 = vpop.f32.mrf.mxu0 }
 0x3a5   : > { %11932 = vst [vmem:[#allocation63_spill] sm:$0xff] %v10306_v20  ;;  %v4262_v13 = vadd.f32 %v6330_v29, %v10186_v41 }
 0x3a6   : > { %v4195_v45 = vpop.f32.mrf.mxu1  ;;  %v10311_v39 = vpop.f32.mrf.mxu0 }
 0x3a7   : > { %11933 = vst [vmem:[#allocation60_spill] sm:$0xff] %v10311_v39  ;;  %v10314_v1 = vadd.f32 %v4195_v45, %v10193_v46  ;;  %v10316_v21 = vadd.f32 %v6366_v36, %v4262_v13 }
 0x3a8   : > { %v6333_v15 = vpop.f32.mrf.mxu1  ;;  %v6370_v42 = vpop.f32.mrf.mxu0 }
 0x3a9   : > { %11934 = vst [vmem:[#allocation71_spill] sm:$0xff] %v10314_v1  ;;  %v4265_v6 = vadd.f32 %v6333_v15, %v10196_v23 }
 0x3aa   : > { %v4208_v14 = vpop.f32.mrf.mxu1  ;;  %v10319_v35 = vpop.f32.mrf.mxu0 }
 0x3ab   : > { %11935 = vst [vmem:[#allocation70_spill] sm:$0xff] %v10319_v35  ;;  %v10322_v32 = vadd.f32 %v4208_v14, %v10199_v2  ;;  %v10324_v22 = vadd.f32 %v6369_v19, %v4265_v6 }
 0x3ac   : > { %v6334_v41 = vpop.f32.mrf.mxu1  ;;  %v6373_v26 = vpop.f32.mrf.mxu0 }
 0x3ad   : > { %11936 = vst [vmem:[#allocation61_spill] sm:$0xff] %v10322_v32  ;;  %v4266_v44 = vadd.f32 %v6334_v41, %v10202_v10 }
 0x3ae   : > { %v4211_v46 = vpop.f32.mrf.mxu1  ;;  %v10327_v33 = vpop.f32.mrf.mxu0 }
 0x3af   : > { %11937 = vst [vmem:[#allocation68_spill] sm:$0xff] %v10327_v33  ;;  %v10330_v55 = vadd.f32 %v4211_v46, %v10209_v18  ;;  %v10332_v36 = vadd.f32 %v6370_v42, %v4266_v44 }
 0x3b0   : > { %v6337_v23 = vpop.f32.mrf.mxu1  ;;  %v6374_v56 = vpop.f32.mrf.mxu0 }
 0x3b1   : > { %11938 = vst [vmem:[#allocation69_spill] sm:$0xff] %v10330_v55  ;;  %v4269_v51 = vadd.f32 %v6337_v23, %v10212_v38 }
 0x3b2   : > { %v4224_v2 = vpop.f32.mrf.mxu1  ;;  %v10338_v19 = vpop.f32.mrf.mxu0 }
 0x3b3   : > { %v10336_v29 = vadd.f32 %v4224_v2, %v10215_v50  ;;  %11940 = vst [vmem:[#allocation66_spill] sm:$0xff] %v10338_v19  ;;  %v10340_v13 = vadd.f32 %v6373_v26, %v4269_v51 }
 0x3b4   : > { %v6338_v10 = vpop.f32.mrf.mxu1  ;;  %v10343_v18 = vpop.f32.mrf.mxu0 }
 0x3b5   : > { %11939 = vst [vmem:[#allocation67_spill] sm:$0xff] %v10336_v29  ;;  %v4270_v45 = vadd.f32 %v6338_v10, %v10218_v7 }
 0x3b6   : > { %v4227_v15 = vpop.f32.mrf.mxu1  ;;  %v10353_v41 = vpop.f32.mrf.mxu0 }
 0x3b7   : > { %v10346_v42 = vadd.f32 %v4227_v15, %v10221_v40  ;;  %v10348_v6 = vadd.f32 %v6374_v56, %v4270_v45 }
 0x3b8   : > { %v6381_v38 = vpop.f32.mrf.mxu1  ;;  %v10361_v23 = vpop.f32.mrf.mxu0 }
 0x3b9   : > { %11941 = vst [vmem:[#allocation59_spill] sm:$0xff] %v10346_v42  ;;  %v10351_v14 = vadd.f32 %v6381_v38, %v10226_v12 }
 0x3ba   : > { %v4547_v50 = vpop.f32.mrf.mxu1  ;;  %v10368_v12 = vpop.f32.mrf.mxu0 }
 0x3bb   : > { %v10356_v26 = vadd.f32 %v4547_v50, %v10229_v57 }
 0x3bc   : > { %v6382_v44 = vpop.f32.mrf.mxu1  ;;  %v10375_v45 = vpop.f32.mrf.mxu0 }
 0x3bd   : > { %v10359_v7 = vadd.f32 %v6382_v44, %v10236_v28 }
 0x3be   : > { %v4550_v46 = vpop.f32.mrf.mxu1 }
 0x3c0   : > { %v6385_v40 = vpop.f32.mrf.mxu1 }
 0x3c1   : > { %v10364_v56 = vadd.f32 %v6385_v40, %v10244_v31  ;;  %v10382_v31 = vpop.f32.mrf.mxu0 }
 0x3c2   : > { %v10366_v51 = vpop.f32.mrf.mxu1 }
 0x3c4   : > { %v6386_v2 = vpop.f32.mrf.mxu1 }
 0x3c5   : > { %v10371_v10 = vadd.f32 %v6386_v2, %v10252_v63  ;;  %v10389_v63 = vpop.f32.mrf.mxu0 }
 0x3c6   : > { %v10373_v57 = vpop.f32.mrf.mxu1 }
 0x3c8   : > { %v6389_v28 = vpop.f32.mrf.mxu1 }
 0x3c9   : > { %v10378_v15 = vadd.f32 %v6389_v28, %v10260_v60  ;;  %v10396_v60 = vpop.f32.mrf.mxu0 }
 0x3ca   : > { %v10380_v38 = vpop.f32.mrf.mxu1 }
 0x3cc   : > { %v6390_v50 = vpop.f32.mrf.mxu1 }
 0x3cd   : > { %v10385_v44 = vadd.f32 %v6390_v50, %v10268_v53  ;;  %v10403_v53 = vpop.f32.mrf.mxu0 }
 0x3ce   : > { %v10387_v40 = vpop.f32.mrf.mxu1 }
 0x3d0   : > { %v6393_v2 = vpop.f32.mrf.mxu1 }
 0x3d1   : > { %v10392_v19 = vadd.f32 %v6393_v2, %v10276_v27  ;;  %v10410_v27 = vpop.f32.mrf.mxu0 }
 0x3d2   : > { %v10394_v42 = vpop.f32.mrf.mxu1 }
 0x3d4   : > { %v6394_v28 = vpop.f32.mrf.mxu1 }
 0x3d5   : > { %v10399_v33 = vadd.f32 %v6394_v28, %v10284_v3  ;;  %v10417_v3 = vpop.f32.mrf.mxu0 }
 0x3d6   : > { %v10401_v29 = vpop.f32.mrf.mxu1 }
 0x3d8   : > { %v6397_v50 = vpop.f32.mrf.mxu1 }
 0x3d9   : > { %v10406_v35 = vadd.f32 %v6397_v50, %v10292_v48  ;;  %v10424_v48 = vpop.f32.mrf.mxu0 }
 0x3da   : > { %v10408_v55 = vpop.f32.mrf.mxu1 }
 0x3db   : > { %11942 = vst [vmem:[#allocation73_spill] sm:$0xff] %v10406_v35 }
 0x3dc   : > { %v6398_v2 = vpop.f32.mrf.mxu1 }
 0x3dd   : > { %v10413_v39 = vadd.f32 %v6398_v2, %v10300_v54  ;;  %v10431_v54 = vpop.f32.mrf.mxu0 }
 0x3de   : > { %v10415_v32 = vpop.f32.mrf.mxu1 }
 0x3df   : > { %11943 = vst [vmem:[#allocation74_spill] sm:$0xff] %v10413_v39 }
 0x3e0   : > { %v6401_v28 = vpop.f32.mrf.mxu1 }
 0x3e1   : > { %v10420_v5 = vadd.f32 %v6401_v28, %v10308_v62  ;;  %v10438_v62 = vpop.f32.mrf.mxu0 }
 0x3e2   : > { %v10422_v1 = vpop.f32.mrf.mxu1 }
 0x3e3   : > { %11944 = vst [vmem:[#allocation80_spill] sm:$0xff] %v10420_v5  ;;  %11945 = vst [vmem:[#allocation81_spill] sm:$0xff] %v10422_v1 }
 0x3e4   : > { %v6402_v50 = vpop.f32.mrf.mxu1 }
 0x3e5   : > { %v10427_v52 = vadd.f32 %v6402_v50, %v10316_v21  ;;  %v10445_v21 = vpop.f32.mrf.mxu0 }
 0x3e6   : > { %v10429_v20 = vpop.f32.mrf.mxu1 }
 0x3e7   : > { %11946 = vst [vmem:[#allocation79_spill] sm:$0xff] %v10427_v52  ;;  %11947 = vst [vmem:[#allocation82_spill] sm:$0xff] %v10429_v20 }
 0x3e8   : > { %v6405_v2 = vpop.f32.mrf.mxu1 }
 0x3e9   : > { %v10434_v39 = vadd.f32 %v6405_v2, %v10324_v22  ;;  %v10452_v22 = vpop.f32.mrf.mxu0 }
 0x3ea   : > { %v10436_v35 = vpop.f32.mrf.mxu1 }
 0x3eb   : > { %11948 = vst [vmem:[#allocation75_spill] sm:$0xff] %v10434_v39  ;;  %11949 = vst [vmem:[#allocation76_spill] sm:$0xff] %v10436_v35 }
 0x3ec   : > { %v6406_v28 = vpop.f32.mrf.mxu1 }
 0x3ed   : > { %v10441_v5 = vadd.f32 %v6406_v28, %v10332_v36  ;;  %v4461_v36 = vadd.f32 %v10223_v8, %v10234_v43  ;;  %v10461_v28 = vpop.f32.mrf.mxu0  ;;  %v4901_v8 = vadd.f32 %v10361_v23, %v10359_v7  ;;  %v10476_v43 = vld [vmem:[%s11050_s7 + $0x2] ss:$0 sm:$0xff] }
 0x3ee   : > { %v10443_v1 = vpop.f32.mrf.mxu1 }
 0x3ef   : > { %11950 = vst [vmem:[#allocation78_spill] sm:$0xff] %v10441_v5  ;;  %11951 = vst [vmem:[#allocation77_spill] sm:$0xff] %v10443_v1  ;;  %v4675_v1 = vadd.f32 %v4550_v46, %v4461_v36  ;;  %v10489_v46 = vld [vmem:[%s11050_s7 + $0x3] ss:$0 sm:$0xff]  ;;  %v4468_v36 = vadd.f32 %v10247_v9, %v10258_v0 }
 0x3f0   : > { %v6409_v50 = vpop.f32.mrf.mxu1 }
 0x3f1   : > { %v10448_v52 = vadd.f32 %v6409_v50, %v10340_v13  ;;  %v4900_v13 = vadd.f32 %v10343_v18, %v10351_v14  ;;  %v4898_v50 = vadd.f32 %v10353_v41, %v10356_v26 }
 0x3f2   : > { %v10450_v20 = vpop.f32.mrf.mxu1 }
 0x3f3   : > { %11952 = vst [vmem:[#allocation72_spill] sm:$0xff] %v10448_v52 }
 0x3f4   : > { %v6410_v2 = vpop.f32.mrf.mxu1 }
 0x3f5   : > { %v10455_v39 = vadd.f32 %v6410_v2, %v10348_v6  ;;  %v4464_v6 = vadd.f32 %v10231_v58, %v10242_v61  ;;  %v10469_v2 = vpop.f32.mrf.mxu0  ;;  %v4899_v58 = vadd.f32 %v10368_v12, %v4675_v1  ;;  %v4465_v61 = vadd.f32 %v10239_v11, %v10250_v24 }
 0x3f6   : > { %v10457_v35 = vpop.f32.mrf.mxu1  ;;  %v4904_v24 = vadd.f32 %v10375_v45, %v10364_v56  ;;  %v4682_v56 = vadd.f32 %v10380_v38, %v4468_v36  ;;  %v4472_v36 = vadd.f32 %v10263_v4, %v10274_v34 }
 0x3f7   : > { %11953 = vst [vmem:[#allocation95_spill] sm:$0xff] %v10455_v39  ;;  %11954 = vst [vmem:[#allocation85_spill] sm:$0xff] %v10457_v35  ;;  %v4678_v14 = vadd.f32 %v10366_v51, %v4464_v6  ;;  %v4679_v51 = vadd.f32 %v10373_v57, %v4465_v61  ;;  %v4905_v57 = vadd.f32 %v10389_v63, %v10371_v10 }
 0x3f8   : > { %v6453_v5 = vpop.f32.mrf.mxu1  ;;  %v4686_v4 = vadd.f32 %v10394_v42, %v4472_v36 }
 0x3f9   : > { %v5121_v39 = vadd.f32 %v6453_v5, %v4900_v13  ;;  %v10483_v5 = vpop.f32.mrf.mxu0  ;;  %v4903_v0 = vadd.f32 %v10396_v60, %v4679_v51 }
 0x3fa   : > { %v4992_v52 = vpop.f32.mrf.mxu1 }
 0x3fb   : > { %v5119_v35 = vadd.f32 %v4992_v52, %v4898_v50  ;;  %v5158_v7 = vmul.f32 %v10476_v43, %v5121_v39  ;;  %v4902_v39 = vadd.f32 %v10382_v31, %v4678_v14  ;;  %v10504_v50 = vpop.f32.mrf.mxu0 }
 0x3fc   : > { %v6454_v18 = vpop.f32.mrf.mxu1 }
 0x3fd   : > { %v5156_v41 = vmul.f32 %v10476_v43, %v5119_v35  ;;  %v5122_v26 = vadd.f32 %v6454_v18, %v4901_v8  ;;  %v10507_v6 = vadd.f32 %v10489_v46, %v5158_v7  ;;  %v10524_v61 = vpop.f32.mrf.mxu0 }
 0x3fe   : > { %v4995_v52 = vpop.f32.mrf.mxu1 }
 0x3ff   : > { %v5120_v23 = vadd.f32 %v4995_v52, %v4899_v58  ;;  %v10493_v35 = vadd.f32 %v10489_v46, %v5156_v41  ;;  %v5159_v12 = vmul.f32 %v10476_v43, %v5122_v26  ;;  %v4469_v26 = vadd.f32 %v10255_v47, %v10266_v16 }
 0x400   : > { %v6457_v1 = vpop.f32.mrf.mxu1  ;;  %v5228_v52 = vsel %vm305_vm2, %v10507_v6, 0.0 }
 0x401   : > { %v5157_v11 = vmul.f32 %v10476_v43, %v5120_v23  ;;  %v5125_v18 = vadd.f32 %v6457_v1, %v4904_v24  ;;  %v5225_v45 = vsel %vm305_vm2, %v10493_v35, 0.0  ;;  %v10517_v10 = vadd.f32 %v10489_v46, %v5159_v12 }
 0x402   : > { %v5008_v13 = vpop.f32.mrf.mxu1  ;;  %v4683_v51 = vadd.f32 %v10387_v40, %v4469_v26  ;;  %v4908_v12 = vadd.f32 %v10403_v53, %v10378_v15  ;;  %v10544_v15 = vpop.f32.mrf.mxu0 }
 0x403   : > { %v10510_v8 = vadd.f32 %v10489_v46, %v5157_v11  ;;  %v5123_v41 = vadd.f32 %v5008_v13, %v4902_v39  ;;  %v5162_v60 = vmul.f32 %v10476_v43, %v5125_v18  ;;  %v5230_v16 = vsel %vm305_vm2, %v10517_v10, 0.0 }
 0x404   : > { %v6458_v9 = vpop.f32.mrf.mxu1  ;;  %v4906_v39 = vadd.f32 %v10410_v27, %v4682_v56  ;;  %v4909_v18 = vadd.f32 %v10417_v3, %v10385_v44 }
 0x405   : > { %v5226_v31 = vsel %vm305_vm2, %v10510_v8, 0.0  ;;  %v5160_v63 = vmul.f32 %v10476_v43, %v5123_v41  ;;  %v5126_v14 = vadd.f32 %v6458_v9, %v4905_v57  ;;  %v10547_v53 = vadd.f32 %v10489_v46, %v5162_v60 }
 0x406   : > { %v5227_v58 = vadd.f32 %v5226_v31, %v5225_v45  ;;  %v5011_v38 = vpop.f32.mrf.mxu1  ;;  %v4907_v9 = vadd.f32 %v10424_v48, %v4683_v51  ;;  %v4912_v51 = vadd.f32 %v10431_v54, %v10392_v19  ;;  %v4913_v19 = vadd.f32 %v10445_v21, %v10399_v33 }
 0x407   : > { %v10530_v7 = vadd.f32 %v10489_v46, %v5160_v63  ;;  %v5124_v23 = vadd.f32 %v5011_v38, %v4903_v0  ;;  %v5163_v11 = vmul.f32 %v10476_v43, %v5126_v14  ;;  %v4473_v63 = vadd.f32 %v10271_v30, %v10282_v59 }
 0x408   : > { %v5229_v1 = vadd.f32 %v5228_v52, %v5227_v58  ;;  %v6461_v47 = vpop.f32.mrf.mxu1  ;;  %v10565_v58 = vpop.f32.mrf.mxu0  ;;  %v5236_v48 = vsel %vm305_vm2, %v10547_v53, 0.0 }
 0x409   : > { %v5161_v24 = vmul.f32 %v10476_v43, %v5124_v23  ;;  %v5129_v57 = vadd.f32 %v6461_v47, %v4908_v12  ;;  %v5232_v41 = vsel %vm305_vm2, %v10530_v7, 0.0  ;;  %v10557_v44 = vadd.f32 %v10489_v46, %v5163_v11 }
 0x40a   : > { %v5231_v13 = vadd.f32 %v5230_v16, %v5229_v1  ;;  %v5024_v40 = vpop.f32.mrf.mxu1  ;;  %v4687_v60 = vadd.f32 %v10401_v29, %v4473_v63  ;;  %v4910_v47 = vadd.f32 %v10438_v62, %v4686_v4  ;;  %v4476_v16 = vadd.f32 %v10279_v37, %v10290_v17  ;;  %v10587_v54 = vpop.f32.mrf.mxu0  ;;  %v11955_v63 = vld [vmem:[#allocation73_spill] sm:$0xff] }
 0x40b   : > { %v10552_v45 = vadd.f32 %v10489_v46, %v5161_v24  ;;  %v5127_v27 = vadd.f32 %v5024_v40, %v4906_v39  ;;  %v5166_v26 = vmul.f32 %v10476_v43, %v5129_v57  ;;  %v5238_v59 = vsel %vm305_vm2, %v10557_v44, 0.0 }
 0x40c   : > { %v5233_v34 = vadd.f32 %v5232_v41, %v5231_v13  ;;  %v6462_v56 = vpop.f32.mrf.mxu1  ;;  %v4690_v37 = vadd.f32 %v10408_v55, %v4476_v16  ;;  %v4911_v40 = vadd.f32 %v10452_v22, %v4687_v60  ;;  %v11957_v60 = vld [vmem:[#allocation65_spill] sm:$0xff] }
 0x40d   : > { %v5234_v3 = vsel %vm305_vm2, %v10552_v45, 0.0  ;;  %v5164_v0 = vmul.f32 %v10476_v43, %v5127_v27  ;;  %v5130_v31 = vadd.f32 %v6462_v56, %v4909_v18  ;;  %v10583_v11 = vadd.f32 %v10489_v46, %v5166_v26  ;;  %v10604_v56 = vpop.f32.mrf.mxu0 }
 0x40e   : > { %v5235_v14 = vadd.f32 %v5234_v3, %v5233_v34  ;;  %v5027_v42 = vpop.f32.mrf.mxu1  ;;  %v4477_v27 = vadd.f32 %v10287_v49, %v10298_v25 }
 0x40f   : > { %v10570_v38 = vadd.f32 %v10489_v46, %v5164_v0  ;;  %v5128_v52 = vadd.f32 %v5027_v42, %v4907_v9  ;;  %v5167_v1 = vmul.f32 %v10476_v43, %v5130_v31  ;;  %v5244_v55 = vsel %vm305_vm2, %v10583_v11, 0.0 }
 0x410   : > { %v5237_v23 = vadd.f32 %v5236_v48, %v5235_v14  ;;  %v6465_v30 = vpop.f32.mrf.mxu1  ;;  %v4691_v0 = vadd.f32 %v10415_v32, %v4477_v27  ;;  %v4916_v14 = vadd.f32 %v10461_v28, %v11955_v63  ;;  %v4914_v48 = vadd.f32 %v10469_v2, %v4690_v37  ;;  %v10624_v28 = vpop.f32.mrf.mxu0 }
 0x411   : > { %v5165_v12 = vmul.f32 %v10476_v43, %v5128_v52  ;;  %v5240_v39 = vsel %vm305_vm2, %v10570_v38, 0.0  ;;  %v5133_v62 = vadd.f32 %v6465_v30, %v4912_v51  ;;  %v10597_v18 = vadd.f32 %v10489_v46, %v5167_v1  ;;  %v11956_v52 = vld [vmem:[#allocation63_spill] sm:$0xff] }
 0x412   : > { %v5239_v29 = vadd.f32 %v5238_v59, %v5237_v23  ;;  %v5040_v24 = vpop.f32.mrf.mxu1  ;;  %v4480_v23 = vadd.f32 %v11957_v60, %v11956_v52  ;;  %v11958_v59 = vld [vmem:[#allocation74_spill] sm:$0xff]  ;;  %v11965_v52 = vld [vmem:[#allocation60_spill] sm:$0xff] }
 0x413   : > { %v10592_v36 = vadd.f32 %v10489_v46, %v5165_v12  ;;  %v5131_v13 = vadd.f32 %v5040_v24, %v4910_v47  ;;  %v5170_v22 = vmul.f32 %v10476_v43, %v5133_v62  ;;  %v5246_v25 = vsel %vm305_vm2, %v10597_v18, 0.0 }
 0x414   : > { %v5241_v17 = vadd.f32 %v5240_v39, %v5239_v29  ;;  %v6466_v57 = vpop.f32.mrf.mxu1  ;;  %v4917_v1 = vadd.f32 %v10483_v5, %v11958_v59  ;;  %v11959_v29 = vld [vmem:[#allocation81_spill] sm:$0xff]  ;;  %v4915_v62 = vadd.f32 %v10504_v50, %v4691_v0 }
 0x415   : > { %v5242_v33 = vsel %vm305_vm2, %v10592_v36, 0.0  ;;  %v5168_v21 = vmul.f32 %v10476_v43, %v5131_v13  ;;  %v5134_v41 = vadd.f32 %v6466_v57, %v4913_v19  ;;  %v10627_v12 = vadd.f32 %v10489_v46, %v5170_v22  ;;  %v11960_v57 = vld [vmem:[#allocation71_spill] sm:$0xff]  ;;  %v11962_v22 = vld [vmem:[#allocation82_spill] sm:$0xff] }
 0x416   : > { %v5243_v4 = vadd.f32 %v5242_v33, %v5241_v17  ;;  %v5043_v34 = vpop.f32.mrf.mxu1  ;;  %v4694_v24 = vadd.f32 %v11959_v29, %v4480_v23  ;;  %v11967_v29 = vld [vmem:[#allocation76_spill] sm:$0xff] }
 0x417   : > { %v10610_v9 = vadd.f32 %v10489_v46, %v5168_v21  ;;  %v5132_v3 = vadd.f32 %v5043_v34, %v4911_v40  ;;  %v5171_v26 = vmul.f32 %v10476_v43, %v5134_v41  ;;  %v11961_v40 = vld [vmem:[#allocation62_spill] sm:$0xff]  ;;  %v5252_v50 = vsel %vm305_vm2, %v10627_v12, 0.0 }
 0x418   : > { %v5245_v31 = vadd.f32 %v5244_v55, %v5243_v4  ;;  %v6469_v49 = vpop.f32.mrf.mxu1  ;;  %v4481_v33 = vadd.f32 %v11961_v40, %v11960_v57  ;;  %v6442_v4 = vpop.f32.mrf.mxu0  ;;  %v11968_v40 = vld [vmem:[#allocation69_spill] sm:$0xff] }
 0x419   : > { %v5169_v42 = vmul.f32 %v10476_v43, %v5132_v3  ;;  %v5137_v30 = vadd.f32 %v6469_v49, %v4916_v14  ;;  %v5248_v47 = vsel %vm305_vm2, %v10610_v9, 0.0  ;;  %v10637_v5 = vadd.f32 %v10489_v46, %v5171_v26 }
 0x41a   : > { %v5247_v51 = vadd.f32 %v5246_v25, %v5245_v31  ;;  %v5056_v32 = vpop.f32.mrf.mxu1  ;;  %v4695_v3 = vadd.f32 %v11962_v22, %v4481_v33  ;;  %v11963_v31 = vld [vmem:[#allocation80_spill] sm:$0xff]  ;;  %v4870_v59 = vpop.f32.mrf.mxu0  ;;  %v11969_v33 = vld [vmem:[#allocation70_spill] sm:$0xff] }
 0x41b   : > { %v10632_v16 = vadd.f32 %v10489_v46, %v5169_v42  ;;  %v5135_v2 = vadd.f32 %v5056_v32, %v4914_v48  ;;  %v5174_v41 = vmul.f32 %v10476_v43, %v5137_v30  ;;  %v4920_v63 = vadd.f32 %v10524_v61, %v11963_v31  ;;  %v11964_v48 = vld [vmem:[#allocation61_spill] sm:$0xff]  ;;  %v11966_v32 = vld [vmem:[#allocation79_spill] sm:$0xff] }
 0x41c   : > { %v5249_v19 = vadd.f32 %v5248_v47, %v5247_v51  ;;  %v6470_v39 = vpop.f32.mrf.mxu1  ;;  %v5254_v49 = vsel %vm305_vm2, %v10637_v5, 0.0  ;;  %v4918_v42 = vadd.f32 %v10544_v15, %v4694_v24  ;;  %v4484_v60 = vadd.f32 %v11965_v52, %v11964_v48 }
 0x41d   : > { %v5250_v13 = vsel %vm305_vm2, %v10632_v16, 0.0  ;;  %v5172_v37 = vmul.f32 %v10476_v43, %v5135_v2  ;;  %v5138_v17 = vadd.f32 %v6470_v39, %v4917_v1  ;;  %v10661_v23 = vadd.f32 %v10489_v46, %v5174_v41 }
 0x41e   : > { %v5251_v21 = vadd.f32 %v5250_v13, %v5249_v19  ;;  %v5059_v27 = vpop.f32.mrf.mxu1  ;;  %v4921_v61 = vadd.f32 %v10565_v58, %v11966_v32  ;;  %v4698_v24 = vadd.f32 %v11967_v29, %v4484_v60  ;;  %v6445_v13 = vpop.f32.mrf.mxu0  ;;  %v11972_v60 = vld [vmem:[#allocation67_spill] sm:$0xff] }
 0x41f   : > { %v10648_v34 = vadd.f32 %v10489_v46, %v5172_v37  ;;  %v5136_v55 = vadd.f32 %v5059_v27, %v4915_v62  ;;  %v5175_v25 = vmul.f32 %v10476_v43, %v5138_v17  ;;  %v4919_v62 = vadd.f32 %v10587_v54, %v4695_v3  ;;  %v11970_v3 = vld [vmem:[#allocation77_spill] sm:$0xff] }
 0x420   : > { %v5253_v0 = vadd.f32 %v5252_v50, %v5251_v21  ;;  %v6473_v14 = vpop.f32.mrf.mxu1  ;;  %v4485_v21 = vadd.f32 %v11969_v33, %v11968_v40  ;;  %v5260_v50 = vsel %vm305_vm2, %v10661_v23, 0.0  ;;  %v4922_v52 = vadd.f32 %v10624_v28, %v4698_v24 }
 0x421   : > { %v5173_v26 = vmul.f32 %v10476_v43, %v5136_v55  ;;  %v5256_v1 = vsel %vm305_vm2, %v10648_v34, 0.0  ;;  %v5141_v2 = vadd.f32 %v6473_v14, %v4920_v63  ;;  %v10673_v37 = vadd.f32 %v10489_v46, %v5175_v25  ;;  %v11971_v63 = vld [vmem:[#allocation75_spill] sm:$0xff]  ;;  %v4883_v25 = vpop.f32.mrf.mxu0 }
 0x422   : > { %v5255_v51 = vadd.f32 %v5254_v49, %v5253_v0  ;;  %v5072_v30 = vpop.f32.mrf.mxu1  ;;  %v4699_v0 = vadd.f32 %v11970_v3, %v4485_v21  ;;  %v4924_v14 = vadd.f32 %v10604_v56, %v11971_v63  ;;  %v11975_v21 = vld [vmem:[#allocation59_spill] sm:$0xff]  ;;  %v11979_v63 = vld [vmem:[#allocation85_spill] sm:$0xff] }
 0x423   : > { %v10668_v47 = vadd.f32 %v10489_v46, %v5173_v26  ;;  %v5139_v15 = vadd.f32 %v5072_v30, %v4918_v42  ;;  %v5178_v54 = vmul.f32 %v10476_v43, %v5141_v2  ;;  %v5262_v26 = vsel %vm305_vm2, %v10673_v37, 0.0  ;;  %v11974_v2 = vld [vmem:[#allocation78_spill] sm:$0xff] }
 0x424   : > { %v5257_v19 = vadd.f32 %v5256_v1, %v5255_v51  ;;  %v6474_v39 = vpop.f32.mrf.mxu1  ;;  %v11973_v51 = vld [vmem:[#allocation68_spill] sm:$0xff] }
 0x425   : > { %v5258_v58 = vsel %vm305_vm2, %v10668_v47, 0.0  ;;  %v5176_v17 = vmul.f32 %v10476_v43, %v5139_v15  ;;  %v5142_v57 = vadd.f32 %v6474_v39, %v4921_v61  ;;  %v4488_v30 = vadd.f32 %v11973_v51, %v11972_v60 }
 0x426   : > { %v5259_v41 = vadd.f32 %v5258_v58, %v5257_v19  ;;  %v5075_v27 = vpop.f32.mrf.mxu1  ;;  %v4925_v15 = vadd.f32 %v6442_v4, %v11974_v2  ;;  %v10698_v56 = vadd.f32 %v10489_v46, %v5178_v54  ;;  %v4923_v58 = vadd.f32 %v4870_v59, %v4699_v0  ;;  %v11978_v0 = vld [vmem:[#allocation72_spill] sm:$0xff] }
 0x427   : > { %v10684_v55 = vadd.f32 %v10489_v46, %v5176_v17  ;;  %v5140_v22 = vadd.f32 %v5075_v27, %v4919_v62  ;;  %v5179_v42 = vmul.f32 %v10476_v43, %v5142_v57  ;;  %v4702_v28 = vadd.f32 %v10450_v20, %v4488_v30  ;;  %v6446_v17 = vpop.f32.mrf.mxu0  ;;  %v11980_v30 = vld [vmem:[#allocation95_spill] sm:$0xff] }
 0x428   : > { %v5261_v31 = vadd.f32 %v5260_v50, %v5259_v41  ;;  %v6477_v49 = vpop.f32.mrf.mxu1  ;;  %v11976_v41 = vld [vmem:[#allocation66_spill] sm:$0xff]  ;;  %v5268_v59 = vsel %vm305_vm2, %v10698_v56, 0.0 }
 0x429   : > { %v5177_v48 = vmul.f32 %v10476_v43, %v5140_v22  ;;  %v5145_v61 = vadd.f32 %v6477_v49, %v4924_v14  ;;  %v5264_v29 = vsel %vm305_vm2, %v10684_v55, 0.0  ;;  %v10707_v57 = vadd.f32 %v10489_v46, %v5179_v42 }
 0x42a   : > { %v5263_v32 = vadd.f32 %v5262_v26, %v5261_v31  ;;  %v5088_v1 = vpop.f32.mrf.mxu1  ;;  %v4489_v27 = vadd.f32 %v11976_v41, %v11975_v21  ;;  %v4928_v31 = vadd.f32 %v6445_v13, %v11978_v0  ;;  %v4926_v42 = vadd.f32 %v4883_v25, %v4702_v28 }
 0x42b   : > { %v10703_v19 = vadd.f32 %v10489_v46, %v5177_v48  ;;  %v5143_v39 = vadd.f32 %v5088_v1, %v4922_v52  ;;  %v5182_v54 = vmul.f32 %v10476_v43, %v5145_v61  ;;  %v4886_v48 = vpop.f32.mrf.mxu0  ;;  %v5270_v52 = vsel %vm305_vm2, %v10707_v57, 0.0 }
 0x42c   : > { %v5265_v24 = vadd.f32 %v5264_v29, %v5263_v32  ;;  %v6478_v62 = vpop.f32.mrf.mxu1  ;;  %v4703_v14 = vadd.f32 %v11979_v63, %v4489_v27  ;;  %v4929_v32 = vadd.f32 %v6446_v17, %v11980_v30 }
 0x42d   : > { %v5266_v4 = vsel %vm305_vm2, %v10703_v19, 0.0  ;;  %v5180_v40 = vmul.f32 %v10476_v43, %v5143_v39  ;;  %v5146_v33 = vadd.f32 %v6478_v62, %v4925_v15  ;;  %v10728_v61 = vadd.f32 %v10489_v46, %v5182_v54 }
 0x42e   : > { %v5267_v50 = vadd.f32 %v5266_v4, %v5265_v24  ;;  %v5091_v20 = vpop.f32.mrf.mxu1  ;;  %v4927_v39 = vadd.f32 %v4886_v48, %v4703_v14 }
 0x42f   : > { %v10718_v22 = vadd.f32 %v10489_v46, %v5180_v40  ;;  %v5144_v3 = vadd.f32 %v5091_v20, %v4923_v58  ;;  %v5183_v60 = vmul.f32 %v10476_v43, %v5146_v33  ;;  %11981 = vst [vmem:[#allocation96_spill] sm:$0xff] %v10728_v61  ;;  %v5276_v21 = vsel %vm305_vm2, %v10728_v61, 0.0 }
 0x430   : > { %v5269_v49 = vadd.f32 %v5268_v59, %v5267_v50  ;;  %v6481_v26 = vpop.f32.mrf.mxu1 }
 0x431   : > { %11977 = vst [vmem:[#allocation91_spill] sm:$0xff] %v10718_v22  ;;  %v5181_v51 = vmul.f32 %v10476_v43, %v5144_v3  ;;  %v5272_v2 = vsel %vm305_vm2, %v10718_v22, 0.0  ;;  %v5149_v15 = vadd.f32 %v6481_v26, %v4928_v31  ;;  %v10736_v62 = vadd.f32 %v10489_v46, %v5183_v60 }
 0x432   : > { %v5271_v1 = vadd.f32 %v5270_v52, %v5269_v49  ;;  %v5104_v13 = vpop.f32.mrf.mxu1 }
 0x433   : > { %v10733_v25 = vadd.f32 %v10489_v46, %v5181_v51  ;;  %v5147_v29 = vadd.f32 %v5104_v13, %v4926_v42  ;;  %v5186_v41 = vmul.f32 %v10476_v43, %v5149_v15  ;;  %v5278_v20 = vsel %vm305_vm2, %v10736_v62, 0.0 }
 0x434   : > { %v5273_v28 = vadd.f32 %v5272_v2, %v5271_v1  ;;  %v6482_v24 = vpop.f32.mrf.mxu1 }
 0x435   : > { %v5274_v58 = vsel %vm305_vm2, %v10733_v25, 0.0  ;;  %v5184_v17 = vmul.f32 %v10476_v43, %v5147_v29  ;;  %v5150_v4 = vadd.f32 %v6482_v24, %v4929_v32  ;;  %v10752_v31 = vadd.f32 %v10489_v46, %v5186_v41  ;;  %v11984_v24 = vld [vmem:[#allocation13_spill] sm:$0xff]  ;;  %v11991_v41 = vld [vmem:[#allocation182_spill] sm:$0xff] }
 0x436   : > { %v5275_v40 = vadd.f32 %v5274_v58, %v5273_v28  ;;  %v5107_v33 = vpop.f32.mrf.mxu1  ;;  %v11985_v58 = vld [vmem:[#allocation20_spill] sm:$0xff] }
 0x437   : > { %v10745_v27 = vadd.f32 %v10489_v46, %v5184_v17  ;;  %v5148_v50 = vadd.f32 %v5107_v33, %v4927_v39  ;;  %v5187_v59 = vmul.f32 %v10476_v43, %v5150_v4  ;;  %11983 = vst [vmem:[#allocation104_spill] sm:$0xff] %v10752_v31  ;;  %v11986_v17 = vld [vmem:[#allocation83_spill] sm:$0xff]  ;;  %v11987_v4 = vld [vmem:[#allocation84_spill] sm:$0xff]  ;;  %v11989_v33 = vld [vmem:[#allocation89_spill] sm:$0xff] }
 0x438   : > { %v5277_v54 = vadd.f32 %v5276_v21, %v5275_v40  ;;  %v11988_v40 = vld [vmem:[#allocation86_spill] sm:$0xff]  ;;  %v11990_v21 = vld [vmem:[#allocation169_spill] sm:$0xff] }
 0x439   : > { %11982 = vst [vmem:[#allocation103_spill] sm:$0xff] %v10745_v27  ;;  %v5185_v3 = vmul.f32 %v10476_v43, %v5148_v50  ;;  %v5280_v63 = vsel %vm305_vm2, %v10745_v27, 0.0  ;;  %v10760_v26 = vadd.f32 %v10489_v46, %v5187_v59  ;;  %v5284_v43 = vsel %vm305_vm2, %v10752_v31, 0.0  ;;  %v11992_v50 = vld [vmem:[#allocation10_spill] sm:$0xff] }
 0x43a   : > { %v5279_v0 = vadd.f32 %v5278_v20, %v5277_v54  ;;  %v10790_v54 = vpop.permute.xlu1 %5383 }
 0x43b   : > { %v10757_v14 = vadd.f32 %v10489_v46, %v5185_v3  ;;  %v5286_v60 = vsel %vm305_vm2, %v10760_v26, 0.0  ;;  %v5296_v46 = vld [vmem:[%s11047_s4] sm:$0x3] }
 0x43c   : > { %v5281_v49 = vadd.f32 %v5280_v63, %v5279_v0  ;;  %v10800_v63 = vpop.permute.xlu0 %5381 }
 0x43d   : > { %v5282_v42 = vsel %vm305_vm2, %v10757_v14, 0.0 }
 0x43e   : > { %v5283_v48 = vadd.f32 %v5282_v42, %v5281_v49  ;;  %v10792_v20 = vpop.permute.xlu1 %5387 }
 0x440   : > { %v5285_v52 = vadd.f32 %v5284_v43, %v5283_v48  ;;  %v10804_v42 = vpop.permute.xlu0 %5397 }
 0x442   : > { %v5287_v51 = vadd.f32 %v5286_v60, %v5285_v52  ;;  %v10794_v59 = vpop.permute.xlu1 %5385 }
 0x444   : > { %v5288_v30 = vrot.slane %v5287_v51, 4  ;;  %v10808_v43 = vpop.permute.xlu0 %5401 }
 0x446   : > { %v5289_v32 = vadd.f32 %v5288_v30, %v5287_v51  ;;  %v10796_v3 = vpop.permute.xlu1 %5391  ;;  %v5302_v51 = vld [vmem:[%s11048_s5] sm:$0x3] }
 0x448   : > { %v5290_v1 = vrot.slane %v5289_v32, 2  ;;  %v10812_v60 = vpop.permute.xlu0 %5405 }
 0x44a   : > { %v5291_v13 = vadd.f32 %v5290_v1, %v5289_v32  ;;  %v10798_v0 = vpop.permute.xlu1 %5389 }
 0x44c   : > { %v5292_v2 = vrot.slane %v5291_v13, 1 }
 0x44e   : > { %v5293_v15 = vadd.f32 %v5292_v2, %v5291_v13  ;;  %v10802_v49 = vpop.permute.xlu1 %5395 }
 0x450   : > { %v5295_v29 = vmul.f32 0.00390625, %v5293_v15 }
 0x452   : > { %v5297_v39 = vmul.f32 %v5296_v46, %v5295_v29  ;;  %v10806_v48 = vpop.permute.xlu1 %5393 }
 0x454   : > { %v5298_v28 = vsel %vm308_vm4, %v5297_v39, 0.0 }
 0x455   : > { %5299 = vadd.xlane.f32.xlu0 %v5298_v28 }
 0x456   : > { %v10810_v52 = vpop.permute.xlu1 %5399 }
 0x45a   : > { %v10817_v32 = vpop.permute.xlu1 %5403 }
 0x45e   : > { %v10820_v46 = vpop.permute.xlu1 %5407 }
 0x46b   : > { %5409 = vrot.lane.b32.xlu0 %v11984_v24, %s6664_s10  ;;  %v10822_v24 = vpop.permute.xlu1 %5411 }
 0x46f   : > { %5413 = vrot.lane.b32.xlu0 %v11985_v58, %s6664_s10 }
 0x473   : > { %5417 = vrot.lane.b32.xlu0 %v11986_v17, %s6664_s10 }
 0x477   : > { %5421 = vrot.lane.b32.xlu0 %v11987_v4, %s6664_s10 }
 0x47b   : > { %5425 = vrot.lane.b32.xlu0 %v11988_v40, %s6664_s10  ;;  %v5416_v40 = vpop.permute.xlu1 %5415 }
 0x47f   : > { %5429 = vrot.lane.b32.xlu0 %v11989_v33, %s6664_s10 }
 0x483   : > { %5433 = vrot.lane.b32.xlu0 %v11990_v21, %s6664_s10  ;;  %v5420_v21 = vpop.permute.xlu1 %5419 }
 0x487   : > { %5437 = vrot.lane.b32.xlu0 %v11991_v41, %s6664_s10 }
 0x48b   : > { %5441 = vrot.lane.b32.xlu0 %v11992_v50, %s6664_s10  ;;  %v5424_v50 = vpop.permute.xlu1 %5423  ;;  %s6607_s10 = scalar_lea.vmem %s6606_s26, 8192 }
 0x48c   : > { %p6609_p1 = scmp.lt.s32.totalorder %s6607_s10, %s6601_s24 }
 0x48e   : > { %p6610_p2 = por %p6609_p1, %p6608_p0 }
 0x490   : > { %p6611_p3 = pnand %p6610_p2, %p6604_p13 }
 0x4de   : > { %v5300_v30 = vpop.xlane.xlu0 %5299 }
 0x4df   : > { %v5301_v1 = vmax.f32 %v5300_v30, 0.0 }
 0x4e1   : > { %v5303_v13 = vmul.f32 %v5302_v51, %v5301_v1 }
 0x4e2   : > { %v5410_v33 = vpop.permute.xlu0 %5409 }
 0x4e3   : > { %v5304_v2 = vsel %vm308_vm4, %v5303_v13, 0.0  ;;  %v5428_v13 = vpop.permute.xlu1 %5427 }
 0x4e4   : > { %v5305_v15 = vrot.slane %v5304_v2, 4 }
 0x4e6   : > { %v5306_v29 = vadd.f32 %v5305_v15, %v5304_v2  ;;  %v10824_v41 = vpop.permute.xlu0 %5413 }
 0x4e7   : > { %v5432_v15 = vpop.permute.xlu1 %5431 }
 0x4e8   : > { %v5307_v39 = vrot.slane %v5306_v29, 2 }
 0x4ea   : > { %v5308_v28 = vadd.f32 %v5307_v39, %v5306_v29  ;;  %v10826_v1 = vpop.permute.xlu0 %5417 }
 0x4eb   : > { %11993 = vst [vmem:[#allocation100_spill] sm:$0xff] %v10826_v1 }
 0x4ec   : > { %v5309_v58 = vrot.slane %v5308_v28, 1 }
 0x4ee   : > { %v5310_v17 = vadd.f32 %v5309_v58, %v5308_v28  ;;  %v10828_v2 = vpop.permute.xlu0 %5421  ;;  %v5436_v28 = vpop.permute.xlu1 %5435 }
 0x4ef   : > { %11994 = vst [vmem:[#allocation99_spill] sm:$0xff] %v10828_v2 }
 0x4f0   : > { %v5906_v4 = vmul.f32 -1.442695, %v5310_v17 }
 0x4f2   : > { %6544 = vpow2.f32 %v5906_v4  ;;  %v10830_v29 = vpop.permute.xlu0 %5425 }
 0x4f3   : > { %11995 = vst [vmem:[#allocation93_spill] sm:$0xff] %v10830_v29 }
 0x4f6   : > { %v10867_v31 = vpop.permute.xlu0 %5429 }
 0x4f7   : > { %11996 = vst [vmem:[#allocation102_spill] sm:$0xff] %v10867_v31 }
 0x4ff   : > { %v6545_v51 = vpop.eup %6544 }
 0x500   : > { %v5314_v30 = vadd.f32 1.0, %v6545_v51 }
 0x502   : > { %6546 = vrcp.f32 %v5314_v30 }
 0x50f   : > { %v10832_v39 = vpop.eup %6546 }
 0x510   : > { %v5317_v58 = vmul.f32 %v10832_v39, %v10493_v35  ;;  %v5318_v17 = vmul.f32 %v10832_v39, %v10510_v8  ;;  %v5319_v4 = vmul.f32 %v10832_v39, %v10507_v6  ;;  %v5320_v51 = vmul.f32 %v10832_v39, %v10517_v10 }
 0x511   : > { %v5321_v30 = vmul.f32 %v10832_v39, %v10530_v7  ;;  %v5322_v29 = vmul.f32 %v10832_v39, %v10552_v45  ;;  %v5323_v2 = vmul.f32 %v10832_v39, %v10547_v53  ;;  %v5324_v35 = vmul.f32 %v10832_v39, %v10557_v44 }
 0x512   : > { %v5325_v6 = vmul.f32 %v10832_v39, %v10570_v38  ;;  %v5326_v8 = vmul.f32 %v10832_v39, %v10592_v36  ;;  %v5327_v10 = vmul.f32 %v10832_v39, %v10583_v11  ;;  %v5328_v7 = vmul.f32 %v10832_v39, %v10597_v18 }
 0x513   : > { %v5329_v53 = vmul.f32 %v10832_v39, %v10610_v9  ;;  %v5330_v45 = vmul.f32 %v10832_v39, %v10632_v16  ;;  %v5332_v44 = vmul.f32 %v10832_v39, %v10637_v5  ;;  %v5334_v38 = vmul.f32 %v10832_v39, %v10668_v47  ;;  %v5440_v16 = vpop.permute.xlu1 %5439 }
 0x514   : > { %v5336_v11 = vmul.f32 %v10832_v39, %v10673_v37  ;;  %v5338_v36 = vmul.f32 %v10832_v39, %v10703_v19  ;;  %v5340_v18 = vmul.f32 %v10832_v39, %v10707_v57  ;;  %v5342_v9 = vmul.f32 %v10832_v39, %v10733_v25 }
 0x515   : > { %v5344_v5 = vmul.f32 %v10832_v39, %v10736_v62  ;;  %v5346_v47 = vmul.f32 %v10832_v39, %v10757_v14  ;;  %v5348_v37 = vmul.f32 %v10832_v39, %v10760_v26  ;;  %v5331_v19 = vmul.f32 %v10832_v39, %v10627_v12 }
 0x516   : > { %v5477_v57 = vadd.f32 %v10800_v63, %v5317_v58  ;;  %v5478_v31 = vadd.f32 %v10790_v54, %v5318_v17  ;;  %v5479_v25 = vadd.f32 %v10794_v59, %v5319_v4  ;;  %v5480_v27 = vadd.f32 %v10792_v20, %v5320_v51 }
 0x517   : > { %v5491_v1 = vadd.f32 %v5410_v33, %v5331_v19  ;;  %v5481_v62 = vadd.f32 %v10798_v0, %v5321_v30  ;;  %v5482_v61 = vadd.f32 %v10796_v3, %v5322_v29  ;;  %v5483_v14 = vadd.f32 %v10806_v48, %v5323_v2  ;;  %v10901_v0 = vpop.permute.xlu0 %5433  ;;  %v5444_v29 = vpop.permute.xlu1 %5443  ;;  %v12002_v19 = vld [vmem:[#allocation99_spill] sm:$0xff] }
 0x518   : > { %v5484_v26 = vadd.f32 %v10802_v49, %v5324_v35  ;;  %v5485_v22 = vadd.f32 %v10804_v42, %v5325_v6  ;;  %v5486_v12 = vadd.f32 %v10810_v52, %v5326_v8  ;;  %v5487_v63 = vadd.f32 %v10808_v43, %v5327_v10 }
 0x519   : > { %v5523_v54 = vmax.f32 %v5491_v1, 0.0  ;;  %v5488_v59 = vadd.f32 %v10817_v32, %v5328_v7  ;;  %v5489_v20 = vadd.f32 %v10812_v60, %v5329_v53  ;;  %v5490_v33 = vadd.f32 %v10820_v46, %v5330_v45 }
 0x51a   : > { %v5492_v3 = vadd.f32 %v10822_v24, %v5332_v44  ;;  %v5494_v48 = vadd.f32 %v5416_v40, %v5334_v38  ;;  %v5496_v2 = vadd.f32 %v5420_v21, %v5336_v11  ;;  %v5498_v49 = vadd.f32 %v5424_v50, %v5338_v36  ;;  %v11997_v11 = vld [vmem:[#allocation91_spill] sm:$0xff] }
 0x51b   : > { %5555 = vst.msk [vmem:[%s10904_s18 + $0x70] sm:$0xff] %vm305_vm2, %v5523_v54  ;;  %v5500_v42 = vadd.f32 %v5428_v13, %v5340_v18  ;;  %v5502_v43 = vadd.f32 %v5432_v15, %v5342_v9  ;;  %v5504_v52 = vadd.f32 %v5436_v28, %v5344_v5  ;;  %v5506_v60 = vadd.f32 %v5440_v16, %v5346_v47  ;;  %v11998_v18 = vld [vmem:[#allocation96_spill] sm:$0xff]  ;;  %v12000_v47 = vld [vmem:[#allocation103_spill] sm:$0xff] }
 0x51c   : > { %v5508_v32 = vadd.f32 %v5444_v29, %v5348_v37  ;;  %v5333_v46 = vmul.f32 %v10832_v39, %v10648_v34  ;;  %v5509_v24 = vmax.f32 %v5477_v57, 0.0  ;;  %v5510_v40 = vmax.f32 %v5478_v31, 0.0  ;;  %v11999_v16 = vld [vmem:[#allocation100_spill] sm:$0xff] }
 0x51d   : > { %v5511_v21 = vmax.f32 %v5479_v25, 0.0  ;;  %v5512_v50 = vmax.f32 %v5480_v27, 0.0  ;;  %v5513_v1 = vmax.f32 %v5481_v62, 0.0  ;;  %v5514_v58 = vmax.f32 %v5482_v61, 0.0  ;;  %v12001_v37 = vld [vmem:[#allocation104_spill] sm:$0xff]  ;;  %v12003_v25 = vld [vmem:[#allocation93_spill] sm:$0xff] }
 0x51e   : > { %v5493_v13 = vadd.f32 %v10824_v41, %v5333_v46  ;;  %v5515_v15 = vmax.f32 %v5483_v14, 0.0  ;;  %v5516_v17 = vmax.f32 %v5484_v26, 0.0  ;;  %v5517_v28 = vmax.f32 %v5485_v22, 0.0  ;;  %5541 = vst.msk [vmem:[%s10904_s18] sm:$0xff] %vm305_vm2, %v5509_v24  ;;  %5542 = vst.msk [vmem:[%s10904_s18 + $0x8] sm:$0xff] %vm305_vm2, %v5510_v40  ;;  %v5438_v22 = vpop.permute.xlu0 %5437  ;;  %v12004_v14 = vld [vmem:[#allocation102_spill] sm:$0xff] }
 0x51f   : > { %v5518_v34 = vmax.f32 %v5486_v12, 0.0  ;;  %v5519_v31 = vmax.f32 %v5487_v63, 0.0  ;;  %v5520_v4 = vmax.f32 %v5488_v59, 0.0  ;;  %v5521_v51 = vmax.f32 %v5489_v20, 0.0  ;;  %5543 = vst.msk [vmem:[%s10904_s18 + $0x10] sm:$0xff] %vm305_vm2, %v5511_v21  ;;  %5544 = vst.msk [vmem:[%s10904_s18 + $0x18] sm:$0xff] %vm305_vm2, %v5512_v50 }
 0x520   : > { %5545 = vst.msk [vmem:[%s10904_s18 + $0x20] sm:$0xff] %vm305_vm2, %v5513_v1  ;;  %5546 = vst.msk [vmem:[%s10904_s18 + $0x28] sm:$0xff] %vm305_vm2, %v5514_v58  ;;  %v5525_v61 = vmax.f32 %v5493_v13, 0.0  ;;  %v5522_v27 = vmax.f32 %v5490_v33, 0.0  ;;  %v5524_v41 = vmax.f32 %v5492_v3, 0.0  ;;  %v5526_v30 = vmax.f32 %v5494_v48, 0.0 }
 0x521   : > { %5547 = vst.msk [vmem:[%s10904_s18 + $0x30] sm:$0xff] %vm305_vm2, %v5515_v15  ;;  %5548 = vst.msk [vmem:[%s10904_s18 + $0x38] sm:$0xff] %vm305_vm2, %v5516_v17  ;;  %v5528_v35 = vmax.f32 %v5496_v2, 0.0  ;;  %v5530_v6 = vmax.f32 %v5498_v49, 0.0  ;;  %v5532_v8 = vmax.f32 %v5500_v42, 0.0  ;;  %v5534_v10 = vmax.f32 %v5502_v43, 0.0 }
 0x522   : > { %5549 = vst.msk [vmem:[%s10904_s18 + $0x40] sm:$0xff] %vm305_vm2, %v5517_v28  ;;  %5550 = vst.msk [vmem:[%s10904_s18 + $0x48] sm:$0xff] %vm305_vm2, %v5518_v34  ;;  %v5536_v7 = vmax.f32 %v5504_v52, 0.0  ;;  %v5538_v53 = vmax.f32 %v5506_v60, 0.0  ;;  %v5540_v45 = vmax.f32 %v5508_v32, 0.0  ;;  %v5335_v44 = vmul.f32 %v10832_v39, %v10661_v23  ;;  %v5442_v63 = vpop.permute.xlu0 %5441 }
 0x523   : > { %5551 = vst.msk [vmem:[%s10904_s18 + $0x50] sm:$0xff] %vm305_vm2, %v5519_v31  ;;  %5552 = vst.msk [vmem:[%s10904_s18 + $0x58] sm:$0xff] %vm305_vm2, %v5520_v4  ;;  %v5337_v38 = vmul.f32 %v10832_v39, %v10684_v55  ;;  %v5339_v23 = vmul.f32 %v10832_v39, %v10698_v56  ;;  %v5341_v36 = vmul.f32 %v10832_v39, %v11997_v11 }
 0x524   : > { %5553 = vst.msk [vmem:[%s10904_s18 + $0x60] sm:$0xff] %vm305_vm2, %v5521_v51  ;;  %5557 = vst.msk [vmem:[%s10904_s18 + $0x80] sm:$0xff] %vm305_vm2, %v5525_v61  ;;  %v5343_v9 = vmul.f32 %v10832_v39, %v11998_v18  ;;  %v5495_v5 = vadd.f32 %v11999_v16, %v5335_v44  ;;  %v5345_v55 = vmul.f32 %v10832_v39, %v12000_v47 }
 0x525   : > { %5554 = vst.msk [vmem:[%s10904_s18 + $0x68] sm:$0xff] %vm305_vm2, %v5522_v27  ;;  %5556 = vst.msk [vmem:[%s10904_s18 + $0x78] sm:$0xff] %vm305_vm2, %v5524_v41  ;;  %v5347_v56 = vmul.f32 %v10832_v39, %v12001_v37  ;;  %v5497_v57 = vadd.f32 %v12002_v19, %v5337_v38  ;;  %v5499_v62 = vadd.f32 %v12003_v25, %v5339_v23 }
 0x526   : > { %5558 = vst.msk [vmem:[%s10904_s18 + $0x88] sm:$0xff] %vm305_vm2, %v5526_v30  ;;  %5560 = vst.msk [vmem:[%s10904_s18 + $0x98] sm:$0xff] %vm305_vm2, %v5528_v35  ;;  %v5501_v26 = vadd.f32 %v12004_v14, %v5341_v36  ;;  %v5503_v12 = vadd.f32 %v10901_v0, %v5343_v9  ;;  %v5527_v54 = vmax.f32 %v5495_v5, 0.0  ;;  %v5505_v59 = vadd.f32 %v5438_v22, %v5345_v55 }
 0x527   : > { %5562 = vst.msk [vmem:[%s10904_s18 + $0xa8] sm:$0xff] %vm305_vm2, %v5530_v6  ;;  %5564 = vst.msk [vmem:[%s10904_s18 + $0xb8] sm:$0xff] %vm305_vm2, %v5532_v8  ;;  %v5507_v39 = vadd.f32 %v5442_v63, %v5347_v56  ;;  %v5529_v20 = vmax.f32 %v5497_v57, 0.0  ;;  %v5531_v33 = vmax.f32 %v5499_v62, 0.0 }
 0x528   : > { %5566 = vst.msk [vmem:[%s10904_s18 + $0xc8] sm:$0xff] %vm305_vm2, %v5534_v10  ;;  %5568 = vst.msk [vmem:[%s10904_s18 + $0xd8] sm:$0xff] %vm305_vm2, %v5536_v7  ;;  %v5533_v3 = vmax.f32 %v5501_v26, 0.0  ;;  %v5535_v48 = vmax.f32 %v5503_v12, 0.0  ;;  %v5537_v0 = vmax.f32 %v5505_v59, 0.0 }
 0x529   : > { %5570 = vst.msk [vmem:[%s10904_s18 + $0xe8] sm:$0xff] %vm305_vm2, %v5538_v53  ;;  %5572 = vst.msk [vmem:[%s10904_s18 + $0xf8] sm:$0xff] %vm305_vm2, %v5540_v45  ;;  %v5539_v2 = vmax.f32 %v5507_v39, 0.0 }
 0x52a   : > { %5559 = vst.msk [vmem:[%s10904_s18 + $0x90] sm:$0xff] %vm305_vm2, %v5527_v54  ;;  %5561 = vst.msk [vmem:[%s10904_s18 + $0xa0] sm:$0xff] %vm305_vm2, %v5529_v20 }
 0x52b   : > { %5563 = vst.msk [vmem:[%s10904_s18 + $0xb0] sm:$0xff] %vm305_vm2, %v5531_v33  ;;  %5565 = vst.msk [vmem:[%s10904_s18 + $0xc0] sm:$0xff] %vm305_vm2, %v5533_v3 }
 0x52c   : > { %5567 = vst.msk [vmem:[%s10904_s18 + $0xd0] sm:$0xff] %vm305_vm2, %v5535_v48  ;;  %5569 = vst.msk [vmem:[%s10904_s18 + $0xe0] sm:$0xff] %vm305_vm2, %v5537_v0 }
 0x52d   : > { %5571 = vst.msk [vmem:[%s10904_s18 + $0xf0] sm:$0xff] %vm305_vm2, %v5539_v2 }
 0x52e   : > { %6614 = shalt.err (!%p6611_p3)
}
 0x52f   : > { %s6615_s12 = scalar_lea.hbm %s10983_s22, 4096  ;;  %s6619_s18 = scalar_lea.hbm %s11051_s8, 8192 }
 0x530   : > { %p6616_p4 = scmp.ne.s32.totalorder %s10983_s22, %s6615_s12  ;;  %p6620_p9 = scmp.lt.s32.totalorder %s10983_s22, %s11051_s8 }
 0x531   : > { %p6621_p10 = scmp.lt.s32.totalorder %s6619_s18, %s6615_s12 }
 0x532   : > { %p6617_p7 = pnand %p6616_p4, %p6751_p5 }
 0x533   : > { %p6622_p11 = por %p6621_p10, %p6620_p9 }
 0x534   : > { %p6618_p8 = pneg %p6617_p7 }
 0x536   : > { %p6623_p12 = pnand %p6622_p11, %p6618_p8 }
 0x538   : > { %6626 = shalt.err (!%p6623_p12)
}
 0x539   : > { %s6666_s21 = smov 128   ;;  %s6667_s24 = smov 8  }
 0x53a   : > { %6483 = dma.vmem_to_hbm [thread:$0]  (%p6751_p5), %s10985_s20, 4096, %s10983_s22, %s11003_s23, %s6666_s21, %s6666_s21, %s6667_s24  }
 0x53b PF: > { %p6489_p13 = scmp.ge.s32.totalorder %s6661_s30, 2  ;;  %s5602_s25 = sand.u32 1, %s6649_s27  }
 0x53c   : > { %s5603_s26 = scalar_lea.sflag [#allocation5], %s5602_s25 }
 0x53d   : > { %p6486_p0 = pnand %p6489_p13, %p6755_p6 }
 0x53f   : > { %p6487_p1 = pneg %p6486_p0 }
 0x541   : > { %6644 = dma.done.wait (%p6487_p1), %s5603_s26, 4096  }
 0x542   : > { %6646 = vsyncadd (%p6487_p1), %s5603_s26, 4294963200  ;;  %p18_p2 = scmp.ge.s32.totalorder %s6738_s11, 4   ;;  %s12005_s27 = smov %s6653_s28 }
 0x543   : > { %s12006_s28 = smov %s6657_s29  ;;  %s12007_s29 = smov %s6749_s14 }
 0x544   : > { %s12008_s30 = smov %s6738_s11  ;;  %20 = sbr.rel (!%p18_p2) target bundleno = 3 (0x3), region = 107 }
 0x549   :  { %5608 = vsyncpa [#allocation5], 1 }
 0x54a   :  { %5610 = vsyncpa [#allocation5 + $0x1], 1 }

</bundles_post_ra>
